<compile_context>
chip_gen: v7x
topology: tpu7x:2x2x1
jax: 0.10.0
libtpu: 0.0.40
codegen_flags: <defaults>
</compile_context>

<pallas_src>
import jax
import jax.numpy as jnp
from jax import lax
from jax.experimental import pallas as pl
from jax.experimental.pallas import tpu as pltpu

_LANES = 128
_IL = 8          # interior start column of the haloed buffer (sublane aligned)


def _pick_tile_h(H):
    for t in (32, 16, 8, 4, 2):
        if t <= H and H % t == 0:
            return t
    return H


def _const_spec(shape):
    """Grid-constant operand (weights/bias): fetched once, single-buffered."""
    imap = lambda n, s: (0,) * len(shape)
    try:
        return pl.BlockSpec(shape, imap, pipeline_mode=pl.Buffered(1))
    except (TypeError, AttributeError):       # older BlockSpec signature
        return pl.BlockSpec(shape, imap)


def residual_conv_unit(x_nhwc, w1_hwio, s1, b1, w2_hwio, s2, b2,
                       *, tile_h=None, compute_dtype=jnp.bfloat16):
    """x: (N,H,W,C) f32; w*: (3,3,Cin,Cout); s*/b*: per-channel affine (C,)."""
    N, H, W, C = x_nhwc.shape
    Cp = ((C + _LANES - 1) // _LANES) * _LANES
    TH = _pick_tile_h(H) if tile_h is None else tile_h
    # TODO(synk): pad H in the wrapper for strip sizes that do not divide H.
    assert H % TH == 0 and (TH >= 2 or TH == H), "tile_h must divide H, >= 2"
    S = H // TH
    # Haloed-buffer width: >=1 zero column each side of the interior; the
    # right edge is rounded up so the row pitch stays sublane-friendly.
    # (Best perf when W itself is a multiple of 8 so reshapes are free.)
    PW = _IL + ((W + 1 + 7) // 8) * 8
    cdt = jnp.dtype(compute_dtype)

    def prep_w(w, s):
        w = w * jnp.reshape(s, (1, 1, 1, C))                 # fold affine scale
        w = jnp.pad(w, ((0, 0), (0, 0), (0, Cp - C), (0, Cp - C)))
        return w.reshape(9, Cp, Cp).astype(cdt)              # tap-major blocks

    def prep_b(b):
        return jnp.pad(jnp.reshape(b, (1, C)), ((0, 0), (0, Cp - C)))  # f32

    xp = jnp.pad(x_nhwc, ((0, 0), (0, 0), (0, 0), (0, Cp - C)))

    def kernel(x_ref, xf_ref, w1_ref, b1_ref, w2_ref, b2_ref, o_ref,
               halo_ref, dsem, pad_ref, acc_ref):
        # x_ref   : (1, TH, W, Cp) f32   auto-pipelined strip (no halo)
        # xf_ref  : (N, H, W, Cp)  f32   raw HBM ref (pl.ANY), halo rows only
        # w*_ref  : (9, Cp, Cp)          per-tap weight blocks (scale folded)
        # b*_ref  : (1, Cp)        f32   bias
        # halo_ref: (4, W, Cp)     f32   DMA landing for top(0:2)/bottom(2:4)
        # pad_ref : (TH+4, PW, Cp)       haloed activations, interior [IL,IL+W)
        # acc_ref : ((TH+2)*W, Cp) f32   conv accumulator
        n = pl.program_id(0)
        s = pl.program_id(1)
        r0 = s * TH

        # 1-wide zero columns read by the dx=0 / dx=2 taps.  Redone every step
        # (cheap, and correct under megacore sharding of the grid).
        pad_ref[:, _IL - 1:_IL, :] = jnp.zeros((TH + 4, 1, Cp), cdt)
        pad_ref[:, _IL + W:_IL + W + 1, :] = jnp.zeros((TH + 4, 1, Cp), cdt)

        # Interior rows of conv1's input: relu(x) for this strip (matmul dtype).
        pad_ref[2:TH + 2, _IL:_IL + W, :] = (
            jnp.maximum(x_ref[0], 0.0).astype(cdt))

        # 2-row x halos above/below the strip: small DMA for interior strips,
        # zeros at the image boundary (== conv1's 'SAME' zero padding).
        if S > 1:
            @pl.when(s > 0)
            def _():
                cp = pltpu.make_async_copy(
                    xf_ref.at[n, pl.ds(r0 - 2, 2)], halo_ref.at[0:2],
                    dsem.at[0])
                cp.start()
                cp.wait()
                pad_ref[0:2, _IL:_IL + W, :] = (
                    jnp.maximum(halo_ref[0:2], 0.0).astype(cdt))

            @pl.when(s < S - 1)
            def _():
                cp = pltpu.make_async_copy(
                    xf_ref.at[n, pl.ds(r0 + TH, 2)], halo_ref.at[2:4],
                    dsem.at[1])
                cp.start()
                cp.wait()
                pad_ref[TH + 2:TH + 4, _IL:_IL + W, :] = (
                    jnp.maximum(halo_ref[2:4], 0.0).astype(cdt))

        @pl.when(s == 0)
        def _():
            pad_ref[0:2, _IL:_IL + W, :] = jnp.zeros((2, W, Cp), cdt)

        @pl.when(s == S - 1)
        def _():
            pad_ref[TH + 2:TH + 4, _IL:_IL + W, :] = jnp.zeros((2, W, Cp), cdt)

        def conv3x3(rows, w_ref, b_ref):
            # 'SAME' 3x3 conv of pad_ref rows [0, rows+2) -> `rows` output rows
            # (output row i reads pad rows i..i+2).  9 accumulating tap
            # matmuls; tap 0 seeds the accumulator with the bias.
            nr = rows * W
            for dy in range(3):
                for dx in range(3):
                    tap = dy * 3 + dx
                    patch = pad_ref[dy:dy + rows,
                                    _IL - 1 + dx:_IL - 1 + dx + W, :]
                    contrib = jnp.dot(patch.reshape(nr, Cp), w_ref[tap],
                                      preferred_element_type=jnp.float32)
                    if tap == 0:
                        acc_ref[0:nr, :] = contrib + b_ref[...]
                    else:
                        acc_ref[0:nr, :] += contrib
            return acc_ref[0:nr, :].reshape(rows, W, Cp)

        # conv1 over the TH+2 rows conv2 needs (strip halo recomputed locally).
        out1 = conv3x3(TH + 2, w1_ref, b1_ref)
        pad_ref[0:TH + 2, _IL:_IL + W, :] = (
            jnp.maximum(out1, 0.0).astype(cdt))

        # conv2's 'SAME' padding: out1 halo rows outside the image are zero.
        @pl.when(s == 0)
        def _():
            pad_ref[0:1, _IL:_IL + W, :] = jnp.zeros((1, W, Cp), cdt)

        @pl.when(s == S - 1)
        def _():
            pad_ref[TH + 1:TH + 2, _IL:_IL + W, :] = jnp.zeros((1, W, Cp), cdt)

        out2 = conv3x3(TH, w2_ref, b2_ref)
        # Residual skip with the pre-relu input; x_ref is re-read here (block
        # is already resident in VMEM) instead of holding it live across convs.
        o_ref[0] = (x_ref[0] + out2).astype(o_ref.dtype)

    # Explicit VMEM budget from the real footprint (weights counted at 2x in
    # case single-buffering is unavailable), floor 16 MiB, cap 64 MiB (v7x).
    cd_bytes = cdt.itemsize
    blk_bytes = TH * W * Cp * 4
    footprint = (4 * blk_bytes                         # x + out blocks, 2 bufs
                 + 2 * 2 * 9 * Cp * Cp * cd_bytes      # weights
                 + 2 * 2 * Cp * 4                      # biases
                 + 4 * W * Cp * 4                      # halo landing scratch
                 + (TH + 4) * PW * Cp * cd_bytes       # haloed activations
                 + (TH + 2) * W * Cp * 4)              # conv accumulator
    vmem_limit = int(min(64 * 2 ** 20, max(16 * 2 ** 20, 3 * footprint // 2)))

    out = pl.pallas_call(
        kernel,
        out_shape=jax.ShapeDtypeStruct((N, H, W, Cp), x_nhwc.dtype),
        grid_spec=pltpu.PrefetchScalarGridSpec(
            num_scalar_prefetch=0,
            grid=(N, S),
            in_specs=[
                pl.BlockSpec((1, TH, W, Cp), lambda n, s: (n, s, 0, 0)),  # x
                pl.BlockSpec(memory_space=pl.ANY),          # x again (halos)
                _const_spec((9, Cp, Cp)),                   # w1
                _const_spec((1, Cp)),                       # b1
                _const_spec((9, Cp, Cp)),                   # w2
                _const_spec((1, Cp)),                       # b2
            ],
            out_specs=pl.BlockSpec((1, TH, W, Cp), lambda n, s: (n, s, 0, 0)),
            scratch_shapes=[
                pltpu.VMEM((4, W, Cp), jnp.float32),            # halo rows
                pltpu.SemaphoreType.DMA((2,)),                  # halo DMA sems
                pltpu.VMEM((TH + 4, PW, Cp), cdt),              # haloed act
                pltpu.VMEM(((TH + 2) * W, Cp), jnp.float32),    # accumulator
            ],
        ),
        compiler_params=pltpu.CompilerParams(
            dimension_semantics=("parallel", "parallel"),
            vmem_limit_bytes=vmem_limit),
    )(xp, xp, prep_w(w1_hwio, s1), prep_b(b1), prep_w(w2_hwio, s2), prep_b(b2))

    return out[..., :C]


def _reference(x_nhwc, w1_hwio, s1, b1, w2_hwio, s2, b2):
    dn = ('NHWC', 'HWIO', 'NHWC')
    out = jnp.maximum(x_nhwc, 0.0)
    out = lax.conv_general_dilated(out, w1_hwio, (1, 1), 'SAME',
                                   dimension_numbers=dn)
    out = out * s1.reshape(1, 1, 1, -1) + b1.reshape(1, 1, 1, -1)
    out = jnp.maximum(out, 0.0)
    out = lax.conv_general_dilated(out, w2_hwio, (1, 1), 'SAME',
                                   dimension_numbers=dn)
    out = out * s2.reshape(1, 1, 1, -1) + b2.reshape(1, 1, 1, -1)
    return x_nhwc + out


if __name__ == "__main__":
    # ResidualConvUnit(in_dim=4, activation_func_name='relu', use_batch_norm=False)
    N, C, H, W = 2, 4, 16, 16
    key = jax.random.PRNGKey(0)
    kx, kw1, kb1, kw2, kb2 = jax.random.split(key, 5)

    # PyTorch-shaped parameters: conv weight (out, in, kh, kw), bias (out,).
    x_nchw = jax.random.normal(kx, (N, C, H, W), dtype=jnp.float32)
    w1_oihw = 0.1 * jax.random.normal(kw1, (C, C, 3, 3), dtype=jnp.float32)
    b1_conv = 0.1 * jax.random.normal(kb1, (C,), dtype=jnp.float32)
    w2_oihw = 0.1 * jax.random.normal(kw2, (C, C, 3, 3), dtype=jnp.float32)
    b2_conv = 0.1 * jax.random.normal(kb2, (C,), dtype=jnp.float32)

    # use_batch_norm=False -> identity scale, conv bias.
    # TODO(synk): for use_batch_norm=True (eval), fold BN into (s, b) here
    #   (s = gamma/sqrt(var+eps), b = beta - mean*s) and drop the conv bias.
    s1 = jnp.ones((C,), jnp.float32)
    s2 = jnp.ones((C,), jnp.float32)
    b1 = b1_conv
    b2 = b2_conv

    # NCHW -> NHWC, OIHW -> HWIO for the kernel.
    x_nhwc = jnp.transpose(x_nchw, (0, 2, 3, 1))
    w1_hwio = jnp.transpose(w1_oihw, (2, 3, 1, 0))
    w2_hwio = jnp.transpose(w2_oihw, (2, 3, 1, 0))

    ref = _reference(x_nhwc, w1_hwio, s1, b1, w2_hwio, s2, b2)

    # f32 matmul operands: tight check of the strip/halo/accumulation logic
    # (tile_h=8 -> 2 strips, exercises the manual halo DMA path).
    out_f32 = residual_conv_unit(x_nhwc, w1_hwio, s1, b1, w2_hwio, s2, b2,
                                 tile_h=8, compute_dtype=jnp.float32)
    out_f32 = jax.block_until_ready(out_f32)
    assert out_f32.shape == (N, H, W, C)
    assert jnp.allclose(out_f32, ref, atol=1e-4, rtol=1e-4), "f32 mismatch"

    # bf16 matmul operands (default / production path); per the perf review
    # the tolerance is loosened for bf16 operands with f32 accumulation.
    out_bf16 = residual_conv_unit(x_nhwc, w1_hwio, s1, b1, w2_hwio, s2, b2,
                                  tile_h=8)
    out_bf16 = jax.block_until_ready(out_bf16)
    assert out_bf16.shape == (N, H, W, C)
    assert jnp.allclose(out_bf16, ref, atol=5e-2, rtol=5e-2), "bf16 mismatch"

    print("KERNEL_OK")
</pallas_src>

<mosaic_0001>
module attributes {stable_mosaic.version = 11 : i64} {
  func.func @kernel(%arg0: i32, %arg1: i32, %arg2: memref<1x8x16x128xf32, #tpu.memory_space<vmem>>, %arg3: memref<2x16x16x128xf32, #tpu.memory_space<any>>, %arg4: memref<9x128x128xf32, #tpu.memory_space<vmem>>, %arg5: memref<1x128xf32, #tpu.memory_space<vmem>>, %arg6: memref<9x128x128xf32, #tpu.memory_space<vmem>>, %arg7: memref<1x128xf32, #tpu.memory_space<vmem>>, %arg8: memref<1x8x16x128xf32, #tpu.memory_space<vmem>>, %arg9: memref<4x16x128xf32, #tpu.memory_space<vmem>>, %arg10: memref<2x!tpu.dma_semaphore, #tpu.memory_space<semaphore_mem>>, %arg11: memref<12x32x128xf32, #tpu.memory_space<vmem>>, %arg12: memref<160x128xf32, #tpu.memory_space<vmem>>) attributes {dimension_semantics = [#tpu.dimension_semantics<parallel>, #tpu.dimension_semantics<parallel>], iteration_bounds = array<i64: 2, 2>, scalar_prefetch = 0 : i64, scratch_operands = 4 : i64, tpu.core_type = #tpu.core_type<tc>, window_params = [{transform_indices = @transform_0, window_bounds = array<i64: 1, 8, 16, 128>}, {}, {pipeline_mode = #tpu.pipeline_mode<synchronous>, transform_indices = @transform_2, window_bounds = array<i64: 9, 128, 128>}, {pipeline_mode = #tpu.pipeline_mode<synchronous>, transform_indices = @transform_3, window_bounds = array<i64: 1, 128>}, {pipeline_mode = #tpu.pipeline_mode<synchronous>, transform_indices = @transform_4, window_bounds = array<i64: 9, 128, 128>}, {pipeline_mode = #tpu.pipeline_mode<synchronous>, transform_indices = @transform_5, window_bounds = array<i64: 1, 128>}, {transform_indices = @transform_6, window_bounds = array<i64: 1, 8, 16, 128>}]} {
    %c8_i32 = arith.constant 8 : i32
    %0 = arith.muli %arg1, %c8_i32 : i32
    %cst = arith.constant 0.000000e+00 : f32
    %1 = vector.broadcast %cst : f32 to vector<12x1x128xf32>
    %c0 = arith.constant 0 : index
    %c7 = arith.constant 7 : index
    %c0_0 = arith.constant 0 : index
    %2 = vector.load %arg11[%c0, %c7, %c0_0] : memref<12x32x128xf32, #tpu.memory_space<vmem>>, vector<12x1x128xf32>
    tpu.vector_store %arg11[%c0, %c7, %c0_0], %1 {strides = array<i32>} : memref<12x32x128xf32, #tpu.memory_space<vmem>>, vector<12x1x128xf32>,
    %cst_1 = arith.constant 0.000000e+00 : f32
    %3 = vector.broadcast %cst_1 : f32 to vector<12x1x128xf32>
    %c0_2 = arith.constant 0 : index
    %c24 = arith.constant 24 : index
    %c0_3 = arith.constant 0 : index
    %4 = vector.load %arg11[%c0_2, %c24, %c0_3] : memref<12x32x128xf32, #tpu.memory_space<vmem>>, vector<12x1x128xf32>
    tpu.vector_store %arg11[%c0_2, %c24, %c0_3], %3 {strides = array<i32>} : memref<12x32x128xf32, #tpu.memory_space<vmem>>, vector<12x1x128xf32>,
    %c0_4 = arith.constant 0 : index
    %c0_5 = arith.constant 0 : index
    %c0_6 = arith.constant 0 : index
    %c0_7 = arith.constant 0 : index
    %5 = vector.load %arg2[%c0_4, %c0_5, %c0_6, %c0_7] : memref<1x8x16x128xf32, #tpu.memory_space<vmem>>, vector<1x8x16x128xf32>
    %6 = vector.shape_cast %5 : vector<1x8x16x128xf32> to vector<8x16x128xf32>
    %cst_8 = arith.constant 0.000000e+00 : f32
    %7 = vector.broadcast %cst_8 : f32 to vector<8x16x128xf32>
    %8 = arith.maximumf %6, %7 : vector<8x16x128xf32>
    %c2 = arith.constant 2 : index
    %c8 = arith.constant 8 : index
    %c0_9 = arith.constant 0 : index
    %9 = vector.load %arg11[%c2, %c8, %c0_9] : memref<12x32x128xf32, #tpu.memory_space<vmem>>, vector<8x16x128xf32>
    tpu.vector_store %arg11[%c2, %c8, %c0_9], %8 {strides = array<i32>} : memref<12x32x128xf32, #tpu.memory_space<vmem>>, vector<8x16x128xf32>,
    %c0_i32 = arith.constant 0 : i32
    %10 = arith.cmpi sgt, %arg1, %c0_i32 : i32
    %11 = arith.extui %10 : i1 to i32
    %c0_i32_10 = arith.constant 0 : i32
    %12 = arith.cmpi ne, %11, %c0_i32_10 : i32
    scf.if %12 {
      %c2_i32 = arith.constant 2 : i32
      %187 = arith.subi %0, %c2_i32 : i32
      %c0_i32_228 = arith.constant 0 : i32
      %c0_i32_229 = arith.constant 0 : i32
      %c0_i32_230 = arith.constant 0 : i32
      %188 = tpu.memref_slice %arg3[%arg0, %187, %c0_i32_229, %c0_i32_230] : memref<2x16x16x128xf32, #tpu.memory_space<any>> -> memref<1x2x16x128xf32, #tpu.memory_space<any>>
      %189 = tpu.memref_squeeze %188 : memref<1x2x16x128xf32, #tpu.memory_space<any>> -> memref<2x16x128xf32, #tpu.memory_space<any>>
      %c0_i32_231 = arith.constant 0 : i32
      %c0_i32_232 = arith.constant 0 : i32
      %c0_i32_233 = arith.constant 0 : i32
      %190 = tpu.memref_slice %arg9[%c0_i32_231, %c0_i32_232, %c0_i32_233] : memref<4x16x128xf32, #tpu.memory_space<vmem>> -> memref<2x16x128xf32, #tpu.memory_space<vmem>>
      %191 = tpu.memref_slice %arg10[%c0_i32_228] : memref<2x!tpu.dma_semaphore, #tpu.memory_space<semaphore_mem>> -> memref<1x!tpu.dma_semaphore, #tpu.memory_space<semaphore_mem>>
      %192 = tpu.memref_squeeze %191 : memref<1x!tpu.dma_semaphore, #tpu.memory_space<semaphore_mem>> -> memref<!tpu.dma_semaphore, #tpu.memory_space<semaphore_mem>>
      tpu.enqueue_dma source(%189 : memref<2x16x128xf32, #tpu.memory_space<any>>) target(%190 : memref<2x16x128xf32, #tpu.memory_space<vmem>>) target_semaphore(%192 : memref<!tpu.dma_semaphore, #tpu.memory_space<semaphore_mem>>)
      %c0_i32_234 = arith.constant 0 : i32
      %c0_i32_235 = arith.constant 0 : i32
      %c0_i32_236 = arith.constant 0 : i32
      %193 = tpu.memref_slice %arg3[%arg0, %187, %c0_i32_235, %c0_i32_236] : memref<2x16x16x128xf32, #tpu.memory_space<any>> -> memref<1x2x16x128xf32, #tpu.memory_space<any>>
      %194 = tpu.memref_squeeze %193 : memref<1x2x16x128xf32, #tpu.memory_space<any>> -> memref<2x16x128xf32, #tpu.memory_space<any>>
      %c0_i32_237 = arith.constant 0 : i32
      %c0_i32_238 = arith.constant 0 : i32
      %c0_i32_239 = arith.constant 0 : i32
      %195 = tpu.memref_slice %arg9[%c0_i32_237, %c0_i32_238, %c0_i32_239] : memref<4x16x128xf32, #tpu.memory_space<vmem>> -> memref<2x16x128xf32, #tpu.memory_space<vmem>>
      %196 = tpu.memref_slice %arg10[%c0_i32_234] : memref<2x!tpu.dma_semaphore, #tpu.memory_space<semaphore_mem>> -> memref<1x!tpu.dma_semaphore, #tpu.memory_space<semaphore_mem>>
      %197 = tpu.memref_squeeze %196 : memref<1x!tpu.dma_semaphore, #tpu.memory_space<semaphore_mem>> -> memref<!tpu.dma_semaphore, #tpu.memory_space<semaphore_mem>>
      tpu.wait_dma2 semaphore(%197 : memref<!tpu.dma_semaphore, #tpu.memory_space<semaphore_mem>>) src(%194 : memref<2x16x128xf32, #tpu.memory_space<any>>) dst(%195 : memref<2x16x128xf32, #tpu.memory_space<vmem>>)
      %c0_240 = arith.constant 0 : index
      %c0_241 = arith.constant 0 : index
      %c0_242 = arith.constant 0 : index
      %198 = vector.load %arg9[%c0_240, %c0_241, %c0_242] : memref<4x16x128xf32, #tpu.memory_space<vmem>>, vector<2x16x128xf32>
      %cst_243 = arith.constant 0.000000e+00 : f32
      %199 = vector.broadcast %cst_243 : f32 to vector<2x16x128xf32>
      %200 = arith.maximumf %198, %199 : vector<2x16x128xf32>
      %c0_244 = arith.constant 0 : index
      %c8_245 = arith.constant 8 : index
      %c0_246 = arith.constant 0 : index
      %201 = vector.load %arg11[%c0_244, %c8_245, %c0_246] : memref<12x32x128xf32, #tpu.memory_space<vmem>>, vector<2x16x128xf32>
      tpu.vector_store %arg11[%c0_244, %c8_245, %c0_246], %200 {strides = array<i32>} : memref<12x32x128xf32, #tpu.memory_space<vmem>>, vector<2x16x128xf32>,
    } else {
    }
    %c1_i32 = arith.constant 1 : i32
    %13 = arith.cmpi slt, %arg1, %c1_i32 : i32
    %14 = arith.extui %13 : i1 to i32
    %c0_i32_11 = arith.constant 0 : i32
    %15 = arith.cmpi ne, %14, %c0_i32_11 : i32
    scf.if %15 {
      %c8_i32_228 = arith.constant 8 : i32
      %187 = arith.addi %0, %c8_i32_228 : i32
      %c1_i32_229 = arith.constant 1 : i32
      %c0_i32_230 = arith.constant 0 : i32
      %c0_i32_231 = arith.constant 0 : i32
      %188 = tpu.memref_slice %arg3[%arg0, %187, %c0_i32_230, %c0_i32_231] : memref<2x16x16x128xf32, #tpu.memory_space<any>> -> memref<1x2x16x128xf32, #tpu.memory_space<any>>
      %189 = tpu.memref_squeeze %188 : memref<1x2x16x128xf32, #tpu.memory_space<any>> -> memref<2x16x128xf32, #tpu.memory_space<any>>
      %c2_i32 = arith.constant 2 : i32
      %c0_i32_232 = arith.constant 0 : i32
      %c0_i32_233 = arith.constant 0 : i32
      %190 = tpu.memref_slice %arg9[%c2_i32, %c0_i32_232, %c0_i32_233] : memref<4x16x128xf32, #tpu.memory_space<vmem>> -> memref<2x16x128xf32, #tpu.memory_space<vmem>>
      %191 = tpu.memref_slice %arg10[%c1_i32_229] : memref<2x!tpu.dma_semaphore, #tpu.memory_space<semaphore_mem>> -> memref<1x!tpu.dma_semaphore, #tpu.memory_space<semaphore_mem>>
      %192 = tpu.memref_squeeze %191 : memref<1x!tpu.dma_semaphore, #tpu.memory_space<semaphore_mem>> -> memref<!tpu.dma_semaphore, #tpu.memory_space<semaphore_mem>>
      tpu.enqueue_dma source(%189 : memref<2x16x128xf32, #tpu.memory_space<any>>) target(%190 : memref<2x16x128xf32, #tpu.memory_space<vmem>>) target_semaphore(%192 : memref<!tpu.dma_semaphore, #tpu.memory_space<semaphore_mem>>)
      %c1_i32_234 = arith.constant 1 : i32
      %c0_i32_235 = arith.constant 0 : i32
      %c0_i32_236 = arith.constant 0 : i32
      %193 = tpu.memref_slice %arg3[%arg0, %187, %c0_i32_235, %c0_i32_236] : memref<2x16x16x128xf32, #tpu.memory_space<any>> -> memref<1x2x16x128xf32, #tpu.memory_space<any>>
      %194 = tpu.memref_squeeze %193 : memref<1x2x16x128xf32, #tpu.memory_space<any>> -> memref<2x16x128xf32, #tpu.memory_space<any>>
      %c2_i32_237 = arith.constant 2 : i32
      %c0_i32_238 = arith.constant 0 : i32
      %c0_i32_239 = arith.constant 0 : i32
      %195 = tpu.memref_slice %arg9[%c2_i32_237, %c0_i32_238, %c0_i32_239] : memref<4x16x128xf32, #tpu.memory_space<vmem>> -> memref<2x16x128xf32, #tpu.memory_space<vmem>>
      %196 = tpu.memref_slice %arg10[%c1_i32_234] : memref<2x!tpu.dma_semaphore, #tpu.memory_space<semaphore_mem>> -> memref<1x!tpu.dma_semaphore, #tpu.memory_space<semaphore_mem>>
      %197 = tpu.memref_squeeze %196 : memref<1x!tpu.dma_semaphore, #tpu.memory_space<semaphore_mem>> -> memref<!tpu.dma_semaphore, #tpu.memory_space<semaphore_mem>>
      tpu.wait_dma2 semaphore(%197 : memref<!tpu.dma_semaphore, #tpu.memory_space<semaphore_mem>>) src(%194 : memref<2x16x128xf32, #tpu.memory_space<any>>) dst(%195 : memref<2x16x128xf32, #tpu.memory_space<vmem>>)
      %c2_240 = arith.constant 2 : index
      %c0_241 = arith.constant 0 : index
      %c0_242 = arith.constant 0 : index
      %198 = vector.load %arg9[%c2_240, %c0_241, %c0_242] : memref<4x16x128xf32, #tpu.memory_space<vmem>>, vector<2x16x128xf32>
      %cst_243 = arith.constant 0.000000e+00 : f32
      %199 = vector.broadcast %cst_243 : f32 to vector<2x16x128xf32>
      %200 = arith.maximumf %198, %199 : vector<2x16x128xf32>
      %c10 = arith.constant 10 : index
      %c8_244 = arith.constant 8 : index
      %c0_245 = arith.constant 0 : index
      %201 = vector.load %arg11[%c10, %c8_244, %c0_245] : memref<12x32x128xf32, #tpu.memory_space<vmem>>, vector<2x16x128xf32>
      tpu.vector_store %arg11[%c10, %c8_244, %c0_245], %200 {strides = array<i32>} : memref<12x32x128xf32, #tpu.memory_space<vmem>>, vector<2x16x128xf32>,
    } else {
    }
    %c0_i32_12 = arith.constant 0 : i32
    %16 = arith.cmpi eq, %arg1, %c0_i32_12 : i32
    %17 = arith.extui %16 : i1 to i32
    %c0_i32_13 = arith.constant 0 : i32
    %18 = arith.cmpi ne, %17, %c0_i32_13 : i32
    scf.if %18 {
      %cst_228 = arith.constant 0.000000e+00 : f32
      %187 = vector.broadcast %cst_228 : f32 to vector<2x16x128xf32>
      %c0_229 = arith.constant 0 : index
      %c8_230 = arith.constant 8 : index
      %c0_231 = arith.constant 0 : index
      %188 = vector.load %arg11[%c0_229, %c8_230, %c0_231] : memref<12x32x128xf32, #tpu.memory_space<vmem>>, vector<2x16x128xf32>
      tpu.vector_store %arg11[%c0_229, %c8_230, %c0_231], %187 {strides = array<i32>} : memref<12x32x128xf32, #tpu.memory_space<vmem>>, vector<2x16x128xf32>,
    } else {
    }
    %c1_i32_14 = arith.constant 1 : i32
    %19 = arith.cmpi eq, %arg1, %c1_i32_14 : i32
    %20 = arith.extui %19 : i1 to i32
    %c0_i32_15 = arith.constant 0 : i32
    %21 = arith.cmpi ne, %20, %c0_i32_15 : i32
    scf.if %21 {
      %cst_228 = arith.constant 0.000000e+00 : f32
      %187 = vector.broadcast %cst_228 : f32 to vector<2x16x128xf32>
      %c10 = arith.constant 10 : index
      %c8_229 = arith.constant 8 : index
      %c0_230 = arith.constant 0 : index
      %188 = vector.load %arg11[%c10, %c8_229, %c0_230] : memref<12x32x128xf32, #tpu.memory_space<vmem>>, vector<2x16x128xf32>
      tpu.vector_store %arg11[%c10, %c8_229, %c0_230], %187 {strides = array<i32>} : memref<12x32x128xf32, #tpu.memory_space<vmem>>, vector<2x16x128xf32>,
    } else {
    }
    %c0_16 = arith.constant 0 : index
    %c7_17 = arith.constant 7 : index
    %c0_18 = arith.constant 0 : index
    %22 = vector.load %arg11[%c0_16, %c7_17, %c0_18] : memref<12x32x128xf32, #tpu.memory_space<vmem>>, vector<10x16x128xf32>
    %23 = vector.shape_cast %22 : vector<10x16x128xf32> to vector<160x128xf32>
    %c0_19 = arith.constant 0 : index
    %c0_20 = arith.constant 0 : index
    %c0_21 = arith.constant 0 : index
    %24 = vector.load %arg4[%c0_19, %c0_20, %c0_21] : memref<9x128x128xf32, #tpu.memory_space<vmem>>, vector<1x128x128xf32>
    %25 = vector.shape_cast %24 : vector<1x128x128xf32> to vector<128x128xf32>
    %cst_22 = arith.constant dense<0.000000e+00> : vector<160x128xf32>
    %26 = tpu.matmul %23, %25, %cst_22 {dimension_numbers = #tpu.dot_dimension_numbers<[1], [0], [0], [1], [0, 0, 1, 1], [], []>} : vector<160x128xf32>, vector<128x128xf32>, vector<160x128xf32> -> vector<160x128xf32>
    %c0_23 = arith.constant 0 : index
    %c0_24 = arith.constant 0 : index
    %27 = vector.load %arg5[%c0_23, %c0_24] : memref<1x128xf32, #tpu.memory_space<vmem>>, vector<1x128xf32>
    %28 = vector.broadcast %27 : vector<1x128xf32> to vector<160x128xf32>
    %29 = arith.addf %26, %28 : vector<160x128xf32>
    %c0_25 = arith.constant 0 : index
    %c0_26 = arith.constant 0 : index
    %30 = vector.load %arg12[%c0_25, %c0_26] : memref<160x128xf32, #tpu.memory_space<vmem>>, vector<160x128xf32>
    tpu.vector_store %arg12[%c0_25, %c0_26], %29 {strides = array<i32>} : memref<160x128xf32, #tpu.memory_space<vmem>>, vector<160x128xf32>,
    %c0_27 = arith.constant 0 : index
    %c8_28 = arith.constant 8 : index
    %c0_29 = arith.constant 0 : index
    %31 = vector.load %arg11[%c0_27, %c8_28, %c0_29] : memref<12x32x128xf32, #tpu.memory_space<vmem>>, vector<10x16x128xf32>
    %32 = vector.shape_cast %31 : vector<10x16x128xf32> to vector<160x128xf32>
    %c1 = arith.constant 1 : index
    %c0_30 = arith.constant 0 : index
    %c0_31 = arith.constant 0 : index
    %33 = vector.load %arg4[%c1, %c0_30, %c0_31] : memref<9x128x128xf32, #tpu.memory_space<vmem>>, vector<1x128x128xf32>
    %34 = vector.shape_cast %33 : vector<1x128x128xf32> to vector<128x128xf32>
    %cst_32 = arith.constant dense<0.000000e+00> : vector<160x128xf32>
    %35 = tpu.matmul %32, %34, %cst_32 {dimension_numbers = #tpu.dot_dimension_numbers<[1], [0], [0], [1], [0, 0, 1, 1], [], []>} : vector<160x128xf32>, vector<128x128xf32>, vector<160x128xf32> -> vector<160x128xf32>
    %c0_33 = arith.constant 0 : index
    %c0_34 = arith.constant 0 : index
    %36 = vector.load %arg12[%c0_33, %c0_34] : memref<160x128xf32, #tpu.memory_space<vmem>>, vector<160x128xf32>
    %37 = arith.addf %36, %35 : vector<160x128xf32>
    %c0_35 = arith.constant 0 : index
    %c0_36 = arith.constant 0 : index
    %38 = vector.load %arg12[%c0_35, %c0_36] : memref<160x128xf32, #tpu.memory_space<vmem>>, vector<160x128xf32>
    tpu.vector_store %arg12[%c0_35, %c0_36], %37 {strides = array<i32>} : memref<160x128xf32, #tpu.memory_space<vmem>>, vector<160x128xf32>,
    %c0_37 = arith.constant 0 : index
    %c9 = arith.constant 9 : index
    %c0_38 = arith.constant 0 : index
    %39 = vector.load %arg11[%c0_37, %c9, %c0_38] : memref<12x32x128xf32, #tpu.memory_space<vmem>>, vector<10x16x128xf32>
    %40 = vector.shape_cast %39 : vector<10x16x128xf32> to vector<160x128xf32>
    %c2_39 = arith.constant 2 : index
    %c0_40 = arith.constant 0 : index
    %c0_41 = arith.constant 0 : index
    %41 = vector.load %arg4[%c2_39, %c0_40, %c0_41] : memref<9x128x128xf32, #tpu.memory_space<vmem>>, vector<1x128x128xf32>
    %42 = vector.shape_cast %41 : vector<1x128x128xf32> to vector<128x128xf32>
    %cst_42 = arith.constant dense<0.000000e+00> : vector<160x128xf32>
    %43 = tpu.matmul %40, %42, %cst_42 {dimension_numbers = #tpu.dot_dimension_numbers<[1], [0], [0], [1], [0, 0, 1, 1], [], []>} : vector<160x128xf32>, vector<128x128xf32>, vector<160x128xf32> -> vector<160x128xf32>
    %c0_43 = arith.constant 0 : index
    %c0_44 = arith.constant 0 : index
    %44 = vector.load %arg12[%c0_43, %c0_44] : memref<160x128xf32, #tpu.memory_space<vmem>>, vector<160x128xf32>
    %45 = arith.addf %44, %43 : vector<160x128xf32>
    %c0_45 = arith.constant 0 : index
    %c0_46 = arith.constant 0 : index
    %46 = vector.load %arg12[%c0_45, %c0_46] : memref<160x128xf32, #tpu.memory_space<vmem>>, vector<160x128xf32>
    tpu.vector_store %arg12[%c0_45, %c0_46], %45 {strides = array<i32>} : memref<160x128xf32, #tpu.memory_space<vmem>>, vector<160x128xf32>,
    %c1_47 = arith.constant 1 : index
    %c7_48 = arith.constant 7 : index
    %c0_49 = arith.constant 0 : index
    %47 = vector.load %arg11[%c1_47, %c7_48, %c0_49] : memref<12x32x128xf32, #tpu.memory_space<vmem>>, vector<10x16x128xf32>
    %48 = vector.shape_cast %47 : vector<10x16x128xf32> to vector<160x128xf32>
    %c3 = arith.constant 3 : index
    %c0_50 = arith.constant 0 : index
    %c0_51 = arith.constant 0 : index
    %49 = vector.load %arg4[%c3, %c0_50, %c0_51] : memref<9x128x128xf32, #tpu.memory_space<vmem>>, vector<1x128x128xf32>
    %50 = vector.shape_cast %49 : vector<1x128x128xf32> to vector<128x128xf32>
    %cst_52 = arith.constant dense<0.000000e+00> : vector<160x128xf32>
    %51 = tpu.matmul %48, %50, %cst_52 {dimension_numbers = #tpu.dot_dimension_numbers<[1], [0], [0], [1], [0, 0, 1, 1], [], []>} : vector<160x128xf32>, vector<128x128xf32>, vector<160x128xf32> -> vector<160x128xf32>
    %c0_53 = arith.constant 0 : index
    %c0_54 = arith.constant 0 : index
    %52 = vector.load %arg12[%c0_53, %c0_54] : memref<160x128xf32, #tpu.memory_space<vmem>>, vector<160x128xf32>
    %53 = arith.addf %52, %51 : vector<160x128xf32>
    %c0_55 = arith.constant 0 : index
    %c0_56 = arith.constant 0 : index
    %54 = vector.load %arg12[%c0_55, %c0_56] : memref<160x128xf32, #tpu.memory_space<vmem>>, vector<160x128xf32>
    tpu.vector_store %arg12[%c0_55, %c0_56], %53 {strides = array<i32>} : memref<160x128xf32, #tpu.memory_space<vmem>>, vector<160x128xf32>,
    %c1_57 = arith.constant 1 : index
    %c8_58 = arith.constant 8 : index
    %c0_59 = arith.constant 0 : index
    %55 = vector.load %arg11[%c1_57, %c8_58, %c0_59] : memref<12x32x128xf32, #tpu.memory_space<vmem>>, vector<10x16x128xf32>
    %56 = vector.shape_cast %55 : vector<10x16x128xf32> to vector<160x128xf32>
    %c4 = arith.constant 4 : index
    %c0_60 = arith.constant 0 : index
    %c0_61 = arith.constant 0 : index
    %57 = vector.load %arg4[%c4, %c0_60, %c0_61] : memref<9x128x128xf32, #tpu.memory_space<vmem>>, vector<1x128x128xf32>
    %58 = vector.shape_cast %57 : vector<1x128x128xf32> to vector<128x128xf32>
    %cst_62 = arith.constant dense<0.000000e+00> : vector<160x128xf32>
    %59 = tpu.matmul %56, %58, %cst_62 {dimension_numbers = #tpu.dot_dimension_numbers<[1], [0], [0], [1], [0, 0, 1, 1], [], []>} : vector<160x128xf32>, vector<128x128xf32>, vector<160x128xf32> -> vector<160x128xf32>
    %c0_63 = arith.constant 0 : index
    %c0_64 = arith.constant 0 : index
    %60 = vector.load %arg12[%c0_63, %c0_64] : memref<160x128xf32, #tpu.memory_space<vmem>>, vector<160x128xf32>
    %61 = arith.addf %60, %59 : vector<160x128xf32>
    %c0_65 = arith.constant 0 : index
    %c0_66 = arith.constant 0 : index
    %62 = vector.load %arg12[%c0_65, %c0_66] : memref<160x128xf32, #tpu.memory_space<vmem>>, vector<160x128xf32>
    tpu.vector_store %arg12[%c0_65, %c0_66], %61 {strides = array<i32>} : memref<160x128xf32, #tpu.memory_space<vmem>>, vector<160x128xf32>,
    %c1_67 = arith.constant 1 : index
    %c9_68 = arith.constant 9 : index
    %c0_69 = arith.constant 0 : index
    %63 = vector.load %arg11[%c1_67, %c9_68, %c0_69] : memref<12x32x128xf32, #tpu.memory_space<vmem>>, vector<10x16x128xf32>
    %64 = vector.shape_cast %63 : vector<10x16x128xf32> to vector<160x128xf32>
    %c5 = arith.constant 5 : index
    %c0_70 = arith.constant 0 : index
    %c0_71 = arith.constant 0 : index
    %65 = vector.load %arg4[%c5, %c0_70, %c0_71] : memref<9x128x128xf32, #tpu.memory_space<vmem>>, vector<1x128x128xf32>
    %66 = vector.shape_cast %65 : vector<1x128x128xf32> to vector<128x128xf32>
    %cst_72 = arith.constant dense<0.000000e+00> : vector<160x128xf32>
    %67 = tpu.matmul %64, %66, %cst_72 {dimension_numbers = #tpu.dot_dimension_numbers<[1], [0], [0], [1], [0, 0, 1, 1], [], []>} : vector<160x128xf32>, vector<128x128xf32>, vector<160x128xf32> -> vector<160x128xf32>
    %c0_73 = arith.constant 0 : index
    %c0_74 = arith.constant 0 : index
    %68 = vector.load %arg12[%c0_73, %c0_74] : memref<160x128xf32, #tpu.memory_space<vmem>>, vector<160x128xf32>
    %69 = arith.addf %68, %67 : vector<160x128xf32>
    %c0_75 = arith.constant 0 : index
    %c0_76 = arith.constant 0 : index
    %70 = vector.load %arg12[%c0_75, %c0_76] : memref<160x128xf32, #tpu.memory_space<vmem>>, vector<160x128xf32>
    tpu.vector_store %arg12[%c0_75, %c0_76], %69 {strides = array<i32>} : memref<160x128xf32, #tpu.memory_space<vmem>>, vector<160x128xf32>,
    %c2_77 = arith.constant 2 : index
    %c7_78 = arith.constant 7 : index
    %c0_79 = arith.constant 0 : index
    %71 = vector.load %arg11[%c2_77, %c7_78, %c0_79] : memref<12x32x128xf32, #tpu.memory_space<vmem>>, vector<10x16x128xf32>
    %72 = vector.shape_cast %71 : vector<10x16x128xf32> to vector<160x128xf32>
    %c6 = arith.constant 6 : index
    %c0_80 = arith.constant 0 : index
    %c0_81 = arith.constant 0 : index
    %73 = vector.load %arg4[%c6, %c0_80, %c0_81] : memref<9x128x128xf32, #tpu.memory_space<vmem>>, vector<1x128x128xf32>
    %74 = vector.shape_cast %73 : vector<1x128x128xf32> to vector<128x128xf32>
    %cst_82 = arith.constant dense<0.000000e+00> : vector<160x128xf32>
    %75 = tpu.matmul %72, %74, %cst_82 {dimension_numbers = #tpu.dot_dimension_numbers<[1], [0], [0], [1], [0, 0, 1, 1], [], []>} : vector<160x128xf32>, vector<128x128xf32>, vector<160x128xf32> -> vector<160x128xf32>
    %c0_83 = arith.constant 0 : index
    %c0_84 = arith.constant 0 : index
    %76 = vector.load %arg12[%c0_83, %c0_84] : memref<160x128xf32, #tpu.memory_space<vmem>>, vector<160x128xf32>
    %77 = arith.addf %76, %75 : vector<160x128xf32>
    %c0_85 = arith.constant 0 : index
    %c0_86 = arith.constant 0 : index
    %78 = vector.load %arg12[%c0_85, %c0_86] : memref<160x128xf32, #tpu.memory_space<vmem>>, vector<160x128xf32>
    tpu.vector_store %arg12[%c0_85, %c0_86], %77 {strides = array<i32>} : memref<160x128xf32, #tpu.memory_space<vmem>>, vector<160x128xf32>,
    %c2_87 = arith.constant 2 : index
    %c8_88 = arith.constant 8 : index
    %c0_89 = arith.constant 0 : index
    %79 = vector.load %arg11[%c2_87, %c8_88, %c0_89] : memref<12x32x128xf32, #tpu.memory_space<vmem>>, vector<10x16x128xf32>
    %80 = vector.shape_cast %79 : vector<10x16x128xf32> to vector<160x128xf32>
    %c7_90 = arith.constant 7 : index
    %c0_91 = arith.constant 0 : index
    %c0_92 = arith.constant 0 : index
    %81 = vector.load %arg4[%c7_90, %c0_91, %c0_92] : memref<9x128x128xf32, #tpu.memory_space<vmem>>, vector<1x128x128xf32>
    %82 = vector.shape_cast %81 : vector<1x128x128xf32> to vector<128x128xf32>
    %cst_93 = arith.constant dense<0.000000e+00> : vector<160x128xf32>
    %83 = tpu.matmul %80, %82, %cst_93 {dimension_numbers = #tpu.dot_dimension_numbers<[1], [0], [0], [1], [0, 0, 1, 1], [], []>} : vector<160x128xf32>, vector<128x128xf32>, vector<160x128xf32> -> vector<160x128xf32>
    %c0_94 = arith.constant 0 : index
    %c0_95 = arith.constant 0 : index
    %84 = vector.load %arg12[%c0_94, %c0_95] : memref<160x128xf32, #tpu.memory_space<vmem>>, vector<160x128xf32>
    %85 = arith.addf %84, %83 : vector<160x128xf32>
    %c0_96 = arith.constant 0 : index
    %c0_97 = arith.constant 0 : index
    %86 = vector.load %arg12[%c0_96, %c0_97] : memref<160x128xf32, #tpu.memory_space<vmem>>, vector<160x128xf32>
    tpu.vector_store %arg12[%c0_96, %c0_97], %85 {strides = array<i32>} : memref<160x128xf32, #tpu.memory_space<vmem>>, vector<160x128xf32>,
    %c2_98 = arith.constant 2 : index
    %c9_99 = arith.constant 9 : index
    %c0_100 = arith.constant 0 : index
    %87 = vector.load %arg11[%c2_98, %c9_99, %c0_100] : memref<12x32x128xf32, #tpu.memory_space<vmem>>, vector<10x16x128xf32>
    %88 = vector.shape_cast %87 : vector<10x16x128xf32> to vector<160x128xf32>
    %c8_101 = arith.constant 8 : index
    %c0_102 = arith.constant 0 : index
    %c0_103 = arith.constant 0 : index
    %89 = vector.load %arg4[%c8_101, %c0_102, %c0_103] : memref<9x128x128xf32, #tpu.memory_space<vmem>>, vector<1x128x128xf32>
    %90 = vector.shape_cast %89 : vector<1x128x128xf32> to vector<128x128xf32>
    %cst_104 = arith.constant dense<0.000000e+00> : vector<160x128xf32>
    %91 = tpu.matmul %88, %90, %cst_104 {dimension_numbers = #tpu.dot_dimension_numbers<[1], [0], [0], [1], [0, 0, 1, 1], [], []>} : vector<160x128xf32>, vector<128x128xf32>, vector<160x128xf32> -> vector<160x128xf32>
    %c0_105 = arith.constant 0 : index
    %c0_106 = arith.constant 0 : index
    %92 = vector.load %arg12[%c0_105, %c0_106] : memref<160x128xf32, #tpu.memory_space<vmem>>, vector<160x128xf32>
    %93 = arith.addf %92, %91 : vector<160x128xf32>
    %c0_107 = arith.constant 0 : index
    %c0_108 = arith.constant 0 : index
    %94 = vector.load %arg12[%c0_107, %c0_108] : memref<160x128xf32, #tpu.memory_space<vmem>>, vector<160x128xf32>
    tpu.vector_store %arg12[%c0_107, %c0_108], %93 {strides = array<i32>} : memref<160x128xf32, #tpu.memory_space<vmem>>, vector<160x128xf32>,
    %c0_109 = arith.constant 0 : index
    %c0_110 = arith.constant 0 : index
    %95 = vector.load %arg12[%c0_109, %c0_110] : memref<160x128xf32, #tpu.memory_space<vmem>>, vector<160x128xf32>
    %96 = vector.shape_cast %95 : vector<160x128xf32> to vector<10x16x128xf32>
    %cst_111 = arith.constant 0.000000e+00 : f32
    %97 = vector.broadcast %cst_111 : f32 to vector<10x16x128xf32>
    %98 = arith.maximumf %96, %97 : vector<10x16x128xf32>
    %c0_112 = arith.constant 0 : index
    %c8_113 = arith.constant 8 : index
    %c0_114 = arith.constant 0 : index
    %99 = vector.load %arg11[%c0_112, %c8_113, %c0_114] : memref<12x32x128xf32, #tpu.memory_space<vmem>>, vector<10x16x128xf32>
    tpu.vector_store %arg11[%c0_112, %c8_113, %c0_114], %98 {strides = array<i32>} : memref<12x32x128xf32, #tpu.memory_space<vmem>>, vector<10x16x128xf32>,
    %c0_i32_115 = arith.constant 0 : i32
    %100 = arith.cmpi eq, %arg1, %c0_i32_115 : i32
    %101 = arith.extui %100 : i1 to i32
    %c0_i32_116 = arith.constant 0 : i32
    %102 = arith.cmpi ne, %101, %c0_i32_116 : i32
    scf.if %102 {
      %cst_228 = arith.constant 0.000000e+00 : f32
      %187 = vector.broadcast %cst_228 : f32 to vector<1x16x128xf32>
      %c0_229 = arith.constant 0 : index
      %c8_230 = arith.constant 8 : index
      %c0_231 = arith.constant 0 : index
      %188 = vector.load %arg11[%c0_229, %c8_230, %c0_231] : memref<12x32x128xf32, #tpu.memory_space<vmem>>, vector<1x16x128xf32>
      tpu.vector_store %arg11[%c0_229, %c8_230, %c0_231], %187 {strides = array<i32>} : memref<12x32x128xf32, #tpu.memory_space<vmem>>, vector<1x16x128xf32>,
    } else {
    }
    %c1_i32_117 = arith.constant 1 : i32
    %103 = arith.cmpi eq, %arg1, %c1_i32_117 : i32
    %104 = arith.extui %103 : i1 to i32
    %c0_i32_118 = arith.constant 0 : i32
    %105 = arith.cmpi ne, %104, %c0_i32_118 : i32
    scf.if %105 {
      %cst_228 = arith.constant 0.000000e+00 : f32
      %187 = vector.broadcast %cst_228 : f32 to vector<1x16x128xf32>
      %c9_229 = arith.constant 9 : index
      %c8_230 = arith.constant 8 : index
      %c0_231 = arith.constant 0 : index
      %188 = vector.load %arg11[%c9_229, %c8_230, %c0_231] : memref<12x32x128xf32, #tpu.memory_space<vmem>>, vector<1x16x128xf32>
      tpu.vector_store %arg11[%c9_229, %c8_230, %c0_231], %187 {strides = array<i32>} : memref<12x32x128xf32, #tpu.memory_space<vmem>>, vector<1x16x128xf32>,
    } else {
    }
    %c0_119 = arith.constant 0 : index
    %c7_120 = arith.constant 7 : index
    %c0_121 = arith.constant 0 : index
    %106 = vector.load %arg11[%c0_119, %c7_120, %c0_121] : memref<12x32x128xf32, #tpu.memory_space<vmem>>, vector<8x16x128xf32>
    %107 = vector.shape_cast %106 : vector<8x16x128xf32> to vector<128x128xf32>
    %c0_122 = arith.constant 0 : index
    %c0_123 = arith.constant 0 : index
    %c0_124 = arith.constant 0 : index
    %108 = vector.load %arg6[%c0_122, %c0_123, %c0_124] : memref<9x128x128xf32, #tpu.memory_space<vmem>>, vector<1x128x128xf32>
    %109 = vector.shape_cast %108 : vector<1x128x128xf32> to vector<128x128xf32>
    %cst_125 = arith.constant dense<0.000000e+00> : vector<128x128xf32>
    %110 = tpu.matmul %107, %109, %cst_125 {dimension_numbers = #tpu.dot_dimension_numbers<[1], [0], [0], [1], [0, 0, 1, 1], [], []>} : vector<128x128xf32>, vector<128x128xf32>, vector<128x128xf32> -> vector<128x128xf32>
    %c0_126 = arith.constant 0 : index
    %c0_127 = arith.constant 0 : index
    %111 = vector.load %arg7[%c0_126, %c0_127] : memref<1x128xf32, #tpu.memory_space<vmem>>, vector<1x128xf32>
    %112 = vector.broadcast %111 : vector<1x128xf32> to vector<128x128xf32>
    %113 = arith.addf %110, %112 : vector<128x128xf32>
    %c0_128 = arith.constant 0 : index
    %c0_129 = arith.constant 0 : index
    %114 = vector.load %arg12[%c0_128, %c0_129] : memref<160x128xf32, #tpu.memory_space<vmem>>, vector<128x128xf32>
    tpu.vector_store %arg12[%c0_128, %c0_129], %113 {strides = array<i32>} : memref<160x128xf32, #tpu.memory_space<vmem>>, vector<128x128xf32>,
    %c0_130 = arith.constant 0 : index
    %c8_131 = arith.constant 8 : index
    %c0_132 = arith.constant 0 : index
    %115 = vector.load %arg11[%c0_130, %c8_131, %c0_132] : memref<12x32x128xf32, #tpu.memory_space<vmem>>, vector<8x16x128xf32>
    %116 = vector.shape_cast %115 : vector<8x16x128xf32> to vector<128x128xf32>
    %c1_133 = arith.constant 1 : index
    %c0_134 = arith.constant 0 : index
    %c0_135 = arith.constant 0 : index
    %117 = vector.load %arg6[%c1_133, %c0_134, %c0_135] : memref<9x128x128xf32, #tpu.memory_space<vmem>>, vector<1x128x128xf32>
    %118 = vector.shape_cast %117 : vector<1x128x128xf32> to vector<128x128xf32>
    %cst_136 = arith.constant dense<0.000000e+00> : vector<128x128xf32>
    %119 = tpu.matmul %116, %118, %cst_136 {dimension_numbers = #tpu.dot_dimension_numbers<[1], [0], [0], [1], [0, 0, 1, 1], [], []>} : vector<128x128xf32>, vector<128x128xf32>, vector<128x128xf32> -> vector<128x128xf32>
    %c0_137 = arith.constant 0 : index
    %c0_138 = arith.constant 0 : index
    %120 = vector.load %arg12[%c0_137, %c0_138] : memref<160x128xf32, #tpu.memory_space<vmem>>, vector<128x128xf32>
    %121 = arith.addf %120, %119 : vector<128x128xf32>
    %c0_139 = arith.constant 0 : index
    %c0_140 = arith.constant 0 : index
    %122 = vector.load %arg12[%c0_139, %c0_140] : memref<160x128xf32, #tpu.memory_space<vmem>>, vector<128x128xf32>
    tpu.vector_store %arg12[%c0_139, %c0_140], %121 {strides = array<i32>} : memref<160x128xf32, #tpu.memory_space<vmem>>, vector<128x128xf32>,
    %c0_141 = arith.constant 0 : index
    %c9_142 = arith.constant 9 : index
    %c0_143 = arith.constant 0 : index
    %123 = vector.load %arg11[%c0_141, %c9_142, %c0_143] : memref<12x32x128xf32, #tpu.memory_space<vmem>>, vector<8x16x128xf32>
    %124 = vector.shape_cast %123 : vector<8x16x128xf32> to vector<128x128xf32>
    %c2_144 = arith.constant 2 : index
    %c0_145 = arith.constant 0 : index
    %c0_146 = arith.constant 0 : index
    %125 = vector.load %arg6[%c2_144, %c0_145, %c0_146] : memref<9x128x128xf32, #tpu.memory_space<vmem>>, vector<1x128x128xf32>
    %126 = vector.shape_cast %125 : vector<1x128x128xf32> to vector<128x128xf32>
    %cst_147 = arith.constant dense<0.000000e+00> : vector<128x128xf32>
    %127 = tpu.matmul %124, %126, %cst_147 {dimension_numbers = #tpu.dot_dimension_numbers<[1], [0], [0], [1], [0, 0, 1, 1], [], []>} : vector<128x128xf32>, vector<128x128xf32>, vector<128x128xf32> -> vector<128x128xf32>
    %c0_148 = arith.constant 0 : index
    %c0_149 = arith.constant 0 : index
    %128 = vector.load %arg12[%c0_148, %c0_149] : memref<160x128xf32, #tpu.memory_space<vmem>>, vector<128x128xf32>
    %129 = arith.addf %128, %127 : vector<128x128xf32>
    %c0_150 = arith.constant 0 : index
    %c0_151 = arith.constant 0 : index
    %130 = vector.load %arg12[%c0_150, %c0_151] : memref<160x128xf32, #tpu.memory_space<vmem>>, vector<128x128xf32>
    tpu.vector_store %arg12[%c0_150, %c0_151], %129 {strides = array<i32>} : memref<160x128xf32, #tpu.memory_space<vmem>>, vector<128x128xf32>,
    %c1_152 = arith.constant 1 : index
    %c7_153 = arith.constant 7 : index
    %c0_154 = arith.constant 0 : index
    %131 = vector.load %arg11[%c1_152, %c7_153, %c0_154] : memref<12x32x128xf32, #tpu.memory_space<vmem>>, vector<8x16x128xf32>
    %132 = vector.shape_cast %131 : vector<8x16x128xf32> to vector<128x128xf32>
    %c3_155 = arith.constant 3 : index
    %c0_156 = arith.constant 0 : index
    %c0_157 = arith.constant 0 : index
    %133 = vector.load %arg6[%c3_155, %c0_156, %c0_157] : memref<9x128x128xf32, #tpu.memory_space<vmem>>, vector<1x128x128xf32>
    %134 = vector.shape_cast %133 : vector<1x128x128xf32> to vector<128x128xf32>
    %cst_158 = arith.constant dense<0.000000e+00> : vector<128x128xf32>
    %135 = tpu.matmul %132, %134, %cst_158 {dimension_numbers = #tpu.dot_dimension_numbers<[1], [0], [0], [1], [0, 0, 1, 1], [], []>} : vector<128x128xf32>, vector<128x128xf32>, vector<128x128xf32> -> vector<128x128xf32>
    %c0_159 = arith.constant 0 : index
    %c0_160 = arith.constant 0 : index
    %136 = vector.load %arg12[%c0_159, %c0_160] : memref<160x128xf32, #tpu.memory_space<vmem>>, vector<128x128xf32>
    %137 = arith.addf %136, %135 : vector<128x128xf32>
    %c0_161 = arith.constant 0 : index
    %c0_162 = arith.constant 0 : index
    %138 = vector.load %arg12[%c0_161, %c0_162] : memref<160x128xf32, #tpu.memory_space<vmem>>, vector<128x128xf32>
    tpu.vector_store %arg12[%c0_161, %c0_162], %137 {strides = array<i32>} : memref<160x128xf32, #tpu.memory_space<vmem>>, vector<128x128xf32>,
    %c1_163 = arith.constant 1 : index
    %c8_164 = arith.constant 8 : index
    %c0_165 = arith.constant 0 : index
    %139 = vector.load %arg11[%c1_163, %c8_164, %c0_165] : memref<12x32x128xf32, #tpu.memory_space<vmem>>, vector<8x16x128xf32>
    %140 = vector.shape_cast %139 : vector<8x16x128xf32> to vector<128x128xf32>
    %c4_166 = arith.constant 4 : index
    %c0_167 = arith.constant 0 : index
    %c0_168 = arith.constant 0 : index
    %141 = vector.load %arg6[%c4_166, %c0_167, %c0_168] : memref<9x128x128xf32, #tpu.memory_space<vmem>>, vector<1x128x128xf32>
    %142 = vector.shape_cast %141 : vector<1x128x128xf32> to vector<128x128xf32>
    %cst_169 = arith.constant dense<0.000000e+00> : vector<128x128xf32>
    %143 = tpu.matmul %140, %142, %cst_169 {dimension_numbers = #tpu.dot_dimension_numbers<[1], [0], [0], [1], [0, 0, 1, 1], [], []>} : vector<128x128xf32>, vector<128x128xf32>, vector<128x128xf32> -> vector<128x128xf32>
    %c0_170 = arith.constant 0 : index
    %c0_171 = arith.constant 0 : index
    %144 = vector.load %arg12[%c0_170, %c0_171] : memref<160x128xf32, #tpu.memory_space<vmem>>, vector<128x128xf32>
    %145 = arith.addf %144, %143 : vector<128x128xf32>
    %c0_172 = arith.constant 0 : index
    %c0_173 = arith.constant 0 : index
    %146 = vector.load %arg12[%c0_172, %c0_173] : memref<160x128xf32, #tpu.memory_space<vmem>>, vector<128x128xf32>
    tpu.vector_store %arg12[%c0_172, %c0_173], %145 {strides = array<i32>} : memref<160x128xf32, #tpu.memory_space<vmem>>, vector<128x128xf32>,
    %c1_174 = arith.constant 1 : index
    %c9_175 = arith.constant 9 : index
    %c0_176 = arith.constant 0 : index
    %147 = vector.load %arg11[%c1_174, %c9_175, %c0_176] : memref<12x32x128xf32, #tpu.memory_space<vmem>>, vector<8x16x128xf32>
    %148 = vector.shape_cast %147 : vector<8x16x128xf32> to vector<128x128xf32>
    %c5_177 = arith.constant 5 : index
    %c0_178 = arith.constant 0 : index
    %c0_179 = arith.constant 0 : index
    %149 = vector.load %arg6[%c5_177, %c0_178, %c0_179] : memref<9x128x128xf32, #tpu.memory_space<vmem>>, vector<1x128x128xf32>
    %150 = vector.shape_cast %149 : vector<1x128x128xf32> to vector<128x128xf32>
    %cst_180 = arith.constant dense<0.000000e+00> : vector<128x128xf32>
    %151 = tpu.matmul %148, %150, %cst_180 {dimension_numbers = #tpu.dot_dimension_numbers<[1], [0], [0], [1], [0, 0, 1, 1], [], []>} : vector<128x128xf32>, vector<128x128xf32>, vector<128x128xf32> -> vector<128x128xf32>
    %c0_181 = arith.constant 0 : index
    %c0_182 = arith.constant 0 : index
    %152 = vector.load %arg12[%c0_181, %c0_182] : memref<160x128xf32, #tpu.memory_space<vmem>>, vector<128x128xf32>
    %153 = arith.addf %152, %151 : vector<128x128xf32>
    %c0_183 = arith.constant 0 : index
    %c0_184 = arith.constant 0 : index
    %154 = vector.load %arg12[%c0_183, %c0_184] : memref<160x128xf32, #tpu.memory_space<vmem>>, vector<128x128xf32>
    tpu.vector_store %arg12[%c0_183, %c0_184], %153 {strides = array<i32>} : memref<160x128xf32, #tpu.memory_space<vmem>>, vector<128x128xf32>,
    %c2_185 = arith.constant 2 : index
    %c7_186 = arith.constant 7 : index
    %c0_187 = arith.constant 0 : index
    %155 = vector.load %arg11[%c2_185, %c7_186, %c0_187] : memref<12x32x128xf32, #tpu.memory_space<vmem>>, vector<8x16x128xf32>
    %156 = vector.shape_cast %155 : vector<8x16x128xf32> to vector<128x128xf32>
    %c6_188 = arith.constant 6 : index
    %c0_189 = arith.constant 0 : index
    %c0_190 = arith.constant 0 : index
    %157 = vector.load %arg6[%c6_188, %c0_189, %c0_190] : memref<9x128x128xf32, #tpu.memory_space<vmem>>, vector<1x128x128xf32>
    %158 = vector.shape_cast %157 : vector<1x128x128xf32> to vector<128x128xf32>
    %cst_191 = arith.constant dense<0.000000e+00> : vector<128x128xf32>
    %159 = tpu.matmul %156, %158, %cst_191 {dimension_numbers = #tpu.dot_dimension_numbers<[1], [0], [0], [1], [0, 0, 1, 1], [], []>} : vector<128x128xf32>, vector<128x128xf32>, vector<128x128xf32> -> vector<128x128xf32>
    %c0_192 = arith.constant 0 : index
    %c0_193 = arith.constant 0 : index
    %160 = vector.load %arg12[%c0_192, %c0_193] : memref<160x128xf32, #tpu.memory_space<vmem>>, vector<128x128xf32>
    %161 = arith.addf %160, %159 : vector<128x128xf32>
    %c0_194 = arith.constant 0 : index
    %c0_195 = arith.constant 0 : index
    %162 = vector.load %arg12[%c0_194, %c0_195] : memref<160x128xf32, #tpu.memory_space<vmem>>, vector<128x128xf32>
    tpu.vector_store %arg12[%c0_194, %c0_195], %161 {strides = array<i32>} : memref<160x128xf32, #tpu.memory_space<vmem>>, vector<128x128xf32>,
    %c2_196 = arith.constant 2 : index
    %c8_197 = arith.constant 8 : index
    %c0_198 = arith.constant 0 : index
    %163 = vector.load %arg11[%c2_196, %c8_197, %c0_198] : memref<12x32x128xf32, #tpu.memory_space<vmem>>, vector<8x16x128xf32>
    %164 = vector.shape_cast %163 : vector<8x16x128xf32> to vector<128x128xf32>
    %c7_199 = arith.constant 7 : index
    %c0_200 = arith.constant 0 : index
    %c0_201 = arith.constant 0 : index
    %165 = vector.load %arg6[%c7_199, %c0_200, %c0_201] : memref<9x128x128xf32, #tpu.memory_space<vmem>>, vector<1x128x128xf32>
    %166 = vector.shape_cast %165 : vector<1x128x128xf32> to vector<128x128xf32>
    %cst_202 = arith.constant dense<0.000000e+00> : vector<128x128xf32>
    %167 = tpu.matmul %164, %166, %cst_202 {dimension_numbers = #tpu.dot_dimension_numbers<[1], [0], [0], [1], [0, 0, 1, 1], [], []>} : vector<128x128xf32>, vector<128x128xf32>, vector<128x128xf32> -> vector<128x128xf32>
    %c0_203 = arith.constant 0 : index
    %c0_204 = arith.constant 0 : index
    %168 = vector.load %arg12[%c0_203, %c0_204] : memref<160x128xf32, #tpu.memory_space<vmem>>, vector<128x128xf32>
    %169 = arith.addf %168, %167 : vector<128x128xf32>
    %c0_205 = arith.constant 0 : index
    %c0_206 = arith.constant 0 : index
    %170 = vector.load %arg12[%c0_205, %c0_206] : memref<160x128xf32, #tpu.memory_space<vmem>>, vector<128x128xf32>
    tpu.vector_store %arg12[%c0_205, %c0_206], %169 {strides = array<i32>} : memref<160x128xf32, #tpu.memory_space<vmem>>, vector<128x128xf32>,
    %c2_207 = arith.constant 2 : index
    %c9_208 = arith.constant 9 : index
    %c0_209 = arith.constant 0 : index
    %171 = vector.load %arg11[%c2_207, %c9_208, %c0_209] : memref<12x32x128xf32, #tpu.memory_space<vmem>>, vector<8x16x128xf32>
    %172 = vector.shape_cast %171 : vector<8x16x128xf32> to vector<128x128xf32>
    %c8_210 = arith.constant 8 : index
    %c0_211 = arith.constant 0 : index
    %c0_212 = arith.constant 0 : index
    %173 = vector.load %arg6[%c8_210, %c0_211, %c0_212] : memref<9x128x128xf32, #tpu.memory_space<vmem>>, vector<1x128x128xf32>
    %174 = vector.shape_cast %173 : vector<1x128x128xf32> to vector<128x128xf32>
    %cst_213 = arith.constant dense<0.000000e+00> : vector<128x128xf32>
    %175 = tpu.matmul %172, %174, %cst_213 {dimension_numbers = #tpu.dot_dimension_numbers<[1], [0], [0], [1], [0, 0, 1, 1], [], []>} : vector<128x128xf32>, vector<128x128xf32>, vector<128x128xf32> -> vector<128x128xf32>
    %c0_214 = arith.constant 0 : index
    %c0_215 = arith.constant 0 : index
    %176 = vector.load %arg12[%c0_214, %c0_215] : memref<160x128xf32, #tpu.memory_space<vmem>>, vector<128x128xf32>
    %177 = arith.addf %176, %175 : vector<128x128xf32>
    %c0_216 = arith.constant 0 : index
    %c0_217 = arith.constant 0 : index
    %178 = vector.load %arg12[%c0_216, %c0_217] : memref<160x128xf32, #tpu.memory_space<vmem>>, vector<128x128xf32>
    tpu.vector_store %arg12[%c0_216, %c0_217], %177 {strides = array<i32>} : memref<160x128xf32, #tpu.memory_space<vmem>>, vector<128x128xf32>,
    %c0_218 = arith.constant 0 : index
    %c0_219 = arith.constant 0 : index
    %179 = vector.load %arg12[%c0_218, %c0_219] : memref<160x128xf32, #tpu.memory_space<vmem>>, vector<128x128xf32>
    %180 = vector.shape_cast %179 : vector<128x128xf32> to vector<8x16x128xf32>
    %c0_220 = arith.constant 0 : index
    %c0_221 = arith.constant 0 : index
    %c0_222 = arith.constant 0 : index
    %c0_223 = arith.constant 0 : index
    %181 = vector.load %arg2[%c0_220, %c0_221, %c0_222, %c0_223] : memref<1x8x16x128xf32, #tpu.memory_space<vmem>>, vector<1x8x16x128xf32>
    %182 = vector.shape_cast %181 : vector<1x8x16x128xf32> to vector<8x16x128xf32>
    %183 = arith.addf %182, %180 : vector<8x16x128xf32>
    %c0_224 = arith.constant 0 : index
    %c0_225 = arith.constant 0 : index
    %c0_226 = arith.constant 0 : index
    %c0_227 = arith.constant 0 : index
    %184 = vector.load %arg8[%c0_224, %c0_225, %c0_226, %c0_227] : memref<1x8x16x128xf32, #tpu.memory_space<vmem>>, vector<1x8x16x128xf32>
    %185 = vector.shape_cast %184 : vector<1x8x16x128xf32> to vector<8x16x128xf32>
    %186 = vector.shape_cast %183 : vector<8x16x128xf32> to vector<1x8x16x128xf32>
    tpu.vector_store %arg8[%c0_224, %c0_225, %c0_226, %c0_227], %186 {strides = array<i32>} : memref<1x8x16x128xf32, #tpu.memory_space<vmem>>, vector<1x8x16x128xf32>,
    return
  }
  func.func @transform_0(%arg0: i32, %arg1: i32) -> (i32, i32, i32, i32) {
    %c0_i32 = arith.constant 0 : i32
    %c0_i32_0 = arith.constant 0 : i32
    %c0_i32_1 = arith.constant 0 : i32
    return %arg0, %arg1, %c0_i32, %c0_i32_0 : i32, i32, i32, i32
  }
  func.func @transform_2(%arg0: i32, %arg1: i32) -> (i32, i32, i32) {
    %c0_i32 = arith.constant 0 : i32
    %c0_i32_0 = arith.constant 0 : i32
    %c0_i32_1 = arith.constant 0 : i32
    %c0_i32_2 = arith.constant 0 : i32
    return %c0_i32, %c0_i32_0, %c0_i32_1 : i32, i32, i32
  }
  func.func @transform_3(%arg0: i32, %arg1: i32) -> (i32, i32) {
    %c0_i32 = arith.constant 0 : i32
    %c0_i32_0 = arith.constant 0 : i32
    %c0_i32_1 = arith.constant 0 : i32
    return %c0_i32, %c0_i32_0 : i32, i32
  }
  func.func @transform_4(%arg0: i32, %arg1: i32) -> (i32, i32, i32) {
    %c0_i32 = arith.constant 0 : i32
    %c0_i32_0 = arith.constant 0 : i32
    %c0_i32_1 = arith.constant 0 : i32
    %c0_i32_2 = arith.constant 0 : i32
    return %c0_i32, %c0_i32_0, %c0_i32_1 : i32, i32, i32
  }
  func.func @transform_5(%arg0: i32, %arg1: i32) -> (i32, i32) {
    %c0_i32 = arith.constant 0 : i32
    %c0_i32_0 = arith.constant 0 : i32
    %c0_i32_1 = arith.constant 0 : i32
    return %c0_i32, %c0_i32_0 : i32, i32
  }
  func.func @transform_6(%arg0: i32, %arg1: i32) -> (i32, i32, i32, i32) {
    %c0_i32 = arith.constant 0 : i32
    %c0_i32_0 = arith.constant 0 : i32
    %c0_i32_1 = arith.constant 0 : i32
    return %arg0, %arg1, %c0_i32, %c0_i32_0 : i32, i32, i32, i32
  }
}

</mosaic_0001>

<bundles_post_ra>
// kernel: tpu_custom_call.1
= control target key start
LH: loop header
LB: loop body
LE: loop exit
PB: predicated region body
PF: predicated region fallthrough
CT: control target
= control target key end

     0   :  { %s9237_s0 = inlined_call_operand.hbm [shape: f32[2,16,16,128], index: 0, kind: input, shape index: {}]   ;;  %s9238_s1 = inlined_call_operand.hbm [shape: f32[2,16,16,128], index: 1, kind: input, shape index: {}]   ;;  %s9239_s2 = inlined_call_operand.hbm [shape: f32[9,128,128], index: 2, kind: input, shape index: {}]   ;;  %s9240_s3 = inlined_call_operand.vmem [shape: f32[1,128], index: 3, kind: input, shape index: {}]   ;;  %s9241_s4 = inlined_call_operand.hbm [shape: f32[9,128,128], index: 4, kind: input, shape index: {}]   ;;  %s9242_s5 = inlined_call_operand.vmem [shape: f32[1,128], index: 5, kind: input, shape index: {}]   ;;  %s9243_s6 = inlined_call_operand.hbm [shape: f32[2,16,16,128], index: 6, kind: output, shape index: {}]  }
   0x1   :  { %9274 = sst [smem:[#allocation40_spill]] %s9237_s0 }
   0x2   :  { %9275 = sst [smem:[#allocation41_spill]] %s9239_s2 }
   0x3   :  { %9276 = sst [smem:[#allocation42_spill]] %s9241_s4 }
   0x4   :  { %9277 = sst [smem:[#allocation43_spill]] %s9242_s5 }
   0x5   :  { %9278 = sst [smem:[#allocation44_spill]] %s9243_s6 }
   0x6   :  { %11 = vsyncpa [#allocation7], 0 }
   0x7   :  { %13 = vsyncpa [#allocation7 + $0x1], 0 }
   0x8   :  { %14 = vsyncpa [#allocation10], 0 }
   0x9   :  { %15 = vsyncpa [#allocation8], 0 }
   0xa   :  { %17 = vsyncpa [#allocation8 + $0x1], 0  ;;  %s8228_s21 = smov 0   ;;  %s8230_s22 = smov 0  }
   0xb   :  { %s8232_s23 = smov 0   ;;  %s8234_s24 = smov 0  }
   0xc   :  { %s8236_s25 = smov 0   ;;  %s8238_s26 = smov 0  }
   0xd   :  { %s8240_s27 = smov 0   ;;  %s8242_s28 = smov 0  }
   0xe LB: > { %9279 = sst [smem:[#allocation24_spill]] %s8147_s21  ;;  %s5081_s29 = sadd.s32 4294967295, %s8175_s28   ;;  %s8175_s28 = sphi %s8242_s28, %s23_s28   ;;  %s8171_s27 = sphi %s8240_s27, %s9338_s27   ;;  %s8167_s26 = sphi %s8238_s26, %s9337_s26   ;;  %s8163_s25 = sphi %s8236_s25, %s9336_s25   ;;  %s8159_s24 = sphi %s8234_s24, %s9335_s24   ;;  %s8155_s23 = sphi %s8232_s23, %s9334_s23   ;;  %s8151_s22 = sphi %s8230_s22, %s9333_s22   ;;  %s8147_s21 = sphi %s8228_s21, %s9332_s21  }
   0xf   : > { %s5082_s30 = sadd.s32 4294967294, %s8175_s28   ;;  %p57_p0 = scmp.ne.s32.totalorder %s8151_s22, %s8147_s21 }
  0x10   : > { %p8272_p1 = scmp.eq.s32.totalorder %s5081_s29, 0  ;;  %p8276_p2 = scmp.eq.s32.totalorder %s5081_s29, 3 }
  0x11   : > { %p173_p3 = scmp.eq.s32.totalorder %s5082_s30, 3  ;;  %p5083_p5 = scmp.ge.s32.totalorder %s8175_s28, 1 }
  0x12   : > { %s9280_s7 = scalar_select %p8272_p1, 1, 0 }
  0x13   : > { %s9281_s8 = scalar_select %p8276_p2, 1, 0 }
  0x14   : > { %p8282_p4 = por %p8272_p1, %p57_p0  ;;  %p8287_p6 = por %p173_p3, %p57_p0 }
  0x15   : > { %p180_p7 = scmp.lt.s32.totalorder %s8175_s28, 5  ;;  %s8177_s12 = smov [#allocation9]  }
  0x16   : > { %s9282_s9 = scalar_select %p8282_p4, 1, 0 }
  0x17   : > { %s9283_s10 = scalar_select %p8287_p6, 1, 0 }
  0x18   : > { %p8292_p8 = pnand %p5083_p5, %p180_p7  ;;  %s192_s13 = sshll.u32 %s8177_s12, 4  ;;  %s193_s13 = int_to_ptr.vmem [resolvable:$true] %s192_s13 }
  0x19   : > { %9284 = sst [smem:[#allocation25_spill]] %s9283_s10  ;;  %s8178_s15 = smov [#allocation11]  }
  0x1a   : > { %s9285_s11 = scalar_select %p8292_p8, 1, 0 }
  0x1b   : > { %p7836_p9 = pneg %p8292_p8  ;;  %s208_s16 = sshll.u32 %s8178_s15, 4  ;;  %s8304_s16 = int_to_ptr.vmem [resolvable:$true] %s208_s16 }
  0x1c   : > { %s9287_s2 = sld [smem:[#allocation41_spill]] }
  0x1d   : > { %p8300_p10 = pnand %p7836_p9, %p8272_p1 }
  0x1f   : > { %p7936_p12 = pneg %p8300_p10 }
  0x22   : > { %s7934_s19 = scalar_lea.hbm %s9287_s2, 18432 }
  0x23   : > { %p7935_p11 = scmp.ne.s32.totalorder %s9287_s2, %s7934_s19  ;;  %p7941_p3 = scmp.lt.u32.totalorder %s7934_s19, %s9287_s2 }
  0x25   : > { %p7937_p13 = pnand %p7936_p12, %p7935_p11 }
  0x27   : > { %p7938_p0 = pneg %p7937_p13 }
  0x29   : > { %p7943_p5 = pnand %p7941_p3, %p7938_p0 }
  0x2b   : > { %7946 = shalt.err (!%p7943_p5)
}
  0x2c   : > { %s7947_s15 = scalar_lea.vmem %s193_s13, 18432  ;;  %p7955_p1 = scmp.lt.s32.totalorder %s193_s13, %s193_s13 }
  0x2d   : > { %p7948_p7 = scmp.ne.s32.totalorder %s193_s13, %s7947_s15  ;;  %p7956_p4 = scmp.lt.s32.totalorder %s7947_s15, %s7947_s15 }
  0x2f   : > { %p7950_p9 = pnand %p7948_p7, %p7936_p12  ;;  %p7957_p8 = por %p7956_p4, %p7955_p1 }
  0x31   : > { %p7951_p6 = pneg %p7950_p9 }
  0x33   : > { %p7958_p2 = pnand %p7957_p8, %p7951_p6 }
  0x35   : > { %7961 = shalt.err (!%p7958_p2)
}
  0x36   : > { %s9251_s17 = smov 128   ;;  %s9252_s18 = smov 8  }
  0x37   : > { %7839 = dma.hbm_to_vmem [thread:$0]  (!%p8300_p10), %s9287_s2, 18432, %s193_s13, [#allocation10], %s9251_s17, %s9251_s17, %s9252_s18  }
  0x38   : > { %s9288_s4 = sld [smem:[#allocation42_spill]] }
  0x3e   : > { %s7962_s12 = scalar_lea.hbm %s9288_s4, 18432 }
  0x3f   : > { %p7963_p1 = scmp.ne.s32.totalorder %s9288_s4, %s7962_s12  ;;  %p7969_p6 = scmp.lt.u32.totalorder %s7962_s12, %s9288_s4 }
  0x41   : > { %p7965_p2 = pnand %p7963_p1, %p7936_p12 }
  0x43   : > { %p7966_p4 = pneg %p7965_p2 }
  0x45   : > { %p7971_p8 = pnand %p7969_p6, %p7966_p4 }
  0x47   : > { %7974 = shalt.err (!%p7971_p8)
}
  0x48   : > { %s7975_s13 = scalar_lea.vmem %s8304_s16, 18432  ;;  %p7983_p3 = scmp.lt.s32.totalorder %s8304_s16, %s8304_s16 }
  0x49   : > { %p7976_p11 = scmp.ne.s32.totalorder %s8304_s16, %s7975_s13  ;;  %p7984_p5 = scmp.lt.s32.totalorder %s7975_s13, %s7975_s13 }
  0x4b   : > { %p7978_p13 = pnand %p7976_p11, %p7936_p12  ;;  %p7985_p7 = por %p7984_p5, %p7983_p3 }
  0x4d   : > { %p7979_p0 = pneg %p7978_p13 }
  0x4f   : > { %p7986_p9 = pnand %p7985_p7, %p7979_p0 }
  0x51   : > { %7989 = shalt.err (!%p7986_p9)
}
  0x52   : > { %7842 = dma.hbm_to_vmem [thread:$0]  (!%p8300_p10), %s9288_s4, 18432, %s8304_s16, [#allocation10], %s9251_s17, %s9251_s17, %s9252_s18  }
  0x53   : > { %s32_s10 = sadd.s32 1, %s8167_s26  ;;  %s35_s14 = sadd.s32 1, %s8171_s27 }
  0x54   : > { %p33_p12 = scmp.ge.s32.totalorder %s32_s10, 2  ;;  %s44_s19 = sadd.s32 1, %s8155_s23 }
  0x55   : > { %p51_p1 = scmp.ne.s32.totalorder %s8155_s23, %s8151_s22  ;;  %p52_p2 = scmp.eq.s32.totalorder %s8175_s28, 0 }
  0x56   : > { %s9340_s10 = smov (%p33_p12, %s32_s10), 0  ;;  %s9342_s14 = smov (!%p33_p12, %s35_s14), %s8171_s27 }
  0x57   : > { %9289 = sst [smem:[#allocation26_spill]] %s9340_s10  ;;  %s40_s20 = ssub.s32 %s8167_s26, %s9340_s10 }
  0x58   : > { %p8370_p4 = por %p52_p2, %p51_p1  ;;  %p37_p10 = scmp.ge.s32.totalorder %s9342_s14, 2 }
  0x59   : > { %p9291_p6 = scmp.ne.s32.totalorder %s9281_s8, 0  ;;  %p7853_p11 = scmp.lt.s32.totalorder %s8175_s28, 4 }
  0x5a   : > { %s225_s30 = sand.u32 1, %s8155_s23   ;;  %s9344_s14 = smov (%p37_p10, %s9342_s14), 0 }
  0x5b   : > { %p8376_p8 = por %p9291_p6, %p51_p1  ;;  %s5087_s12 = sshll.u32 %s225_s30, 7 }
  0x5c   : > { %s39_s15 = ssub.s32 %s8171_s27, %s9344_s14  ;;  %s5123_s6 = sshll.u32 %s8167_s26, 4 }
  0x5d   : > { %s9292_s16 = scalar_select %p8376_p8, 1, 0 }
  0x5e   : > { %s41_s13 = sor.u32 %s40_s20, %s39_s15  ;;  %s5090_s21 = sshll.u32 %s8171_s27, 5 }
  0x5f   : > { %9293 = sst [smem:[#allocation27_spill]] %s9292_s16  ;;  %p42_p13 = scmp.eq.s32.totalorder %s41_s13, 0 }
  0x60   : > { %s236_s17 = sadd.s32 %s5123_s6, %s5090_s21  ;;  %s229_s18 = scalar_lea.vmem [#allocation6], %s5087_s12 }
  0x61   : > { %s239_s8 = sshll.u32 %s229_s18, 4  ;;  %s5091_s4 = sshll.u32 %s236_s17, 7  ;;  %s8391_s8 = int_to_ptr.vmem [resolvable:$true] %s239_s8 }
  0x62   : > { %s8389_s2 = scalar_select %p42_p13, %s8155_s23, %s44_s19  }
  0x63   : > { %s9294_s0 = sld [smem:[#allocation40_spill]]  ;;  %p8402_p0 = pnand %p7853_p11, %p8370_p4 }
  0x64   : > { %s8406_s17 = scalar_lea.sflag [#allocation7], %s225_s30 }
  0x65   : > { %p7992_p5 = pneg %p8402_p0 }
  0x69   : > { %s8396_s5 = scalar_lea.hbm %s9294_s0, %s5091_s4  ;;  %s7995_s19 = scalar_lea.hbm %s9294_s0, 8192 }
  0x6a   : > { %s7990_s18 = scalar_lea.hbm %s8396_s5, 2048  ;;  %p7996_p12 = scmp.lt.u32.totalorder %s8396_s5, %s9294_s0 }
  0x6b   : > { %p7991_p3 = scmp.ne.s32.totalorder %s8396_s5, %s7990_s18  ;;  %p7997_p1 = scmp.lt.u32.totalorder %s7995_s19, %s7990_s18 }
  0x6c   : > { %p7999_p4 = scmp.lt.u32.totalorder %s7990_s18, %s8396_s5 }
  0x6d   : > { %p7993_p7 = pnand %p7992_p5, %p7991_p3  ;;  %p7998_p2 = por %p7997_p1, %p7996_p12 }
  0x6f   : > { %p7994_p9 = pneg %p7993_p7  ;;  %p8000_p10 = por %p7999_p4, %p7998_p2 }
  0x71   : > { %p8001_p6 = pnand %p8000_p10, %p7994_p9 }
  0x73   : > { %8004 = shalt.err (!%p8001_p6)
}
  0x74   : > { %s8005_s30 = scalar_lea.vmem %s8391_s8, 2048  ;;  %s8181_s12 = smov [#allocation6]  }
  0x75   : > { %p8006_p11 = scmp.ne.s32.totalorder %s8391_s8, %s8005_s30  ;;  %s8010_s15 = sshll.u32 %s8181_s12, 4  ;;  %s8011_s15 = int_to_ptr.vmem [resolvable:$false] %s8010_s15 }
  0x76   : > { %s8012_s13 = scalar_lea.vmem %s8011_s15, 4096  ;;  %p8013_p7 = scmp.lt.s32.totalorder %s8391_s8, %s8011_s15 }
  0x77   : > { %p8008_p13 = pnand %p8006_p11, %p7992_p5  ;;  %p8014_p12 = scmp.lt.s32.totalorder %s8012_s13, %s8005_s30 }
  0x79   : > { %p8009_p3 = pneg %p8008_p13  ;;  %p8015_p1 = por %p8014_p12, %p8013_p7 }
  0x7b   : > { %p8016_p2 = pnand %p8015_p1, %p8009_p3 }
  0x7d   : > { %8019 = shalt.err (!%p8016_p2)
}
  0x7e   : > { %s9296_s6 = smov 8   ;;  %s9297_s21 = smov 128  }
  0x7f   : > { %7846 = dma.hbm_to_vmem [thread:$0]  (!%p8402_p0), %s8396_s5, 2048, %s8391_s8, %s8406_s17, %s9297_s21, %s9297_s21, %s9296_s6  }
  0x80   : > { %p9298_p5 = scmp.ne.s32.totalorder %s9285_s11, 0 }
  0x82   : > { %251 = sbr.rel (%p9298_p5) target bundleno = 1373 (0x55d), region = 40 }
  0x89   : > { %s8440_s18 = sand.u32 1, %s8151_s22   ;;  %p9299_p9 = scmp.ne.s32.totalorder %s9282_s9, 0 }
  0x8a   : > { %s5093_s4 = sshll.u32 %s8440_s18, 7  ;;  %s254_s10 = scalar_lea.sflag [#allocation7], %s8440_s18 }
  0x8b   : > { %s8446_s20 = scalar_lea.vmem [#allocation6], %s5093_s4 }
  0x8c   : > { %8130 = dma.done.wait (%p9299_p9), %s254_s10, 2048  }
  0x8d   : > { %8132 = vsyncadd (%p9299_p9), %s254_s10, 4294965248  ;;  %p9300_p0 = scmp.ne.s32.totalorder %s9280_s7, 0 }
  0x8f   : > { %8134 = dma.done.wait (%p9300_p0), [#allocation10], 36864  }
  0x90   : > { %8136 = vsyncadd (%p9300_p0), [#allocation10], 4294930432  ;;  %s5097_s5 = sshll.u32 %s8159_s24, 3  ;;  %v8182_v0 = vmov 0.0   ;;  %v319_v1 = vld [vmem:[%s8446_s20] sm:$0xff]  ;;  %v320_v2 = vld [vmem:[%s8446_s20 + $0x8] sm:$0xff] }
  0x91   : > { %295 = vst [vmem:[#allocation4 + $0x7] sm:$0x1] %v8182_v0  ;;  %296 = vst [vmem:[#allocation4 + $0x27] sm:$0x1] %v8182_v0  ;;  %v321_v3 = vld [vmem:[%s8446_s20 + $0x10] sm:$0xff]  ;;  %v335_v4 = vmax.f32 %v319_v1, 0.0 }
  0x92   : > { %297 = vst [vmem:[#allocation4 + $0x47] sm:$0x1] %v8182_v0  ;;  %298 = vst [vmem:[#allocation4 + $0x67] sm:$0x1] %v8182_v0  ;;  %v336_v5 = vmax.f32 %v320_v2, 0.0  ;;  %v337_v6 = vmax.f32 %v321_v3, 0.0 }
  0x93   : > { %299 = vst [vmem:[#allocation4 + $0x87] sm:$0x1] %v8182_v0  ;;  %300 = vst [vmem:[#allocation4 + $0xa7] sm:$0x1] %v8182_v0  ;;  %v322_v7 = vld [vmem:[%s8446_s20 + $0x18] sm:$0xff]  ;;  %v323_v8 = vld [vmem:[%s8446_s20 + $0x20] sm:$0xff] }
  0x94   : > { %301 = vst [vmem:[#allocation4 + $0xc7] sm:$0x1] %v8182_v0  ;;  %302 = vst [vmem:[#allocation4 + $0xe7] sm:$0x1] %v8182_v0  ;;  %v324_v9 = vld [vmem:[%s8446_s20 + $0x28] sm:$0xff]  ;;  %v338_v10 = vmax.f32 %v322_v7, 0.0 }
  0x95   : > { %303 = vst [vmem:[#allocation4 + $0x107] sm:$0x1] %v8182_v0  ;;  %304 = vst [vmem:[#allocation4 + $0x127] sm:$0x1] %v8182_v0  ;;  %v339_v11 = vmax.f32 %v323_v8, 0.0  ;;  %v340_v12 = vmax.f32 %v324_v9, 0.0 }
  0x96   : > { %305 = vst [vmem:[#allocation4 + $0x147] sm:$0x1] %v8182_v0  ;;  %306 = vst [vmem:[#allocation4 + $0x167] sm:$0x1] %v8182_v0  ;;  %v325_v13 = vld [vmem:[%s8446_s20 + $0x30] sm:$0xff]  ;;  %v326_v14 = vld [vmem:[%s8446_s20 + $0x38] sm:$0xff] }
  0x97   : > { %307 = vst [vmem:[#allocation4 + $0x18] sm:$0x1] %v8182_v0  ;;  %308 = vst [vmem:[#allocation4 + $0x38] sm:$0x1] %v8182_v0  ;;  %v327_v15 = vld [vmem:[%s8446_s20 + $0x40] sm:$0xff]  ;;  %v341_v16 = vmax.f32 %v325_v13, 0.0 }
  0x98   : > { %309 = vst [vmem:[#allocation4 + $0x58] sm:$0x1] %v8182_v0  ;;  %310 = vst [vmem:[#allocation4 + $0x78] sm:$0x1] %v8182_v0  ;;  %v342_v17 = vmax.f32 %v326_v14, 0.0  ;;  %v343_v18 = vmax.f32 %v327_v15, 0.0 }
  0x99   : > { %311 = vst [vmem:[#allocation4 + $0x98] sm:$0x1] %v8182_v0  ;;  %312 = vst [vmem:[#allocation4 + $0xb8] sm:$0x1] %v8182_v0  ;;  %v328_v19 = vld [vmem:[%s8446_s20 + $0x48] sm:$0xff]  ;;  %v329_v20 = vld [vmem:[%s8446_s20 + $0x50] sm:$0xff] }
  0x9a   : > { %313 = vst [vmem:[#allocation4 + $0xd8] sm:$0x1] %v8182_v0  ;;  %314 = vst [vmem:[#allocation4 + $0xf8] sm:$0x1] %v8182_v0  ;;  %v330_v21 = vld [vmem:[%s8446_s20 + $0x58] sm:$0xff]  ;;  %v344_v22 = vmax.f32 %v328_v19, 0.0 }
  0x9b   : > { %315 = vst [vmem:[#allocation4 + $0x118] sm:$0x1] %v8182_v0  ;;  %316 = vst [vmem:[#allocation4 + $0x138] sm:$0x1] %v8182_v0  ;;  %v345_v23 = vmax.f32 %v329_v20, 0.0  ;;  %v346_v24 = vmax.f32 %v330_v21, 0.0 }
  0x9c   : > { %317 = vst [vmem:[#allocation4 + $0x158] sm:$0x1] %v8182_v0  ;;  %318 = vst [vmem:[#allocation4 + $0x178] sm:$0x1] %v8182_v0  ;;  %v331_v25 = vld [vmem:[%s8446_s20 + $0x60] sm:$0xff]  ;;  %v332_v26 = vld [vmem:[%s8446_s20 + $0x68] sm:$0xff] }
  0x9d   : > { %352 = vst [vmem:[#allocation4 + $0x48] sm:$0xff] %v335_v4  ;;  %353 = vst [vmem:[#allocation4 + $0x50] sm:$0xff] %v336_v5  ;;  %v333_v27 = vld [vmem:[%s8446_s20 + $0x70] sm:$0xff]  ;;  %v347_v28 = vmax.f32 %v331_v25, 0.0  ;;  %v348_v29 = vmax.f32 %v332_v26, 0.0  ;;  %v334_v31 = vld [vmem:[%s8446_s20 + $0x78] sm:$0xff] }
  0x9e   : > { %354 = vst [vmem:[#allocation4 + $0x68] sm:$0xff] %v337_v6  ;;  %355 = vst [vmem:[#allocation4 + $0x70] sm:$0xff] %v338_v10  ;;  %v349_v30 = vmax.f32 %v333_v27, 0.0  ;;  %v350_v32 = vmax.f32 %v334_v31, 0.0  ;;  %s8475_s7 = scalar_lea.vmem [#allocation12], %s5093_s4  ;;  %p5098_p4 = scmp.le.s32.totalorder %s8159_s24, 0 }
  0x9f   : > { %356 = vst [vmem:[#allocation4 + $0x88] sm:$0xff] %v339_v11  ;;  %357 = vst [vmem:[#allocation4 + $0x90] sm:$0xff] %v340_v12  ;;  %s5099_s9 = sadd.s32 (!%p5098_p4), 4294967294, %s5097_s5  ;;  %s5101_s11 = sshll.u32 (!%p5098_p4), %s8163_s25, 8 }
  0xa0   : > { %358 = vst [vmem:[#allocation4 + $0xa8] sm:$0xff] %v341_v16  ;;  %359 = vst [vmem:[#allocation4 + $0xb0] sm:$0xff] %v342_v17  ;;  %371 = sbr.rel (%p5098_p4) target bundleno = 190 (0xbe), region = 56  ;;  %s5100_s8 = sshll.u32 (!%p5098_p4), %s5099_s9, 4 }
  0xa1   : > { %360 = vst [vmem:[#allocation4 + $0xc8] sm:$0xff] %v343_v18  ;;  %361 = vst [vmem:[#allocation4 + $0xd0] sm:$0xff] %v344_v22  ;;  %s375_s17 = sadd.s32 (!%p5098_p4), %s5101_s11, %s5100_s8  ;;  %s8183_s19 = smov (!%p5098_p4), [#allocation2]  }
  0xa2   : > { %362 = vst [vmem:[#allocation4 + $0xe8] sm:$0xff] %v345_v23  ;;  %363 = vst [vmem:[#allocation4 + $0xf0] sm:$0xff] %v346_v24  ;;  %s385_s29 = sshll.u32 (!%p5098_p4), %s8183_s19, 4  ;;  %s5102_s16 = sshll.u32 (!%p5098_p4), %s375_s17, 4  ;;  %s386_s29 = int_to_ptr.vmem [resolvable:$true] %s385_s29 }
  0xa3   : > { %364 = vst [vmem:[#allocation4 + $0x108] sm:$0xff] %v347_v28  ;;  %365 = vst [vmem:[#allocation4 + $0x110] sm:$0xff] %v348_v29  ;;  %s377_s15 = scalar_lea.hbm (!%p5098_p4), %s9238_s1, %s5102_s16  ;;  %s8022_s4 = scalar_lea.hbm (!%p5098_p4), %s9238_s1, 8192 }
  0xa4   : > { %366 = vst [vmem:[#allocation4 + $0x128] sm:$0xff] %v349_v30  ;;  %367 = vst [vmem:[#allocation4 + $0x130] sm:$0xff] %v350_v32  ;;  %s8020_s13 = scalar_lea.hbm (!%p5098_p4), %s377_s15, 512  ;;  %p8023_p6 = scmp.lt.u32.totalorder (!%p5098_p4), %s377_s15, %s9238_s1 }
  0xa5   : > { %p8021_p10 = scmp.ne.s32.totalorder (!%p5098_p4), %s377_s15, %s8020_s13  ;;  %p8024_p11 = scmp.lt.u32.totalorder (!%p5098_p4), %s8022_s4, %s8020_s13 }
  0xa6   : > { %p8026_p3 = scmp.lt.u32.totalorder (!%p5098_p4), %s8020_s13, %s377_s15 }
  0xa7   : > { %p8025_p13 = por %p8024_p11, %p8023_p6 }
  0xa9   : > { %p8027_p7 = por %p8026_p3, %p8025_p13 }
  0xab   : > { %p8028_p12 = pnand %p8027_p7, %p8021_p10 }
  0xad   : > { %8031 = shalt.err (!%p8028_p12)  }
  0xae   : > { %s8032_s5 = scalar_lea.vmem %s386_s29, 512  ;;  %s8036_s9 = scalar_lea.vmem %s386_s29, 1024 }
  0xaf   : > { %p8033_p1 = scmp.ne.s32.totalorder %s386_s29, %s8032_s5  ;;  %p8037_p2 = scmp.lt.s32.totalorder %s386_s29, %s386_s29 }
  0xb0   : > { %p8038_p5 = scmp.lt.s32.totalorder %s8036_s9, %s8032_s5 }
  0xb2   : > { %p8039_p9 = por %p8038_p5, %p8037_p2 }
  0xb4   : > { %p8040_p0 = pnand %p8039_p9, %p8033_p1 }
  0xb6   : > { %8043 = shalt.err (!%p8040_p0)  }
  0xb7   : > { %388 = dma.hbm_to_vmem [thread:$0]  %s377_s15, 512, %s386_s29, [#allocation3] }
  0xb8   : > { %8137 = dma.done.wait [#allocation3], 512 }
  0xb9   : > { %8138 = vsyncadd [#allocation3], 4294966784  ;;  %v393_v33 = vld [vmem:[#allocation2] sm:$0xff]  ;;  %v394_v34 = vld [vmem:[#allocation2 + $0x8] sm:$0xff] }
  0xba   : > { %v395_v35 = vld [vmem:[#allocation2 + $0x10] sm:$0xff]  ;;  %v397_v36 = vmax.f32 %v393_v33, 0.0  ;;  %v398_v37 = vmax.f32 %v394_v34, 0.0  ;;  %v396_v39 = vld [vmem:[#allocation2 + $0x18] sm:$0xff] }
  0xbb   : > { %v399_v38 = vmax.f32 %v395_v35, 0.0  ;;  %v400_v40 = vmax.f32 %v396_v39, 0.0 }
  0xbc   : > { %401 = vst [vmem:[#allocation4 + $0x8] sm:$0xff] %v397_v36  ;;  %402 = vst [vmem:[#allocation4 + $0x10] sm:$0xff] %v398_v37 }
  0xbd   : > { %403 = vst [vmem:[#allocation4 + $0x28] sm:$0xff] %v399_v38  ;;  %404 = vst [vmem:[#allocation4 + $0x30] sm:$0xff] %v400_v40 }
  0xbe PF: > { %p5103_p4 = scmp.ge.s32.totalorder %s8159_s24, 1 }
  0xbf   : > { %s5124_s0 = sshll.u32 (!%p5103_p4), %s8159_s24, 7  ;;  %s5106_s11 = sshll.u32 (!%p5103_p4), %s8163_s25, 8 }
  0xc0   : > { %408 = sbr.rel (%p5103_p4) target bundleno = 223 (0xdf), region = 64  ;;  %s5013_s8 = sadd.s32 (!%p5103_p4), %s5124_s0, %s5106_s11 }
  0xc1   : > { %s5107_s17 = sshll.u32 (!%p5103_p4), %s5013_s8, 4  ;;  %s8184_s19 = smov (!%p5103_p4), [#allocation2 + $0x20]  }
  0xc2   : > { %s424_s29 = sshll.u32 (!%p5103_p4), %s8184_s19, 4  ;;  %s5015_s12 = scalar_lea.hbm (!%p5103_p4), %s9238_s1, %s5107_s17  ;;  %s425_s29 = int_to_ptr.vmem [resolvable:$true] %s424_s29 }
  0xc3   : > { %s5016_s15 = scalar_lea.hbm (!%p5103_p4), %s5015_s12, 2048  ;;  %s8068_s13 = scalar_lea.hbm (!%p5103_p4), %s5015_s12, 2560 }
  0xc4   : > { %p8045_p10 = scmp.ne.s32.totalorder (!%p5103_p4), %s5016_s15, %s8068_s13  ;;  %s8046_s4 = scalar_lea.hbm (!%p5103_p4), %s9238_s1, 8192 }
  0xc5   : > { %p8047_p6 = scmp.lt.u32.totalorder (!%p5103_p4), %s5016_s15, %s9238_s1  ;;  %p8048_p11 = scmp.lt.u32.totalorder (!%p5103_p4), %s8046_s4, %s8068_s13 }
  0xc6   : > { %p8050_p3 = scmp.lt.u32.totalorder (!%p5103_p4), %s8068_s13, %s5016_s15 }
  0xc7   : > { %p8049_p13 = por %p8048_p11, %p8047_p6 }
  0xc9   : > { %p8051_p7 = por %p8050_p3, %p8049_p13 }
  0xcb   : > { %p8052_p12 = pnand %p8051_p7, %p8045_p10 }
  0xcd   : > { %8055 = shalt.err (!%p8052_p12)  }
  0xce   : > { %s8056_s9 = scalar_lea.vmem %s425_s29, 512  ;;  %s8185_s0 = smov [#allocation2]  }
  0xcf   : > { %p8057_p1 = scmp.ne.s32.totalorder %s425_s29, %s8056_s9  ;;  %s8058_s11 = sshll.u32 %s8185_s0, 4  ;;  %s8059_s11 = int_to_ptr.vmem [resolvable:$false] %s8058_s11 }
  0xd0   : > { %s8060_s8 = scalar_lea.vmem %s8059_s11, 1024  ;;  %p8061_p2 = scmp.lt.s32.totalorder %s425_s29, %s8059_s11 }
  0xd1   : > { %p8062_p5 = scmp.lt.s32.totalorder %s8060_s8, %s8056_s9 }
  0xd3   : > { %p8063_p9 = por %p8062_p5, %p8061_p2 }
  0xd5   : > { %p8064_p0 = pnand %p8063_p9, %p8057_p1 }
  0xd7   : > { %8067 = shalt.err (!%p8064_p0)  }
  0xd8   : > { %427 = dma.hbm_to_vmem [thread:$0]  %s5016_s15, 512, %s425_s29, [#allocation3 + $0x1] }
  0xd9   : > { %8139 = dma.done.wait [#allocation3 + $0x1], 512 }
  0xda   : > { %8140 = vsyncadd [#allocation3 + $0x1], 4294966784  ;;  %v432_v41 = vld [vmem:[#allocation2 + $0x20] sm:$0xff]  ;;  %v433_v42 = vld [vmem:[#allocation2 + $0x28] sm:$0xff] }
  0xdb   : > { %v434_v43 = vld [vmem:[#allocation2 + $0x30] sm:$0xff]  ;;  %v436_v44 = vmax.f32 %v432_v41, 0.0  ;;  %v437_v45 = vmax.f32 %v433_v42, 0.0  ;;  %v435_v47 = vld [vmem:[#allocation2 + $0x38] sm:$0xff] }
  0xdc   : > { %v438_v46 = vmax.f32 %v434_v43, 0.0  ;;  %v439_v48 = vmax.f32 %v435_v47, 0.0 }
  0xdd   : > { %441 = vst [vmem:[#allocation4 + $0x148] sm:$0xff] %v436_v44  ;;  %442 = vst [vmem:[#allocation4 + $0x150] sm:$0xff] %v437_v45 }
  0xde   : > { %443 = vst [vmem:[#allocation4 + $0x168] sm:$0xff] %v438_v46  ;;  %444 = vst [vmem:[#allocation4 + $0x170] sm:$0xff] %v439_v48 }
  0xdf PF: > { %p5108_p4 = scmp.ne.s32.totalorder %s8159_s24, 0 }
  0xe0   : > { %v8186_v49 = vmov (!%p5108_p4), 0.0  }
  0xe1   : > { %448 = sbr.rel (%p5108_p4) target bundleno = 232 (0xe8), region = 72  ;;  %449 = vst [vmem:[#allocation4 + $0x8] sm:$0xff] (!%p5108_p4), %v8186_v49  ;;  %450 = vst [vmem:[#allocation4 + $0x10] sm:$0xff] (!%p5108_p4), %v8186_v49 }
  0xe2   : > { %451 = vst [vmem:[#allocation4 + $0x28] sm:$0xff] (!%p5108_p4), %v8186_v49  ;;  %452 = vst [vmem:[#allocation4 + $0x30] sm:$0xff] (!%p5108_p4), %v8186_v49 }
  0xe8 PF: > { %p5109_p10 = scmp.ne.s32.totalorder %s8159_s24, 1 }
  0xe9   : > { %v8187_v50 = vmov (!%p5109_p10), 0.0  }
  0xea   : > { %456 = sbr.rel (%p5109_p10) target bundleno = 241 (0xf1), region = 76  ;;  %458 = vst [vmem:[#allocation4 + $0x148] sm:$0xff] (!%p5109_p10), %v8187_v50  ;;  %459 = vst [vmem:[#allocation4 + $0x150] sm:$0xff] (!%p5109_p10), %v8187_v50 }
  0xeb   : > { %460 = vst [vmem:[#allocation4 + $0x168] sm:$0xff] (!%p5109_p10), %v8187_v50  ;;  %461 = vst [vmem:[#allocation4 + $0x170] sm:$0xff] (!%p5109_p10), %v8187_v50 }
  0xf1 PF: > { %v482_v51 = vld [vmem:[#allocation9] sm:$0xff]  ;;  %v483_v52 = vld [vmem:[#allocation9 + $0x8] sm:$0xff]  ;;  %v484_v53 = vld [vmem:[#allocation9 + $0x10] sm:$0xff] }
  0xf2   : > { %v6800_v54 = vpack.c.bf16 %v483_v52, %v482_v51  ;;  %v485_v55 = vld [vmem:[#allocation9 + $0x18] sm:$0xff]  ;;  %v486_v57 = vld [vmem:[#allocation9 + $0x20] sm:$0xff]  ;;  %v487_v58 = vld [vmem:[#allocation9 + $0x28] sm:$0xff] }
  0xf3   : > { %v6804_v56 = vpack.c.bf16 %v485_v55, %v484_v53  ;;  %v6808_v59 = vpack.c.bf16 %v487_v58, %v486_v57  ;;  %v462_v60 = vld [vmem:[#allocation4 + $0x7] sm:$0xff]  ;;  %v488_v61 = vld [vmem:[#allocation9 + $0x30] sm:$0xff]  ;;  %v489_v62 = vld [vmem:[#allocation9 + $0x38] sm:$0xff] }
  0xf4   : > { %6801 = vmatprep.subr.bf16.mxu0 %v6800_v54  ;;  %5770 = vmatprep.mubr.f32.mxu0 %v462_v60  ;;  %v6812_v63 = vpack.c.bf16 %v489_v62, %v488_v61  ;;  %v490_v0 = vld [vmem:[#allocation9 + $0x40] sm:$0xff]  ;;  %v491_v1 = vld [vmem:[#allocation9 + $0x48] sm:$0xff]  ;;  %v492_v3 = vld [vmem:[#allocation9 + $0x50] sm:$0xff] }
  0xf5   : > { %6803 = vmatpush3.bf16.msra.mxu0 %v6800_v54  ;;  %v6816_v2 = vpack.c.bf16 %v491_v1, %v490_v0  ;;  %v493_v4 = vld [vmem:[#allocation9 + $0x58] sm:$0xff]  ;;  %v494_v6 = vld [vmem:[#allocation9 + $0x60] sm:$0xff]  ;;  %v495_v7 = vld [vmem:[#allocation9 + $0x68] sm:$0xff] }
  0xf6   : > { %6805 = vmatprep.subr.bf16.mxu0 %v6804_v56  ;;  %v6820_v5 = vpack.c.bf16 %v493_v4, %v492_v3  ;;  %v6824_v8 = vpack.c.bf16 %v495_v7, %v494_v6  ;;  %v496_v9 = vld [vmem:[#allocation9 + $0x70] sm:$0xff]  ;;  %v497_v10 = vld [vmem:[#allocation9 + $0x78] sm:$0xff]  ;;  %v711_v12 = vld [vmem:[#allocation9 + $0x80] sm:$0xff] }
  0xf7   : > { %v6828_v11 = vpack.c.bf16 %v497_v10, %v496_v9  ;;  %v712_v13 = vld [vmem:[#allocation9 + $0x88] sm:$0xff]  ;;  %v713_v15 = vld [vmem:[#allocation9 + $0x90] sm:$0xff]  ;;  %v714_v16 = vld [vmem:[#allocation9 + $0x98] sm:$0xff] }
  0xf8   : > { %v6832_v14 = vpack.c.bf16 %v712_v13, %v711_v12  ;;  %v463_v17 = vld [vmem:[#allocation4 + $0xf] sm:$0xff]  ;;  %v8508_v18 = vld [vmem:[#allocation4 + $0x27] sm:$0xff]  ;;  %v6836_v19 = vpack.c.bf16 %v714_v16, %v713_v15  ;;  %v718_v27 = vld [vmem:[#allocation9 + $0xb8] sm:$0xff] }
  0xf9   : > { %6807 = vmatpush3.bf16.msra.mxu0 %v6804_v56  ;;  %v8510_v20 = vld [vmem:[#allocation4 + $0x69] sm:$0xff]  ;;  %v715_v21 = vld [vmem:[#allocation9 + $0xa0] sm:$0xff]  ;;  %v722_v37 = vld [vmem:[#allocation9 + $0xd8] sm:$0xff] }
  0xfa   : > { %6809 = vmatprep.subr.bf16.mxu0 %v6808_v59  ;;  %9301 = vst [vmem:[#allocation28_spill] sm:$0xff] %v8510_v20  ;;  %v716_v22 = vld [vmem:[#allocation9 + $0xa8] sm:$0xff]  ;;  %6269 = vmatprep.mubr.f32.mxu1 %v8510_v20  ;;  %v717_v26 = vld [vmem:[#allocation9 + $0xb0] sm:$0xff]  ;;  %v719_v31 = vld [vmem:[#allocation9 + $0xc0] sm:$0xff] }
  0xfb   : > { %v8514_v23 = vld [vmem:[#allocation4 + $0x2f] sm:$0xff]  ;;  %v8516_v24 = vld [vmem:[#allocation4 + $0x47] sm:$0xff]  ;;  %v6840_v25 = vpack.c.bf16 %v716_v22, %v715_v21  ;;  %v6844_v30 = vpack.c.bf16 %v718_v27, %v717_v26  ;;  %v726_v47 = vld [vmem:[#allocation9 + $0xf8] sm:$0xff] }
  0xfc   : > { %v8520_v28 = vld [vmem:[#allocation4 + $0x4f] sm:$0xff]  ;;  %v8522_v29 = vld [vmem:[#allocation4 + $0x67] sm:$0xff]  ;;  %v976_v61 = vld [vmem:[#allocation9 + $0x118] sm:$0xff] }
  0xfd   : > { %6811 = vmatpush3.bf16.msra.mxu0 %v6808_v59  ;;  %v720_v32 = vld [vmem:[#allocation9 + $0xc8] sm:$0xff]  ;;  %v721_v36 = vld [vmem:[#allocation9 + $0xd0] sm:$0xff]  ;;  %v723_v41 = vld [vmem:[#allocation9 + $0xe0] sm:$0xff] }
  0xfe   : > { %6813 = vmatprep.subr.bf16.mxu0 %v6812_v63  ;;  %v8526_v33 = vld [vmem:[#allocation4 + $0x6f] sm:$0xff]  ;;  %v8528_v34 = vld [vmem:[#allocation4 + $0x87] sm:$0xff]  ;;  %v6848_v35 = vpack.c.bf16 %v720_v32, %v719_v31  ;;  %v6852_v40 = vpack.c.bf16 %v722_v37, %v721_v36  ;;  %v980_v7 = vld [vmem:[#allocation9 + $0x138] sm:$0xff] }
  0xff   : > { %v8532_v38 = vld [vmem:[#allocation4 + $0x8f] sm:$0xff]  ;;  %v8534_v39 = vld [vmem:[#allocation4 + $0xa7] sm:$0xff] }
 0x100   : > { %v724_v42 = vld [vmem:[#allocation9 + $0xe8] sm:$0xff]  ;;  %v725_v46 = vld [vmem:[#allocation9 + $0xf0] sm:$0xff]  ;;  %v973_v51 = vld [vmem:[#allocation9 + $0x100] sm:$0xff] }
 0x101   : > { %6815 = vmatpush3.bf16.msra.mxu0 %v6812_v63  ;;  %v8538_v43 = vld [vmem:[#allocation4 + $0xaf] sm:$0xff]  ;;  %v8540_v44 = vld [vmem:[#allocation4 + $0xc7] sm:$0xff]  ;;  %v6856_v45 = vpack.c.bf16 %v724_v42, %v723_v41  ;;  %v6860_v50 = vpack.c.bf16 %v726_v47, %v725_v46 }
 0x102   : > { %6817 = vmatprep.subr.bf16.mxu0 %v6816_v2  ;;  %v8544_v48 = vld [vmem:[#allocation4 + $0xcf] sm:$0xff]  ;;  %v8546_v49 = vld [vmem:[#allocation4 + $0xe7] sm:$0xff] }
 0x103   : > { %v974_v52 = vld [vmem:[#allocation9 + $0x108] sm:$0xff]  ;;  %v975_v60 = vld [vmem:[#allocation9 + $0x110] sm:$0xff]  ;;  %v977_v1 = vld [vmem:[#allocation9 + $0x120] sm:$0xff] }
 0x104   : > { %v8550_v53 = vld [vmem:[#allocation4 + $0xef] sm:$0xff]  ;;  %v8552_v54 = vld [vmem:[#allocation4 + $0x107] sm:$0xff]  ;;  %v6864_v55 = vpack.c.bf16 %v974_v52, %v973_v51  ;;  %v6868_v0 = vpack.c.bf16 %v976_v61, %v975_v60  ;;  %v1239_v60 = vld [vmem:[#allocation9 + $0x198] sm:$0xff] }
 0x105   : > { %6819 = vmatpush3.bf16.msra.mxu0 %v6816_v2  ;;  %v8556_v56 = vld [vmem:[#allocation4 + $0x10f] sm:$0xff]  ;;  %v8558_v57 = vld [vmem:[#allocation4 + $0x127] sm:$0xff] }
 0x106   : > { %6821 = vmatprep.subr.bf16.mxu0 %v6820_v5  ;;  %v8562_v58 = vld [vmem:[#allocation4 + $0x12f] sm:$0xff]  ;;  %v1236_v41 = vld [vmem:[#allocation9 + $0x180] sm:$0xff] }
 0x107   : > { %v690_v59 = vld [vmem:[#allocation4 + $0x8] sm:$0xff]  ;;  %v691_v62 = vld [vmem:[#allocation4 + $0x10] sm:$0xff] }
 0x108   : > { %v8565_v63 = vld [vmem:[#allocation4 + $0x28] sm:$0xff]  ;;  %v8568_v3 = vld [vmem:[#allocation4 + $0x30] sm:$0xff] }
 0x109   : > { %6823 = vmatpush3.bf16.msra.mxu0 %v6820_v5  ;;  %v978_v2 = vld [vmem:[#allocation9 + $0x128] sm:$0xff]  ;;  %v979_v6 = vld [vmem:[#allocation9 + $0x130] sm:$0xff] }
 0x10a   : > { %6825 = vmatprep.subr.bf16.mxu0 %v6824_v8  ;;  %v8570_v4 = vld [vmem:[#allocation4 + $0x48] sm:$0xff]  ;;  %v6872_v5 = vpack.c.bf16 %v978_v2, %v977_v1  ;;  %v6876_v10 = vpack.c.bf16 %v980_v7, %v979_v6  ;;  %v8580_v13 = vld [vmem:[#allocation4 + $0x70] sm:$0xff]  ;;  %v1240_v1 = vld [vmem:[#allocation9 + $0x1a0] sm:$0xff] }
 0x10b   : > { %v8576_v9 = vld [vmem:[#allocation4 + $0x68] sm:$0xff]  ;;  %v983_v16 = vld [vmem:[#allocation9 + $0x150] sm:$0xff] }
 0x10c   : > { %v982_v12 = vld [vmem:[#allocation9 + $0x148] sm:$0xff]  ;;  %v8592_v27 = vld [vmem:[#allocation4 + $0xb0] sm:$0xff] }
 0x10d   : > { %6827 = vmatpush3.bf16.msra.mxu0 %v6824_v8  ;;  %v8574_v8 = vld [vmem:[#allocation4 + $0x50] sm:$0xff]  ;;  %v8588_v21 = vld [vmem:[#allocation4 + $0xa8] sm:$0xff] }
 0x10e   : > { %6829 = vmatprep.subr.bf16.mxu0 %v6828_v11  ;;  %v986_v26 = vld [vmem:[#allocation9 + $0x168] sm:$0xff]  ;;  %v987_v32 = vld [vmem:[#allocation9 + $0x170] sm:$0xff] }
 0x10f   : > { %v8598_v36 = vld [vmem:[#allocation4 + $0xd0] sm:$0xff]  ;;  %v8600_v37 = vld [vmem:[#allocation4 + $0xe8] sm:$0xff] }
 0x110   : > { %v1237_v42 = vld [vmem:[#allocation9 + $0x188] sm:$0xff]  ;;  %v8616_v52 = vld [vmem:[#allocation4 + $0x130] sm:$0xff] }
 0x111   : > { %6831 = vmatpush3.bf16.msra.mxu0 %v6828_v11  ;;  %v981_v11 = vld [vmem:[#allocation9 + $0x140] sm:$0xff]  ;;  %v8606_v46 = vld [vmem:[#allocation4 + $0x108] sm:$0xff]  ;;  %v6896_v47 = vpack.c.bf16 %v1237_v42, %v1236_v41  ;;  %9304 = vst [vmem:[#allocation31_spill] sm:$0xff] %v8616_v52  ;;  %v953_v61 = vld [vmem:[#allocation4 + $0x11] sm:$0xff] }
 0x112   : > { %6833 = vmatprep.subr.bf16.mxu0 %v6832_v14  ;;  %v6880_v15 = vpack.c.bf16 %v982_v12, %v981_v11  ;;  %v8612_v51 = vld [vmem:[#allocation4 + $0x128] sm:$0xff]  ;;  %v1243_v11 = vld [vmem:[#allocation9 + $0x1b8] sm:$0xff]  ;;  %v1248_v42 = vld [vmem:[#allocation9 + $0x1e0] sm:$0xff] }
 0x113   : > { %9303 = vst [vmem:[#allocation30_spill] sm:$0xff] %v8612_v51  ;;  %v1241_v2 = vld [vmem:[#allocation9 + $0x1a8] sm:$0xff]  ;;  %v8628_v12 = vld [vmem:[#allocation4 + $0x51] sm:$0xff] }
 0x114   : > { %5771 = vmatmul.mubr.f32.vlgmr.msra.gmra.mrb[0].mxu0 %v463_v17  ;;  %v984_v17 = vld [vmem:[#allocation9 + $0x158] sm:$0xff]  ;;  %v8624_v6 = vld [vmem:[#allocation4 + $0x49] sm:$0xff]  ;;  %v6904_v7 = vpack.c.bf16 %v1241_v2, %v1240_v1  ;;  %9305 = vst [vmem:[#allocation32_spill] sm:$0xff] %v8628_v12 }
 0x115   : > { %6835 = vmatpush3.bf16.msra.mxu0 %v6832_v14  ;;  %5773 = vmatprep.mubr.f32.mxu0 %v8508_v18  ;;  %v8582_v14 = vld [vmem:[#allocation4 + $0x88] sm:$0xff]  ;;  %v6884_v22 = vpack.c.bf16 %v984_v17, %v983_v16  ;;  %v1244_v16 = vld [vmem:[#allocation9 + $0x1c0] sm:$0xff]  ;;  %v8650_v1 = vld [vmem:[#allocation4 + $0xd1] sm:$0xff] }
 0x116   : > { %6837 = vmatprep.subr.bf16.mxu0 %v6836_v19  ;;  %v1245_v17 = vld [vmem:[#allocation9 + $0x1c8] sm:$0xff] }
 0x117   : > { %v8652_v2 = vld [vmem:[#allocation4 + $0xe9] sm:$0xff] }
 0x118   : > { %5774 = vmatmul.mubr.f32.gmra.mrb[2].mxu0 %v8514_v23 }
 0x119   : > { %6839 = vmatpush3.bf16.msra.mxu0 %v6836_v19  ;;  %5776 = vmatprep.mubr.f32.mxu0 %v8516_v24  ;;  %v8586_v19 = vld [vmem:[#allocation4 + $0x90] sm:$0xff] }
 0x11a   : > { %6841 = vmatprep.subr.bf16.mxu0 %v6840_v25 }
 0x11c   : > { %5777 = vmatmul.mubr.f32.gmra.mrb[4].mxu0 %v8520_v28 }
 0x11d   : > { %5779 = vmatprep.mubr.f32.mxu0 %v8522_v29  ;;  %6843 = vmatpush3.bf16.msra.mxu0 %v6840_v25  ;;  %v985_v25 = vld [vmem:[#allocation9 + $0x160] sm:$0xff] }
 0x11e   : > { %6845 = vmatprep.subr.bf16.mxu0 %v6844_v30  ;;  %v6888_v31 = vpack.c.bf16 %v986_v26, %v985_v25  ;;  %v8634_v25 = vld [vmem:[#allocation4 + $0x89] sm:$0xff]  ;;  %v6912_v26 = vpack.c.bf16 %v1245_v17, %v1244_v16 }
 0x11f   : > { %v8658_v16 = vld [vmem:[#allocation4 + $0x109] sm:$0xff] }
 0x120   : > { %5780 = vmatmul.mubr.f32.gmra.mrb[6].mxu0 %v8526_v33 }
 0x121   : > { %5782 = vmatprep.mubr.f32.mxu0 %v8528_v34  ;;  %6847 = vmatpush3.bf16.msra.mxu0 %v6844_v30  ;;  %v8594_v30 = vld [vmem:[#allocation4 + $0xc8] sm:$0xff] }
 0x122   : > { %6849 = vmatprep.subr.bf16.mxu0 %v6848_v35 }
 0x124   : > { %5783 = vmatmul.mubr.f32.gmra.mrb[8].mxu0 %v8532_v38 }
 0x125   : > { %5785 = vmatprep.mubr.f32.mxu0 %v8534_v39  ;;  %6851 = vmatpush3.bf16.msra.mxu0 %v6848_v35  ;;  %v988_v35 = vld [vmem:[#allocation9 + $0x178] sm:$0xff] }
 0x126   : > { %6853 = vmatprep.subr.bf16.mxu0 %v6852_v40 }
 0x128   : > { %5786 = vmatmul.mubr.f32.gmra.mrb[10].mxu0 %v8538_v43 }
 0x129   : > { %5788 = vmatprep.mubr.f32.mxu0 %v8540_v44  ;;  %6855 = vmatpush3.bf16.msra.mxu0 %v6852_v40  ;;  %v6892_v40 = vpack.c.bf16 %v988_v35, %v987_v32  ;;  %v1247_v32 = vld [vmem:[#allocation9 + $0x1d8] sm:$0xff] }
 0x12a   : > { %6857 = vmatprep.subr.bf16.mxu0 %v6856_v45  ;;  %v8638_v35 = vld [vmem:[#allocation4 + $0x91] sm:$0xff] }
 0x12c   : > { %5789 = vmatmul.mubr.f32.gmra.mrb[12].mxu0 %v8544_v48 }
 0x12d   : > { %5791 = vmatprep.mubr.f32.mxu0 %v8546_v49  ;;  %6859 = vmatpush3.bf16.msra.mxu0 %v6856_v45  ;;  %v8604_v45 = vld [vmem:[#allocation4 + $0xf0] sm:$0xff] }
 0x12e   : > { %6861 = vmatprep.subr.bf16.mxu0 %v6860_v50 }
 0x130   : > { %5792 = vmatmul.mubr.f32.gmra.mrb[14].mxu0 %v8550_v53 }
 0x131   : > { %5794 = vmatprep.mubr.f32.mxu0 %v8552_v54  ;;  %6863 = vmatpush3.bf16.msra.mxu0 %v6860_v50  ;;  %v8610_v50 = vld [vmem:[#allocation4 + $0x110] sm:$0xff] }
 0x132   : > { %6865 = vmatprep.subr.bf16.mxu0 %v6864_v55  ;;  %9302 = vst [vmem:[#allocation29_spill] sm:$0xff] %v8610_v50 }
 0x134   : > { %5795 = vmatmul.mubr.f32.gmra.mrb[16].mxu0 %v8556_v56 }
 0x135   : > { %5797 = vmatprep.mubr.f32.mxu0 %v8558_v57 }
 0x138   : > { %5798 = vmatmul.mubr.f32.gmra.mrb[18].mxu0 %v8562_v58 }
 0x139   : > { %5832 = vmatprep.mubr.f32.mxu0 %v690_v59  ;;  %v1238_v59 = vld [vmem:[#allocation9 + $0x190] sm:$0xff] }
 0x13c   : > { %5833 = vmatmul.mubr.f32.vlgmr.msra.gmra.mrb[0].mxu0 %v691_v62  ;;  %v8619_v62 = vld [vmem:[#allocation4 + $0x29] sm:$0xff] }
 0x13d   : > { %6867 = vmatpush3.bf16.msra.mxu0 %v6864_v55  ;;  %5835 = vmatprep.mubr.f32.mxu0 %v8565_v63  ;;  %v952_v55 = vld [vmem:[#allocation4 + $0x9] sm:$0xff] }
 0x13e   : > { %6869 = vmatprep.subr.bf16.mxu0 %v6868_v0 }
 0x140   : > { %5836 = vmatmul.mubr.f32.gmra.mrb[2].mxu0 %v8568_v3 }
 0x141   : > { %6871 = vmatpush3.bf16.msra.mxu0 %v6868_v0  ;;  %5838 = vmatprep.mubr.f32.mxu0 %v8570_v4  ;;  %v6900_v0 = vpack.c.bf16 %v1239_v60, %v1238_v59  ;;  %v8646_v59 = vld [vmem:[#allocation4 + $0xc9] sm:$0xff] }
 0x142   : > { %6873 = vmatprep.subr.bf16.mxu0 %v6872_v5 }
 0x144   : > { %5839 = vmatmul.mubr.f32.gmra.mrb[4].mxu0 %v8574_v8 }
 0x145   : > { %5841 = vmatprep.mubr.f32.mxu0 %v8576_v9  ;;  %6875 = vmatpush3.bf16.msra.mxu0 %v6872_v5  ;;  %v8622_v5 = vld [vmem:[#allocation4 + $0x31] sm:$0xff] }
 0x146   : > { %6877 = vmatprep.subr.bf16.mxu0 %v6876_v10 }
 0x148   : > { %5842 = vmatmul.mubr.f32.gmra.mrb[6].mxu0 %v8580_v13 }
 0x149   : > { %5844 = vmatprep.mubr.f32.mxu0 %v8582_v14  ;;  %6879 = vmatpush3.bf16.msra.mxu0 %v6876_v10  ;;  %v1242_v10 = vld [vmem:[#allocation9 + $0x1b0] sm:$0xff] }
 0x14a   : > { %6881 = vmatprep.subr.bf16.mxu0 %v6880_v15 }
 0x14c   : > { %5845 = vmatmul.mubr.f32.gmra.mrb[8].mxu0 %v8586_v19 }
 0x14d   : > { %5847 = vmatprep.mubr.f32.mxu0 %v8588_v21  ;;  %6883 = vmatpush3.bf16.msra.mxu0 %v6880_v15  ;;  %v6908_v15 = vpack.c.bf16 %v1243_v11, %v1242_v10  ;;  %v1498_v10 = vld [vmem:[#allocation9 + $0x200] sm:$0xff]  ;;  %v1499_v11 = vld [vmem:[#allocation9 + $0x208] sm:$0xff] }
 0x14e   : > { %6885 = vmatprep.subr.bf16.mxu0 %v6884_v22  ;;  %v6928_v17 = vpack.c.bf16 %v1499_v11, %v1498_v10  ;;  %v1505_v10 = vld [vmem:[#allocation9 + $0x238] sm:$0xff]  ;;  %v2546_v11 = vld [vmem:[#allocation9 + $0x400] sm:$0xff] }
 0x150   : > { %5848 = vmatmul.mubr.f32.gmra.mrb[10].mxu0 %v8592_v27 }
 0x151   : > { %5850 = vmatprep.mubr.f32.mxu0 %v8594_v30  ;;  %6887 = vmatpush3.bf16.msra.mxu0 %v6884_v22  ;;  %v8632_v22 = vld [vmem:[#allocation4 + $0x71] sm:$0xff] }
 0x152   : > { %6889 = vmatprep.subr.bf16.mxu0 %v6888_v31 }
 0x154   : > { %5851 = vmatmul.mubr.f32.gmra.mrb[12].mxu0 %v8598_v36 }
 0x155   : > { %5853 = vmatprep.mubr.f32.mxu0 %v8600_v37  ;;  %6891 = vmatpush3.bf16.msra.mxu0 %v6888_v31  ;;  %v1246_v31 = vld [vmem:[#allocation9 + $0x1d0] sm:$0xff] }
 0x156   : > { %6893 = vmatprep.subr.bf16.mxu0 %v6892_v40  ;;  %v6916_v41 = vpack.c.bf16 %v1247_v32, %v1246_v31  ;;  %v8664_v31 = vld [vmem:[#allocation4 + $0x129] sm:$0xff]  ;;  %v8668_v32 = vld [vmem:[#allocation4 + $0x131] sm:$0xff] }
 0x158   : > { %5854 = vmatmul.mubr.f32.gmra.mrb[14].mxu0 %v8604_v45 }
 0x159   : > { %5856 = vmatprep.mubr.f32.mxu0 %v8606_v46  ;;  %6895 = vmatpush3.bf16.msra.mxu0 %v6892_v40  ;;  %v8640_v40 = vld [vmem:[#allocation4 + $0xa9] sm:$0xff] }
 0x15a   : > { %6897 = vmatprep.subr.bf16.mxu0 %v6896_v47 }
 0x15c   : > { %5857 = vmatmul.mubr.f32.gmra.mrb[16].mxu0 %v8610_v50 }
 0x15d   : > { %5859 = vmatprep.mubr.f32.mxu0 %v8612_v51 }
 0x160   : > { %5860 = vmatmul.mubr.f32.gmra.mrb[18].mxu0 %v8616_v52 }
 0x161   : > { %5894 = vmatprep.mubr.f32.mxu0 %v952_v55  ;;  %v8644_v55 = vld [vmem:[#allocation4 + $0xb1] sm:$0xff] }
 0x164   : > { %5895 = vmatmul.mubr.f32.vlgmr.msra.gmra.mrb[0].mxu0 %v953_v61  ;;  %v1250_v61 = vld [vmem:[#allocation9 + $0x1f0] sm:$0xff] }
 0x165   : > { %6899 = vmatpush3.bf16.msra.mxu0 %v6896_v47  ;;  %5897 = vmatprep.mubr.f32.mxu0 %v8619_v62  ;;  %v1249_v47 = vld [vmem:[#allocation9 + $0x1e8] sm:$0xff] }
 0x166   : > { %6901 = vmatprep.subr.bf16.mxu0 %v6900_v0  ;;  %v6920_v60 = vpack.c.bf16 %v1249_v47, %v1248_v42  ;;  %v1501_v42 = vld [vmem:[#allocation9 + $0x218] sm:$0xff] }
 0x168   : > { %5898 = vmatmul.mubr.f32.gmra.mrb[2].mxu0 %v8622_v5 }
 0x169   : > { %6903 = vmatpush3.bf16.msra.mxu0 %v6900_v0  ;;  %5900 = vmatprep.mubr.f32.mxu0 %v8624_v6  ;;  %v1251_v0 = vld [vmem:[#allocation9 + $0x1f8] sm:$0xff] }
 0x16a   : > { %6905 = vmatprep.subr.bf16.mxu0 %v6904_v7 }
 0x16c   : > { %5901 = vmatmul.mubr.f32.gmra.mrb[4].mxu0 %v8628_v12 }
 0x16d   : > { %5903 = vmatprep.mubr.f32.mxu0 %v8510_v20  ;;  %6907 = vmatpush3.bf16.msra.mxu0 %v6904_v7  ;;  %v6924_v7 = vpack.c.bf16 %v1251_v0, %v1250_v61  ;;  %v1503_v61 = vld [vmem:[#allocation9 + $0x228] sm:$0xff] }
 0x16e   : > { %6909 = vmatprep.subr.bf16.mxu0 %v6908_v15  ;;  %v2547_v20 = vld [vmem:[#allocation9 + $0x408] sm:$0xff] }
 0x16f   : > { %v8675_v12 = vpack.c.bf16 %v2547_v20, %v2546_v11 }
 0x170   : > { %5904 = vmatmul.mubr.f32.gmra.mrb[6].mxu0 %v8632_v22 }
 0x171   : > { %5906 = vmatprep.mubr.f32.mxu0 %v8634_v25  ;;  %6911 = vmatpush3.bf16.msra.mxu0 %v6908_v15  ;;  %v8656_v15 = vld [vmem:[#allocation4 + $0xf1] sm:$0xff] }
 0x172   : > { %6913 = vmatprep.subr.bf16.mxu0 %v6912_v26  ;;  %7376 = vmatprep.subr.bf16.mxu1 %v8675_v12 }
 0x173   : > { %7384 = vmatpush3.bf16.msra.mxu1 %v8675_v12 }
 0x174   : > { %5907 = vmatmul.mubr.f32.gmra.mrb[8].mxu0 %v8638_v35 }
 0x175   : > { %5909 = vmatprep.mubr.f32.mxu0 %v8640_v40  ;;  %6915 = vmatpush3.bf16.msra.mxu0 %v6912_v26  ;;  %v8662_v26 = vld [vmem:[#allocation4 + $0x111] sm:$0xff] }
 0x176   : > { %6917 = vmatprep.subr.bf16.mxu0 %v6916_v41 }
 0x178   : > { %5910 = vmatmul.mubr.f32.gmra.mrb[10].mxu0 %v8644_v55 }
 0x179   : > { %5912 = vmatprep.mubr.f32.mxu0 %v8646_v59  ;;  %6919 = vmatpush3.bf16.msra.mxu0 %v6916_v41  ;;  %v1500_v41 = vld [vmem:[#allocation9 + $0x210] sm:$0xff] }
 0x17a   : > { %6921 = vmatprep.subr.bf16.mxu0 %v6920_v60  ;;  %v6932_v47 = vpack.c.bf16 %v1501_v42, %v1500_v41  ;;  %v1506_v41 = vld [vmem:[#allocation9 + $0x240] sm:$0xff]  ;;  %v2549_v42 = vld [vmem:[#allocation9 + $0x418] sm:$0xff] }
 0x17c   : > { %5913 = vmatmul.mubr.f32.gmra.mrb[12].mxu0 %v8650_v1 }
 0x17d   : > { %5915 = vmatprep.mubr.f32.mxu0 %v8652_v2  ;;  %6923 = vmatpush3.bf16.msra.mxu0 %v6920_v60  ;;  %v1502_v60 = vld [vmem:[#allocation9 + $0x220] sm:$0xff] }
 0x17e   : > { %6925 = vmatprep.subr.bf16.mxu0 %v6924_v7  ;;  %v6936_v0 = vpack.c.bf16 %v1503_v61, %v1502_v60  ;;  %v1509_v61 = vld [vmem:[#allocation9 + $0x258] sm:$0xff] }
 0x180   : > { %5916 = vmatmul.mubr.f32.gmra.mrb[14].mxu0 %v8656_v15 }
 0x181   : > { %5918 = vmatprep.mubr.f32.mxu0 %v8658_v16  ;;  %6927 = vmatpush3.bf16.msra.mxu0 %v6924_v7  ;;  %v1504_v7 = vld [vmem:[#allocation9 + $0x230] sm:$0xff] }
 0x182   : > { %6929 = vmatprep.subr.bf16.mxu0 %v6928_v17 }
 0x184   : > { %5919 = vmatmul.mubr.f32.gmra.mrb[16].mxu0 %v8662_v26 }
 0x185   : > { %5921 = vmatprep.mubr.f32.mxu0 %v8664_v31 }
 0x188   : > { %5922 = vmatmul.mubr.f32.gmra.mrb[18].mxu0 %v8668_v32 }
 0x189   : > { %5956 = vmatprep.mubr.f32.mxu0 %v8508_v18  ;;  %v6940_v18 = vpack.c.bf16 %v1505_v10, %v1504_v7  ;;  %v2550_v7 = vld [vmem:[#allocation9 + $0x420] sm:$0xff]  ;;  %v2551_v10 = vld [vmem:[#allocation9 + $0x428] sm:$0xff] }
 0x18a   : > { %v8687_v11 = vpack.c.bf16 %v2551_v10, %v2550_v7  ;;  %v2555_v10 = vld [vmem:[#allocation9 + $0x448] sm:$0xff] }
 0x18c   : > { %5957 = vmatmul.mubr.f32.vlgmr.msra.gmra.mrb[0].mxu0 %v8514_v23  ;;  %v1507_v23 = vld [vmem:[#allocation9 + $0x248] sm:$0xff]  ;;  %9307 = vst [vmem:[#allocation34_spill] sm:$0xff] %v8687_v11 }
 0x18d   : > { %6931 = vmatpush3.bf16.msra.mxu0 %v6928_v17  ;;  %5959 = vmatprep.mubr.f32.mxu0 %v8516_v24  ;;  %v2548_v17 = vld [vmem:[#allocation9 + $0x410] sm:$0xff]  ;;  %v6944_v20 = vpack.c.bf16 %v1507_v23, %v1506_v41  ;;  %v1511_v41 = vld [vmem:[#allocation9 + $0x268] sm:$0xff] }
 0x18e   : > { %6933 = vmatprep.subr.bf16.mxu0 %v6932_v47  ;;  %v8681_v60 = vpack.c.bf16 %v2549_v42, %v2548_v17  ;;  %v2552_v23 = vld [vmem:[#allocation9 + $0x430] sm:$0xff]  ;;  %v2553_v42 = vld [vmem:[#allocation9 + $0x438] sm:$0xff] }
 0x190   : > { %5960 = vmatmul.mubr.f32.gmra.mrb[2].mxu0 %v8520_v28  ;;  %9306 = vst [vmem:[#allocation33_spill] sm:$0xff] %v8681_v60  ;;  %7377 = vmatprep.subr.bf16.mxu1 %v8681_v60 }
 0x191   : > { %6935 = vmatpush3.bf16.msra.mxu0 %v6932_v47  ;;  %5962 = vmatprep.mubr.f32.mxu0 %v8522_v29  ;;  %v1508_v47 = vld [vmem:[#allocation9 + $0x250] sm:$0xff] }
 0x192   : > { %6937 = vmatprep.subr.bf16.mxu0 %v6936_v0  ;;  %7385 = vmatpush3.bf16.msra.mxu1 %v8681_v60  ;;  %v6948_v17 = vpack.c.bf16 %v1509_v61, %v1508_v47  ;;  %v8693_v60 = vpack.c.bf16 %v2553_v42, %v2552_v23  ;;  %v1513_v47 = vld [vmem:[#allocation9 + $0x278] sm:$0xff]  ;;  %v2554_v61 = vld [vmem:[#allocation9 + $0x440] sm:$0xff] }
 0x193   : > { %7378 = vmatprep.subr.bf16.mxu1 %v8687_v11  ;;  %v2557_v42 = vld [vmem:[#allocation9 + $0x458] sm:$0xff] }
 0x194   : > { %5963 = vmatmul.mubr.f32.gmra.mrb[4].mxu0 %v8526_v33  ;;  %9308 = vst [vmem:[#allocation35_spill] sm:$0xff] %v8693_v60 }
 0x195   : > { %5965 = vmatprep.mubr.f32.mxu0 %v8528_v34  ;;  %6939 = vmatpush3.bf16.msra.mxu0 %v6936_v0  ;;  %v1510_v0 = vld [vmem:[#allocation9 + $0x260] sm:$0xff] }
 0x196   : > { %6941 = vmatprep.subr.bf16.mxu0 %v6940_v18  ;;  %7386 = vmatpush3.bf16.msra.mxu1 %v8687_v11  ;;  %v6952_v7 = vpack.c.bf16 %v1511_v41, %v1510_v0  ;;  %v8699_v11 = vpack.c.bf16 %v2555_v10, %v2554_v61  ;;  %v1761_v0 = vld [vmem:[#allocation9 + $0x288] sm:$0xff]  ;;  %v2556_v41 = vld [vmem:[#allocation9 + $0x450] sm:$0xff] }
 0x197   : > { %7379 = vmatprep.subr.bf16.mxu1 %v8693_v60  ;;  %v8714_v10 = vld [vmem:[#allocation4 + $0x147] sm:$0xff] }
 0x198   : > { %5966 = vmatmul.mubr.f32.gmra.mrb[6].mxu0 %v8532_v38 }
 0x199   : > { %5968 = vmatprep.mubr.f32.mxu0 %v8534_v39  ;;  %6943 = vmatpush3.bf16.msra.mxu0 %v6940_v18  ;;  %v1512_v18 = vld [vmem:[#allocation9 + $0x270] sm:$0xff] }
 0x19a   : > { %6945 = vmatprep.subr.bf16.mxu0 %v6944_v20  ;;  %7387 = vmatpush3.bf16.msra.mxu1 %v8693_v60  ;;  %v6956_v23 = vpack.c.bf16 %v1513_v47, %v1512_v18  ;;  %v8705_v60 = vpack.c.bf16 %v2557_v42, %v2556_v41  ;;  %v2559_v18 = vld [vmem:[#allocation9 + $0x468] sm:$0xff]  ;;  %v1763_v42 = vld [vmem:[#allocation9 + $0x298] sm:$0xff] }
 0x19b   : > { %7380 = vmatprep.subr.bf16.mxu1 %v8699_v11  ;;  %v8722_v41 = vld [vmem:[#allocation4 + $0x14f] sm:$0xff] }
 0x19c   : > { %5969 = vmatmul.mubr.f32.gmra.mrb[8].mxu0 %v8538_v43 }
 0x19d   : > { %5971 = vmatprep.mubr.f32.mxu0 %v8540_v44  ;;  %6947 = vmatpush3.bf16.msra.mxu0 %v6944_v20  ;;  %v1760_v20 = vld [vmem:[#allocation9 + $0x280] sm:$0xff] }
 0x19e   : > { %6949 = vmatprep.subr.bf16.mxu0 %v6948_v17  ;;  %7388 = vmatpush3.bf16.msra.mxu1 %v8699_v11  ;;  %v6960_v61 = vpack.c.bf16 %v1761_v0, %v1760_v20  ;;  %v2561_v20 = vld [vmem:[#allocation9 + $0x478] sm:$0xff] }
 0x19f   : > { %7381 = vmatprep.subr.bf16.mxu1 %v8705_v60 }
 0x1a0   : > { %5972 = vmatmul.mubr.f32.gmra.mrb[10].mxu0 %v8544_v48 }
 0x1a1   : > { %5974 = vmatprep.mubr.f32.mxu0 %v8546_v49  ;;  %6951 = vmatpush3.bf16.msra.mxu0 %v6948_v17  ;;  %v2558_v17 = vld [vmem:[#allocation9 + $0x460] sm:$0xff] }
 0x1a2   : > { %6953 = vmatprep.subr.bf16.mxu0 %v6952_v7  ;;  %7389 = vmatpush3.bf16.msra.mxu1 %v8705_v60  ;;  %v8711_v47 = vpack.c.bf16 %v2559_v18, %v2558_v17  ;;  %v1764_v18 = vld [vmem:[#allocation9 + $0x2a0] sm:$0xff] }
 0x1a4   : > { %5975 = vmatmul.mubr.f32.gmra.mrb[12].mxu0 %v8550_v53  ;;  %9309 = vst [vmem:[#allocation36_spill] sm:$0xff] %v8711_v47  ;;  %7382 = vmatprep.subr.bf16.mxu1 %v8711_v47 }
 0x1a5   : > { %5977 = vmatprep.mubr.f32.mxu0 %v8552_v54  ;;  %6955 = vmatpush3.bf16.msra.mxu0 %v6952_v7  ;;  %v2560_v7 = vld [vmem:[#allocation9 + $0x470] sm:$0xff] }
 0x1a6   : > { %6957 = vmatprep.subr.bf16.mxu0 %v6956_v23  ;;  %7390 = vmatpush3.bf16.msra.mxu1 %v8711_v47  ;;  %v8719_v0 = vpack.c.bf16 %v2561_v20, %v2560_v7  ;;  %v1765_v7 = vld [vmem:[#allocation9 + $0x2a8] sm:$0xff]  ;;  %v1767_v47 = vld [vmem:[#allocation9 + $0x2b8] sm:$0xff] }
 0x1a7   : > { %v6968_v20 = vpack.c.bf16 %v1765_v7, %v1764_v18  ;;  %v1773_v18 = vld [vmem:[#allocation9 + $0x2e8] sm:$0xff] }
 0x1a8   : > { %5978 = vmatmul.mubr.f32.gmra.mrb[14].mxu0 %v8556_v56  ;;  %9310 = vst [vmem:[#allocation37_spill] sm:$0xff] %v8719_v0  ;;  %7383 = vmatprep.subr.bf16.mxu1 %v8719_v0 }
 0x1a9   : > { %5980 = vmatprep.mubr.f32.mxu0 %v8558_v57  ;;  %6959 = vmatpush3.bf16.msra.mxu0 %v6956_v23  ;;  %v1762_v23 = vld [vmem:[#allocation9 + $0x290] sm:$0xff] }
 0x1aa   : > { %6961 = vmatprep.subr.bf16.mxu0 %v6960_v61  ;;  %7391 = vmatpush3.bf16.msra.mxu1 %v8719_v0  ;;  %v6964_v17 = vpack.c.bf16 %v1763_v42, %v1762_v23  ;;  %v1766_v0 = vld [vmem:[#allocation9 + $0x2b0] sm:$0xff] }
 0x1ab   : > { %v1770_v42 = vld [vmem:[#allocation9 + $0x2d0] sm:$0xff] }
 0x1ac   : > { %5981 = vmatmul.mubr.f32.gmra.mrb[16].mxu0 %v8562_v58 }
 0x1ad   : > { %5983 = vmatprep.mubr.f32.mxu0 %v8714_v10  ;;  %6270 = vmatmul.mubr.f32.vlgmr.msra.gmra.mrb[0].mxu1 %v8632_v22 }
 0x1ae   : > { %6272 = vmatprep.mubr.f32.mxu1 %v8634_v25 }
 0x1b0   : > { %5984 = vmatmul.mubr.f32.gmra.mrb[18].mxu0 %v8722_v41 }
 0x1b1   : > { %6018 = vmatprep.mubr.f32.mxu0 %v8565_v63  ;;  %6273 = vmatmul.mubr.f32.gmra.mrb[2].mxu1 %v8638_v35  ;;  %v6972_v63 = vpack.c.bf16 %v1767_v47, %v1766_v0  ;;  %v1772_v0 = vld [vmem:[#allocation9 + $0x2e0] sm:$0xff] }
 0x1b2   : > { %6275 = vmatprep.mubr.f32.mxu1 %v8640_v40  ;;  %v6984_v7 = vpack.c.bf16 %v1773_v18, %v1772_v0  ;;  %v2544_v18 = vld [vmem:[#allocation4 + $0x171] sm:$0xff] }
 0x1b4   : > { %6019 = vmatmul.mubr.f32.vlgmr.msra.gmra.mrb[0].mxu0 %v8568_v3  ;;  %v1768_v3 = vld [vmem:[#allocation9 + $0x2c0] sm:$0xff] }
 0x1b5   : > { %6963 = vmatpush3.bf16.msra.mxu0 %v6960_v61  ;;  %6021 = vmatprep.mubr.f32.mxu0 %v8570_v4  ;;  %v1769_v61 = vld [vmem:[#allocation9 + $0x2c8] sm:$0xff] }
 0x1b6   : > { %6965 = vmatprep.subr.bf16.mxu0 %v6964_v17  ;;  %6276 = vmatmul.mubr.f32.gmra.mrb[4].mxu1 %v8644_v55  ;;  %v6976_v23 = vpack.c.bf16 %v1769_v61, %v1768_v3  ;;  %v1775_v3 = vld [vmem:[#allocation9 + $0x2f8] sm:$0xff]  ;;  %v8752_v61 = vld [vmem:[#allocation4 + $0x149] sm:$0xff] }
 0x1b7   : > { %6278 = vmatprep.mubr.f32.mxu1 %v8646_v59 }
 0x1b8   : > { %6022 = vmatmul.mubr.f32.gmra.mrb[2].mxu0 %v8574_v8 }
 0x1b9   : > { %6967 = vmatpush3.bf16.msra.mxu0 %v6964_v17  ;;  %6024 = vmatprep.mubr.f32.mxu0 %v8576_v9  ;;  %v1771_v17 = vld [vmem:[#allocation9 + $0x2d8] sm:$0xff] }
 0x1ba   : > { %6969 = vmatprep.subr.bf16.mxu0 %v6968_v20  ;;  %6279 = vmatmul.mubr.f32.gmra.mrb[6].mxu1 %v8650_v1  ;;  %v6980_v47 = vpack.c.bf16 %v1771_v17, %v1770_v42  ;;  %v2023_v42 = vld [vmem:[#allocation9 + $0x308] sm:$0xff]  ;;  %v8758_v17 = vld [vmem:[#allocation4 + $0x151] sm:$0xff] }
 0x1bb   : > { %6281 = vmatprep.mubr.f32.mxu1 %v8652_v2 }
 0x1bc   : > { %6025 = vmatmul.mubr.f32.gmra.mrb[4].mxu0 %v8580_v13 }
 0x1bd   : > { %6027 = vmatprep.mubr.f32.mxu0 %v8582_v14  ;;  %6971 = vmatpush3.bf16.msra.mxu0 %v6968_v20  ;;  %v1774_v20 = vld [vmem:[#allocation9 + $0x2f0] sm:$0xff] }
 0x1be   : > { %6973 = vmatprep.subr.bf16.mxu0 %v6972_v63  ;;  %6282 = vmatmul.mubr.f32.gmra.mrb[8].mxu1 %v8656_v15 }
 0x1bf   : > { %6284 = vmatprep.mubr.f32.mxu1 %v8658_v16 }
 0x1c0   : > { %6028 = vmatmul.mubr.f32.gmra.mrb[6].mxu0 %v8586_v19 }
 0x1c1   : > { %6030 = vmatprep.mubr.f32.mxu0 %v8588_v21  ;;  %6975 = vmatpush3.bf16.msra.mxu0 %v6972_v63  ;;  %v6988_v63 = vpack.c.bf16 %v1775_v3, %v1774_v20  ;;  %v8763_v20 = vld [vmem:[#allocation4 + $0x148] sm:$0xff]  ;;  %v2024_v3 = vld [vmem:[#allocation9 + $0x310] sm:$0xff] }
 0x1c2   : > { %6977 = vmatprep.subr.bf16.mxu0 %v6976_v23  ;;  %6285 = vmatmul.mubr.f32.gmra.mrb[10].mxu1 %v8662_v26  ;;  %9311 = vst [vmem:[#allocation38_spill] sm:$0xff] %v8763_v20 }
 0x1c3   : > { %6287 = vmatprep.mubr.f32.mxu1 %v8664_v31 }
 0x1c4   : > { %6031 = vmatmul.mubr.f32.gmra.mrb[8].mxu0 %v8592_v27 }
 0x1c5   : > { %6033 = vmatprep.mubr.f32.mxu0 %v8594_v30  ;;  %6979 = vmatpush3.bf16.msra.mxu0 %v6976_v23  ;;  %v2022_v23 = vld [vmem:[#allocation9 + $0x300] sm:$0xff] }
 0x1c6   : > { %6981 = vmatprep.subr.bf16.mxu0 %v6980_v47  ;;  %6288 = vmatmul.mubr.f32.gmra.mrb[12].mxu1 %v8668_v32  ;;  %v6992_v0 = vpack.c.bf16 %v2023_v42, %v2022_v23  ;;  %v2025_v23 = vld [vmem:[#allocation9 + $0x318] sm:$0xff] }
 0x1c7   : > { %6290 = vmatprep.mubr.f32.mxu1 %v8752_v61  ;;  %v6996_v42 = vpack.c.bf16 %v2025_v23, %v2024_v3  ;;  %v2031_v3 = vld [vmem:[#allocation9 + $0x348] sm:$0xff]  ;;  %v2034_v23 = vld [vmem:[#allocation9 + $0x360] sm:$0xff] }
 0x1c8   : > { %6034 = vmatmul.mubr.f32.gmra.mrb[10].mxu0 %v8598_v36 }
 0x1c9   : > { %6036 = vmatprep.mubr.f32.mxu0 %v8600_v37  ;;  %6983 = vmatpush3.bf16.msra.mxu0 %v6980_v47  ;;  %v2543_v47 = vld [vmem:[#allocation4 + $0x169] sm:$0xff] }
 0x1ca   : > { %6985 = vmatprep.subr.bf16.mxu0 %v6984_v7  ;;  %6291 = vmatmul.mubr.f32.gmra.mrb[14].mxu1 %v8758_v17 }
 0x1cb   : > { %6293 = vmatprep.mubr.f32.mxu1 %v2543_v47 }
 0x1cc   : > { %6037 = vmatmul.mubr.f32.gmra.mrb[12].mxu0 %v8604_v45 }
 0x1cd   : > { %6039 = vmatprep.mubr.f32.mxu0 %v8606_v46  ;;  %6987 = vmatpush3.bf16.msra.mxu0 %v6984_v7  ;;  %v8767_v7 = vld [vmem:[#allocation4 + $0x150] sm:$0xff] }
 0x1ce   : > { %6989 = vmatprep.subr.bf16.mxu0 %v6988_v63  ;;  %6294 = vmatmul.mubr.f32.gmra.mrb[16].mxu1 %v2544_v18  ;;  %9312 = vst [vmem:[#allocation39_spill] sm:$0xff] %v8767_v7  ;;  %v2028_v18 = vld [vmem:[#allocation9 + $0x330] sm:$0xff] }
 0x1d0   : > { %6040 = vmatmul.mubr.f32.gmra.mrb[14].mxu0 %v8610_v50  ;;  %v9314_v50 = vld [vmem:[#allocation28_spill] sm:$0xff] }
 0x1d1   : > { %6042 = vmatprep.mubr.f32.mxu0 %v8612_v51  ;;  %6991 = vmatpush3.bf16.msra.mxu0 %v6988_v63  ;;  %v2026_v63 = vld [vmem:[#allocation9 + $0x320] sm:$0xff]  ;;  %v2027_v51 = vld [vmem:[#allocation9 + $0x328] sm:$0xff] }
 0x1d2   : > { %6993 = vmatprep.subr.bf16.mxu0 %v6992_v0  ;;  %v7000_v47 = vpack.c.bf16 %v2027_v51, %v2026_v63  ;;  %v2033_v51 = vld [vmem:[#allocation9 + $0x358] sm:$0xff] }
 0x1d3   : > { %v2295_v63 = vld [vmem:[#allocation9 + $0x3d8] sm:$0xff] }
 0x1d4   : > { %6043 = vmatmul.mubr.f32.gmra.mrb[16].mxu0 %v8616_v52  ;;  %v9313_v52 = vld [vmem:[#allocation32_spill] sm:$0xff] }
 0x1d5   : > { %6045 = vmatprep.mubr.f32.mxu0 %v8763_v20  ;;  %v2029_v20 = vld [vmem:[#allocation9 + $0x338] sm:$0xff] }
 0x1d8   : > { %6046 = vmatmul.mubr.f32.gmra.mrb[18].mxu0 %v8767_v7  ;;  %v7004_v7 = vpack.c.bf16 %v2029_v20, %v2028_v18  ;;  %v2035_v20 = vld [vmem:[#allocation9 + $0x368] sm:$0xff]  ;;  %v2299_v18 = vld [vmem:[#allocation9 + $0x3f8] sm:$0xff] }
 0x1d9   : > { %6080 = vmatprep.mubr.f32.mxu0 %v8619_v62  ;;  %v2030_v62 = vld [vmem:[#allocation9 + $0x340] sm:$0xff] }
 0x1dc   : > { %6081 = vmatmul.mubr.f32.vlgmr.msra.gmra.mrb[0].mxu0 %v8622_v5  ;;  %v7008_v5 = vpack.c.bf16 %v2031_v3, %v2030_v62 }
 0x1dd   : > { %6995 = vmatpush3.bf16.msra.mxu0 %v6992_v0  ;;  %6083 = vmatprep.mubr.f32.mxu0 %v8624_v6  ;;  %v2032_v0 = vld [vmem:[#allocation9 + $0x350] sm:$0xff] }
 0x1de   : > { %6997 = vmatprep.subr.bf16.mxu0 %v6996_v42 }
 0x1e0   : > { %6084 = vmatmul.mubr.f32.gmra.mrb[2].mxu0 %v9313_v52 }
 0x1e1   : > { %6999 = vmatpush3.bf16.msra.mxu0 %v6996_v42  ;;  %6086 = vmatprep.mubr.f32.mxu0 %v9314_v50  ;;  %v7012_v50 = vpack.c.bf16 %v2033_v51, %v2032_v0  ;;  %v2037_v42 = vld [vmem:[#allocation9 + $0x378] sm:$0xff]  ;;  %v8861_v51 = vld [vmem:[%s9240_s3] ss:$0 sm:$0xff] }
 0x1e2   : > { %7001 = vmatprep.subr.bf16.mxu0 %v7000_v47 }
 0x1e4   : > { %6087 = vmatmul.mubr.f32.gmra.mrb[4].mxu0 %v8632_v22  ;;  %v7016_v22 = vpack.c.bf16 %v2035_v20, %v2034_v23 }
 0x1e5   : > { %6089 = vmatprep.mubr.f32.mxu0 %v8634_v25  ;;  %7003 = vmatpush3.bf16.msra.mxu0 %v7000_v47  ;;  %v2036_v25 = vld [vmem:[#allocation9 + $0x370] sm:$0xff]  ;;  %v2297_v47 = vld [vmem:[#allocation9 + $0x3e8] sm:$0xff] }
 0x1e6   : > { %7005 = vmatprep.subr.bf16.mxu0 %v7004_v7 }
 0x1e8   : > { %6090 = vmatmul.mubr.f32.gmra.mrb[6].mxu0 %v8638_v35  ;;  %v7020_v35 = vpack.c.bf16 %v2037_v42, %v2036_v25 }
 0x1e9   : > { %6092 = vmatprep.mubr.f32.mxu0 %v8640_v40  ;;  %7007 = vmatpush3.bf16.msra.mxu0 %v7004_v7  ;;  %v2284_v40 = vld [vmem:[#allocation9 + $0x380] sm:$0xff]  ;;  %v2285_v7 = vld [vmem:[#allocation9 + $0x388] sm:$0xff] }
 0x1ea   : > { %7009 = vmatprep.subr.bf16.mxu0 %v7008_v5 }
 0x1ec   : > { %6093 = vmatmul.mubr.f32.gmra.mrb[8].mxu0 %v8644_v55  ;;  %v7024_v55 = vpack.c.bf16 %v2285_v7, %v2284_v40 }
 0x1ed   : > { %6095 = vmatprep.mubr.f32.mxu0 %v8646_v59  ;;  %7011 = vmatpush3.bf16.msra.mxu0 %v7008_v5  ;;  %v2286_v59 = vld [vmem:[#allocation9 + $0x390] sm:$0xff] }
 0x1ee   : > { %7013 = vmatprep.subr.bf16.mxu0 %v7012_v50 }
 0x1f0   : > { %6096 = vmatmul.mubr.f32.gmra.mrb[10].mxu0 %v8650_v1  ;;  %v2287_v1 = vld [vmem:[#allocation9 + $0x398] sm:$0xff] }
 0x1f1   : > { %6098 = vmatprep.mubr.f32.mxu0 %v8652_v2  ;;  %7015 = vmatpush3.bf16.msra.mxu0 %v7012_v50  ;;  %v7028_v2 = vpack.c.bf16 %v2287_v1, %v2286_v59 }
 0x1f2   : > { %7017 = vmatprep.subr.bf16.mxu0 %v7016_v22 }
 0x1f4   : > { %6099 = vmatmul.mubr.f32.gmra.mrb[12].mxu0 %v8656_v15  ;;  %v2288_v15 = vld [vmem:[#allocation9 + $0x3a0] sm:$0xff] }
 0x1f5   : > { %6101 = vmatprep.mubr.f32.mxu0 %v8658_v16  ;;  %7019 = vmatpush3.bf16.msra.mxu0 %v7016_v22  ;;  %v2289_v16 = vld [vmem:[#allocation9 + $0x3a8] sm:$0xff] }
 0x1f6   : > { %7021 = vmatprep.subr.bf16.mxu0 %v7020_v35 }
 0x1f8   : > { %6102 = vmatmul.mubr.f32.gmra.mrb[14].mxu0 %v8662_v26  ;;  %v7032_v26 = vpack.c.bf16 %v2289_v16, %v2288_v15 }
 0x1f9   : > { %6104 = vmatprep.mubr.f32.mxu0 %v8664_v31  ;;  %7023 = vmatpush3.bf16.msra.mxu0 %v7020_v35  ;;  %v2290_v31 = vld [vmem:[#allocation9 + $0x3b0] sm:$0xff] }
 0x1fa   : > { %7025 = vmatprep.subr.bf16.mxu0 %v7024_v55 }
 0x1fc   : > { %6105 = vmatmul.mubr.f32.gmra.mrb[16].mxu0 %v8668_v32  ;;  %v2291_v32 = vld [vmem:[#allocation9 + $0x3b8] sm:$0xff] }
 0x1fd   : > { %6107 = vmatprep.mubr.f32.mxu0 %v8752_v61  ;;  %v7036_v61 = vpack.c.bf16 %v2291_v32, %v2290_v31 }
 0x200   : > { %6108 = vmatmul.mubr.f32.gmra.mrb[18].mxu0 %v8758_v17  ;;  %v2293_v17 = vld [vmem:[#allocation9 + $0x3c8] sm:$0xff] }
 0x201   : > { %6142 = vmatprep.mubr.f32.mxu0 %v8516_v24  ;;  %v2292_v24 = vld [vmem:[#allocation9 + $0x3c0] sm:$0xff] }
 0x204   : > { %6143 = vmatmul.mubr.f32.vlgmr.msra.gmra.mrb[0].mxu0 %v8520_v28  ;;  %v7040_v28 = vpack.c.bf16 %v2293_v17, %v2292_v24 }
 0x205   : > { %7027 = vmatpush3.bf16.msra.mxu0 %v7024_v55  ;;  %6145 = vmatprep.mubr.f32.mxu0 %v8522_v29  ;;  %v2294_v29 = vld [vmem:[#allocation9 + $0x3d0] sm:$0xff] }
 0x206   : > { %7029 = vmatprep.subr.bf16.mxu0 %v7028_v2 }
 0x208   : > { %6146 = vmatmul.mubr.f32.gmra.mrb[2].mxu0 %v8526_v33  ;;  %v7044_v33 = vpack.c.bf16 %v2295_v63, %v2294_v29 }
 0x209   : > { %7031 = vmatpush3.bf16.msra.mxu0 %v7028_v2  ;;  %6148 = vmatprep.mubr.f32.mxu0 %v8528_v34  ;;  %v2296_v34 = vld [vmem:[#allocation9 + $0x3e0] sm:$0xff] }
 0x20a   : > { %7033 = vmatprep.subr.bf16.mxu0 %v7032_v26 }
 0x20c   : > { %6149 = vmatmul.mubr.f32.gmra.mrb[4].mxu0 %v8532_v38  ;;  %v7048_v38 = vpack.c.bf16 %v2297_v47, %v2296_v34 }
 0x20d   : > { %6151 = vmatprep.mubr.f32.mxu0 %v8534_v39  ;;  %7035 = vmatpush3.bf16.msra.mxu0 %v7032_v26  ;;  %v2298_v39 = vld [vmem:[#allocation9 + $0x3f0] sm:$0xff] }
 0x20e   : > { %7037 = vmatprep.subr.bf16.mxu0 %v7036_v61 }
 0x210   : > { %6152 = vmatmul.mubr.f32.gmra.mrb[6].mxu0 %v8538_v43  ;;  %v7052_v43 = vpack.c.bf16 %v2299_v18, %v2298_v39 }
 0x211   : > { %6154 = vmatprep.mubr.f32.mxu0 %v8540_v44  ;;  %7039 = vmatpush3.bf16.msra.mxu0 %v7036_v61  ;;  %v2019_v44 = vld [vmem:[#allocation4 + $0x167] sm:$0xff] }
 0x212   : > { %7041 = vmatprep.subr.bf16.mxu0 %v7040_v28 }
 0x214   : > { %6155 = vmatmul.mubr.f32.gmra.mrb[8].mxu0 %v8544_v48  ;;  %v2020_v48 = vld [vmem:[#allocation4 + $0x16f] sm:$0xff] }
 0x215   : > { %6157 = vmatprep.mubr.f32.mxu0 %v8546_v49  ;;  %7043 = vmatpush3.bf16.msra.mxu0 %v7040_v28  ;;  %v9315_v49 = vld [vmem:[#allocation33_spill] sm:$0xff] }
 0x216   : > { %7045 = vmatprep.subr.bf16.mxu0 %v7044_v33 }
 0x218   : > { %6158 = vmatmul.mubr.f32.gmra.mrb[10].mxu0 %v8550_v53  ;;  %v9316_v53 = vld [vmem:[#allocation34_spill] sm:$0xff] }
 0x219   : > { %6160 = vmatprep.mubr.f32.mxu0 %v8552_v54  ;;  %7047 = vmatpush3.bf16.msra.mxu0 %v7044_v33  ;;  %v9317_v54 = vld [vmem:[#allocation35_spill] sm:$0xff] }
 0x21a   : > { %7049 = vmatprep.subr.bf16.mxu0 %v7048_v38 }
 0x21c   : > { %6161 = vmatmul.mubr.f32.gmra.mrb[12].mxu0 %v8556_v56  ;;  %v9318_v56 = vld [vmem:[#allocation36_spill] sm:$0xff] }
 0x21d   : > { %6163 = vmatprep.mubr.f32.mxu0 %v8558_v57  ;;  %7051 = vmatpush3.bf16.msra.mxu0 %v7048_v38  ;;  %v9319_v57 = vld [vmem:[#allocation29_spill] sm:$0xff] }
 0x21e   : > { %7053 = vmatprep.subr.bf16.mxu0 %v7052_v43 }
 0x220   : > { %6164 = vmatmul.mubr.f32.gmra.mrb[14].mxu0 %v8562_v58  ;;  %v9320_v58 = vld [vmem:[#allocation30_spill] sm:$0xff] }
 0x221   : > { %6166 = vmatprep.mubr.f32.mxu0 %v8714_v10  ;;  %7055 = vmatpush3.bf16.msra.mxu0 %v7052_v43 }
 0x222   : > { %7057 = vmatprep.subr.bf16.mxu0 %v8675_v12 }
 0x224   : > { %6167 = vmatmul.mubr.f32.gmra.mrb[16].mxu0 %v8722_v41 }
 0x225   : > { %6169 = vmatprep.mubr.f32.mxu0 %v2019_v44 }
 0x228   : > { %6170 = vmatmul.mubr.f32.gmra.mrb[18].mxu0 %v2020_v48 }
 0x229   : > { %6204 = vmatprep.mubr.f32.mxu0 %v8570_v4  ;;  %v9321_v4 = vld [vmem:[#allocation37_spill] sm:$0xff] }
 0x22c   : > { %6205 = vmatmul.mubr.f32.vlgmr.msra.gmra.mrb[0].mxu0 %v8574_v8  ;;  %v9322_v8 = vld [vmem:[#allocation31_spill] sm:$0xff] }
 0x22d   : > { %6207 = vmatprep.mubr.f32.mxu0 %v8576_v9  ;;  %7059 = vmatpush3.bf16.msra.mxu0 %v8675_v12  ;;  %v9323_v9 = vld [vmem:[#allocation38_spill] sm:$0xff] }
 0x22e   : > { %7061 = vmatprep.subr.bf16.mxu0 %v9315_v49 }
 0x230   : > { %6208 = vmatmul.mubr.f32.gmra.mrb[2].mxu0 %v8580_v13  ;;  %v2281_v13 = vld [vmem:[#allocation4 + $0x168] sm:$0xff] }
 0x231   : > { %6210 = vmatprep.mubr.f32.mxu0 %v8582_v14  ;;  %7063 = vmatpush3.bf16.msra.mxu0 %v9315_v49  ;;  %v9324_v14 = vld [vmem:[#allocation39_spill] sm:$0xff] }
 0x232   : > { %7065 = vmatprep.subr.bf16.mxu0 %v9316_v53 }
 0x234   : > { %6211 = vmatmul.mubr.f32.gmra.mrb[4].mxu0 %v8586_v19  ;;  %v2282_v19 = vld [vmem:[#allocation4 + $0x170] sm:$0xff] }
 0x235   : > { %6213 = vmatprep.mubr.f32.mxu0 %v8588_v21  ;;  %7067 = vmatpush3.bf16.msra.mxu0 %v9316_v53 }
 0x236   : > { %7069 = vmatprep.subr.bf16.mxu0 %v9317_v54 }
 0x238   : > { %6214 = vmatmul.mubr.f32.gmra.mrb[6].mxu0 %v8592_v27 }
 0x239   : > { %6216 = vmatprep.mubr.f32.mxu0 %v8594_v30  ;;  %7071 = vmatpush3.bf16.msra.mxu0 %v9317_v54 }
 0x23a   : > { %7073 = vmatprep.subr.bf16.mxu0 %v8699_v11 }
 0x23c   : > { %6217 = vmatmul.mubr.f32.gmra.mrb[8].mxu0 %v8598_v36 }
 0x23d   : > { %6219 = vmatprep.mubr.f32.mxu0 %v8600_v37  ;;  %7075 = vmatpush3.bf16.msra.mxu0 %v8699_v11 }
 0x23e   : > { %7077 = vmatprep.subr.bf16.mxu0 %v8705_v60 }
 0x240   : > { %6220 = vmatmul.mubr.f32.gmra.mrb[10].mxu0 %v8604_v45 }
 0x241   : > { %6222 = vmatprep.mubr.f32.mxu0 %v8606_v46  ;;  %7079 = vmatpush3.bf16.msra.mxu0 %v8705_v60 }
 0x242   : > { %7081 = vmatprep.subr.bf16.mxu0 %v9318_v56 }
 0x244   : > { %6223 = vmatmul.mubr.f32.gmra.mrb[12].mxu0 %v9319_v57 }
 0x245   : > { %6225 = vmatprep.mubr.f32.mxu0 %v9320_v58  ;;  %7083 = vmatpush3.bf16.msra.mxu0 %v9318_v56 }
 0x246   : > { %7085 = vmatprep.subr.bf16.mxu0 %v9321_v4 }
 0x248   : > { %6226 = vmatmul.mubr.f32.gmra.mrb[14].mxu0 %v9322_v8 }
 0x249   : > { %6228 = vmatprep.mubr.f32.mxu0 %v9323_v9  ;;  %7087 = vmatpush3.bf16.msra.mxu0 %v9321_v4 }
 0x24c   : > { %6229 = vmatmul.mubr.f32.gmra.mrb[16].mxu0 %v9324_v14 }
 0x24d   : > { %6231 = vmatprep.mubr.f32.mxu0 %v2281_v13 }
 0x250   : > { %6232 = vmatmul.mubr.f32.gmra.mrb[18].mxu0 %v2282_v19 }
 0x251   : > { %6266 = vmatprep.mubr.f32.mxu0 %v8624_v6 }
 0x254   : > { %6267 = vmatmul.mubr.f32.vlgmr.msra.gmra.mrb[0].mxu0 %v9313_v52 }
 0x280   : > { %v6271_v21 = vpop.f32.mrb[0].mxu1 }
 0x281   : > { %v2638_v27 = vpop.f32.mrb[1].mxu1 }
 0x284   : > { %v6274_v30 = vpop.f32.mrb[2].mxu1 }
 0x285   : > { %v2648_v36 = vpop.f32.mrb[3].mxu1 }
 0x289   : > { %v6277_v37 = vpop.f32.mrb[4].mxu1 }
 0x28a   : > { %v2658_v45 = vpop.f32.mrb[5].mxu1 }
 0x28d   : > { %v6280_v46 = vpop.f32.mrb[6].mxu1 }
 0x28e   : > { %v2668_v12 = vpop.f32.mrb[7].mxu1 }
 0x291   : > { %v6283_v60 = vpop.f32.mrb[8].mxu1 }
 0x292   : > { %v2678_v11 = vpop.f32.mrb[9].mxu1 }
 0x295   : > { %v6286_v10 = vpop.f32.mrb[10].mxu1 }
 0x296   : > { %v8844_v41 = vpop.f32.mrb[11].mxu1 }
 0x299   : > { %v8846_v62 = vpop.f32.mrb[12].mxu1 }
 0x29a   : > { %v8848_v3 = vpop.f32.mrb[13].mxu1 }
 0x29d   : > { %v8850_v6 = vpop.f32.mrb[14].mxu1 }
 0x29e   : > { %v8852_v52 = vpop.f32.mrb[15].mxu1 }
 0x2a1   : > { %v8854_v5 = vpop.f32.mrb[16].mxu1 }
 0x2a2   : > { %v8856_v0 = vpop.f32.mrb[17].mxu1 }
 0x303   : > { %v6209_v50 = vpop.f32.mrb[2].mxu0 }
 0x304   : > { %v7400_v23 = vadd.f32 %v6209_v50, %v8861_v51  ;;  %v2376_v20 = vpop.f32.mrb[3].mxu0 }
 0x305   : > { %v7406_v22 = vadd.f32 %v8861_v51, %v2376_v20 }
 0x306   : > { %v7403_v25 = vadd.f32 %v7400_v23, %v6271_v21 }
 0x307   : > { %v6212_v42 = vpop.f32.mrb[4].mxu0  ;;  %v7409_v35 = vadd.f32 %v7406_v22, %v2638_v27 }
 0x308   : > { %v7412_v40 = vadd.f32 %v6212_v42, %v8861_v51  ;;  %v2386_v7 = vpop.f32.mrb[5].mxu0  ;;  %v2810_v55 = vmax.f32 %v7403_v25, 0.0 }
 0x309   : > { %v7418_v59 = vadd.f32 %v8861_v51, %v2386_v7  ;;  %v2809_v1 = vmax.f32 %v7409_v35, 0.0 }
 0x30a   : > { %2830 = vst [vmem:[#allocation4 + $0x30] sm:$0xff] %v2810_v55  ;;  %v7415_v2 = vadd.f32 %v7412_v40, %v6274_v30 }
 0x30b   : > { %v6215_v15 = vpop.f32.mrb[6].mxu0  ;;  %2829 = vst [vmem:[#allocation4 + $0x28] sm:$0xff] %v2809_v1  ;;  %v7421_v16 = vadd.f32 %v7418_v59, %v2648_v36 }
 0x30c   : > { %v7424_v26 = vadd.f32 %v6215_v15, %v8861_v51  ;;  %v2396_v31 = vpop.f32.mrb[7].mxu0  ;;  %v2812_v32 = vmax.f32 %v7415_v2, 0.0 }
 0x30d   : > { %v7430_v61 = vadd.f32 %v8861_v51, %v2396_v31  ;;  %v2811_v24 = vmax.f32 %v7421_v16, 0.0 }
 0x30e   : > { %2832 = vst [vmem:[#allocation4 + $0x50] sm:$0xff] %v2812_v32  ;;  %v7427_v17 = vadd.f32 %v7424_v26, %v6277_v37 }
 0x30f   : > { %v6218_v28 = vpop.f32.mrb[8].mxu0  ;;  %2831 = vst [vmem:[#allocation4 + $0x48] sm:$0xff] %v2811_v24  ;;  %v7433_v29 = vadd.f32 %v7430_v61, %v2658_v45 }
 0x310   : > { %v7436_v63 = vadd.f32 %v6218_v28, %v8861_v51  ;;  %v2406_v33 = vpop.f32.mrb[9].mxu0  ;;  %v2814_v34 = vmax.f32 %v7427_v17, 0.0 }
 0x311   : > { %v7442_v47 = vadd.f32 %v8861_v51, %v2406_v33  ;;  %v2813_v38 = vmax.f32 %v7433_v29, 0.0 }
 0x312   : > { %2834 = vst [vmem:[#allocation4 + $0x70] sm:$0xff] %v2814_v34  ;;  %v7439_v39 = vadd.f32 %v7436_v63, %v6280_v46 }
 0x313   : > { %v6221_v18 = vpop.f32.mrb[10].mxu0  ;;  %2833 = vst [vmem:[#allocation4 + $0x68] sm:$0xff] %v2813_v38  ;;  %v7445_v43 = vadd.f32 %v7442_v47, %v2668_v12 }
 0x314   : > { %v7448_v44 = vadd.f32 %v6221_v18, %v8861_v51  ;;  %v2416_v48 = vpop.f32.mrb[11].mxu0  ;;  %v2816_v49 = vmax.f32 %v7439_v39, 0.0 }
 0x315   : > { %v7454_v53 = vadd.f32 %v8861_v51, %v2416_v48  ;;  %v2815_v54 = vmax.f32 %v7445_v43, 0.0 }
 0x316   : > { %2836 = vst [vmem:[#allocation4 + $0x90] sm:$0xff] %v2816_v49  ;;  %v7451_v56 = vadd.f32 %v7448_v44, %v6283_v60 }
 0x317   : > { %v6224_v57 = vpop.f32.mrb[12].mxu0  ;;  %2835 = vst [vmem:[#allocation4 + $0x88] sm:$0xff] %v2815_v54  ;;  %v7457_v58 = vadd.f32 %v7454_v53, %v2678_v11 }
 0x318   : > { %v7460_v4 = vadd.f32 %v6224_v57, %v8861_v51  ;;  %v2426_v8 = vpop.f32.mrb[13].mxu0  ;;  %v2818_v9 = vmax.f32 %v7451_v56, 0.0 }
 0x319   : > { %v7466_v13 = vadd.f32 %v8861_v51, %v2426_v8  ;;  %v2817_v14 = vmax.f32 %v7457_v58, 0.0 }
 0x31a   : > { %2838 = vst [vmem:[#allocation4 + $0xb0] sm:$0xff] %v2818_v9  ;;  %v7463_v19 = vadd.f32 %v7460_v4, %v6286_v10 }
 0x31b   : > { %v6227_v21 = vpop.f32.mrb[14].mxu0  ;;  %2837 = vst [vmem:[#allocation4 + $0xa8] sm:$0xff] %v2817_v14  ;;  %v7469_v27 = vadd.f32 %v7466_v13, %v8844_v41 }
 0x31c   : > { %v7472_v30 = vadd.f32 %v6227_v21, %v8861_v51  ;;  %v2436_v36 = vpop.f32.mrb[15].mxu0  ;;  %v2820_v37 = vmax.f32 %v7463_v19, 0.0 }
 0x31d   : > { %v7478_v45 = vadd.f32 %v8861_v51, %v2436_v36  ;;  %v2819_v46 = vmax.f32 %v7469_v27, 0.0 }
 0x31e   : > { %2840 = vst [vmem:[#allocation4 + $0xd0] sm:$0xff] %v2820_v37  ;;  %v7475_v12 = vadd.f32 %v7472_v30, %v8846_v62 }
 0x31f   : > { %v6230_v60 = vpop.f32.mrb[16].mxu0  ;;  %2839 = vst [vmem:[#allocation4 + $0xc8] sm:$0xff] %v2819_v46  ;;  %v7481_v11 = vadd.f32 %v7478_v45, %v8848_v3 }
 0x320   : > { %v7484_v10 = vadd.f32 %v6230_v60, %v8861_v51  ;;  %v2446_v50 = vpop.f32.mrb[17].mxu0  ;;  %v2822_v23 = vmax.f32 %v7475_v12, 0.0 }
 0x321   : > { %v7490_v41 = vadd.f32 %v8861_v51, %v2446_v50  ;;  %v2821_v20 = vmax.f32 %v7481_v11, 0.0 }
 0x322   : > { %2842 = vst [vmem:[#allocation4 + $0xf0] sm:$0xff] %v2822_v23  ;;  %v7487_v22 = vadd.f32 %v7484_v10, %v8850_v6 }
 0x323   : > { %v6233_v25 = vpop.f32.mrb[18].mxu0  ;;  %2841 = vst [vmem:[#allocation4 + $0xe8] sm:$0xff] %v2821_v20  ;;  %v7493_v42 = vadd.f32 %v7490_v41, %v8852_v52 }
 0x324   : > { %v7496_v62 = vadd.f32 %v6233_v25, %v8861_v51  ;;  %v2456_v35 = vpop.f32.mrb[19].mxu0  ;;  %v2824_v40 = vmax.f32 %v7487_v22, 0.0 }
 0x325   : > { %v7502_v3 = vadd.f32 %v8861_v51, %v2456_v35  ;;  %v2823_v7 = vmax.f32 %v7493_v42, 0.0 }
 0x326   : > { %2844 = vst [vmem:[#allocation4 + $0x110] sm:$0xff] %v2824_v40  ;;  %v7499_v55 = vadd.f32 %v7496_v62, %v8854_v5  ;;  %v8188_v5 = vmov (!%p5108_p4), 0.0  }
 0x327   : > { %v6268_v59 = vpop.f32.mrb[0].mxu0  ;;  %2843 = vst [vmem:[#allocation4 + $0x108] sm:$0xff] %v2823_v7  ;;  %v7505_v1 = vadd.f32 %v7502_v3, %v8856_v0  ;;  %2849 = sbr.rel (%p5108_p4) target bundleno = 815 (0x32f), region = 80 }
 0x328   : > { %v7394_v6 = vadd.f32 %v6268_v59, %v8861_v51  ;;  %v2628_v2 = vpop.f32.mrb[1].mxu0  ;;  %v2826_v15 = vmax.f32 %v7499_v55, 0.0 }
 0x329   : > { %v7397_v52 = vadd.f32 %v8861_v51, %v2628_v2  ;;  %v2825_v16 = vmax.f32 %v7505_v1, 0.0 }
 0x32a   : > { %v2808_v26 = vmax.f32 %v7394_v6, 0.0  ;;  %2846 = vst [vmem:[#allocation4 + $0x130] sm:$0xff] %v2826_v15 }
 0x32b   : > { %v2807_v31 = vmax.f32 %v7397_v52, 0.0  ;;  %2845 = vst [vmem:[#allocation4 + $0x128] sm:$0xff] %v2825_v16 }
 0x32c   : > { %2828 = vst [vmem:[#allocation4 + $0x10] sm:$0xff] %v2808_v26 }
 0x32d   : > { %2827 = vst [vmem:[#allocation4 + $0x8] sm:$0xff] %v2807_v31  ;;  %2851 = vst [vmem:[#allocation4 + $0x10] sm:$0xff] (!%p5108_p4), %v8188_v5 }
 0x32e   : > { %2850 = vst [vmem:[#allocation4 + $0x8] sm:$0xff] %v8188_v5 }
 0x32f PF: > { %2854 = sbr.rel (%p5109_p10) target bundleno = 822 (0x336), region = 84  ;;  %v8189_v0 = vmov (!%p5109_p10), 0.0  }
 0x330   : > { %2856 = vst [vmem:[#allocation4 + $0x128] sm:$0xff] (!%p5109_p10), %v8189_v0  ;;  %2857 = vst [vmem:[#allocation4 + $0x130] sm:$0xff] (!%p5109_p10), %v8189_v0 }
 0x336 PF: > { %v2874_v51 = vld [vmem:[#allocation11] sm:$0xff]  ;;  %v2875_v32 = vld [vmem:[#allocation11 + $0x8] sm:$0xff]  ;;  %v2876_v61 = vld [vmem:[#allocation11 + $0x10] sm:$0xff]  ;;  %s9325_s30 = sld [smem:[#allocation43_spill]]  ;;  %s5125_s12 = sshll.u32 %s8159_s24, 4 }
 0x337   : > { %v7088_v24 = vpack.c.bf16 %v2875_v32, %v2874_v51  ;;  %v2877_v17 = vld [vmem:[#allocation11 + $0x18] sm:$0xff]  ;;  %v2878_v29 = vld [vmem:[#allocation11 + $0x20] sm:$0xff]  ;;  %v2879_v63 = vld [vmem:[#allocation11 + $0x28] sm:$0xff]  ;;  %s5117_s15 = sshll.u32 %s8163_s25, 5  ;;  %s4947_s25 = sshll.u32 %s8475_s7, 4  ;;  %s9181_s25 = int_to_ptr.vmem [resolvable:$true] %s4947_s25 }
 0x338   : > { %v7092_v28 = vpack.c.bf16 %v2877_v17, %v2876_v61  ;;  %v7096_v33 = vpack.c.bf16 %v2879_v63, %v2878_v29  ;;  %v2858_v34 = vld [vmem:[#allocation4 + $0x7] sm:$0xff]  ;;  %v2880_v47 = vld [vmem:[#allocation11 + $0x30] sm:$0xff]  ;;  %v2881_v38 = vld [vmem:[#allocation11 + $0x38] sm:$0xff]  ;;  %s4944_s13 = sadd.s32 %s5125_s12, %s5117_s15  ;;  %s9327_s10 = sld [smem:[#allocation44_spill]] }
 0x339   : > { %7089 = vmatprep.subr.bf16.mxu1 %v7088_v24  ;;  %6328 = vmatprep.mubr.f32.mxu1 %v2858_v34  ;;  %v7100_v39 = vpack.c.bf16 %v2881_v38, %v2880_v47  ;;  %v2882_v18 = vld [vmem:[#allocation11 + $0x40] sm:$0xff]  ;;  %v2883_v43 = vld [vmem:[#allocation11 + $0x48] sm:$0xff]  ;;  %v2884_v48 = vld [vmem:[#allocation11 + $0x50] sm:$0xff]  ;;  %s5118_s24 = sshll.u32 %s4944_s13, 7  ;;  %s4931_s9 = scalar_lea.sflag [#allocation8], %s8440_s18 }
 0x33a   : > { %7091 = vmatpush3.bf16.msra.mxu1 %v7088_v24  ;;  %v7104_v44 = vpack.c.bf16 %v2883_v43, %v2882_v18  ;;  %v2885_v49 = vld [vmem:[#allocation11 + $0x58] sm:$0xff]  ;;  %v2886_v54 = vld [vmem:[#allocation11 + $0x60] sm:$0xff]  ;;  %v2887_v56 = vld [vmem:[#allocation11 + $0x68] sm:$0xff]  ;;  %s8069_s0 = scalar_lea.vmem %s9181_s25, 2048 }
 0x33b   : > { %7093 = vmatprep.subr.bf16.mxu1 %v7092_v28  ;;  %v7108_v53 = vpack.c.bf16 %v2885_v49, %v2884_v48  ;;  %v7112_v57 = vpack.c.bf16 %v2887_v56, %v2886_v54  ;;  %v2888_v58 = vld [vmem:[#allocation11 + $0x70] sm:$0xff]  ;;  %v2889_v4 = vld [vmem:[#allocation11 + $0x78] sm:$0xff]  ;;  %v3075_v9 = vld [vmem:[#allocation11 + $0x80] sm:$0xff]  ;;  %p8070_p6 = scmp.ne.s32.totalorder %s9181_s25, %s8069_s0 }
 0x33c   : > { %v7116_v8 = vpack.c.bf16 %v2889_v4, %v2888_v58  ;;  %v3076_v13 = vld [vmem:[#allocation11 + $0x88] sm:$0xff]  ;;  %v3077_v19 = vld [vmem:[#allocation11 + $0x90] sm:$0xff]  ;;  %v3078_v21 = vld [vmem:[#allocation11 + $0x98] sm:$0xff] }
 0x33d   : > { %v7120_v14 = vpack.c.bf16 %v3076_v13, %v3075_v9  ;;  %v2859_v27 = vld [vmem:[#allocation4 + $0xf] sm:$0xff]  ;;  %v8894_v30 = vld [vmem:[#allocation4 + $0x27] sm:$0xff]  ;;  %v7124_v36 = vpack.c.bf16 %v3078_v21, %v3077_v19  ;;  %v3082_v10 = vld [vmem:[#allocation11 + $0xb8] sm:$0xff]  ;;  %p8071_p11 = pnand %p8070_p6, %p8376_p8 }
 0x33e   : > { %7095 = vmatpush3.bf16.msra.mxu1 %v7092_v28  ;;  %v3079_v37 = vld [vmem:[#allocation11 + $0xa0] sm:$0xff]  ;;  %v3080_v45 = vld [vmem:[#allocation11 + $0xa8] sm:$0xff]  ;;  %v3081_v11 = vld [vmem:[#allocation11 + $0xb0] sm:$0xff]  ;;  %s9179_s5 = scalar_lea.hbm %s9327_s10, %s5118_s24 }
 0x33f   : > { %7097 = vmatprep.subr.bf16.mxu1 %v7096_v33  ;;  %v8897_v46 = vld [vmem:[#allocation4 + $0x2f] sm:$0xff]  ;;  %v8899_v12 = vld [vmem:[#allocation4 + $0x47] sm:$0xff]  ;;  %v7128_v60 = vpack.c.bf16 %v3080_v45, %v3079_v37  ;;  %v7132_v41 = vpack.c.bf16 %v3082_v10, %v3081_v11  ;;  %v3086_v40 = vld [vmem:[#allocation11 + $0xd8] sm:$0xff]  ;;  %p8072_p13 = pneg %p8071_p11 }
 0x340   : > { %v8903_v50 = vld [vmem:[#allocation4 + $0x4f] sm:$0xff]  ;;  %v8905_v23 = vld [vmem:[#allocation4 + $0x67] sm:$0xff]  ;;  %v3090_v16 = vld [vmem:[#allocation11 + $0xf8] sm:$0xff] }
 0x341   : > { %v3083_v20 = vld [vmem:[#allocation11 + $0xc0] sm:$0xff]  ;;  %v3084_v22 = vld [vmem:[#allocation11 + $0xc8] sm:$0xff]  ;;  %v3085_v35 = vld [vmem:[#allocation11 + $0xd0] sm:$0xff] }
 0x342   : > { %7099 = vmatpush3.bf16.msra.mxu1 %v7096_v33  ;;  %v8909_v25 = vld [vmem:[#allocation4 + $0x6f] sm:$0xff]  ;;  %v8911_v42 = vld [vmem:[#allocation4 + $0x87] sm:$0xff]  ;;  %v7136_v62 = vpack.c.bf16 %v3084_v22, %v3083_v20  ;;  %v7140_v55 = vpack.c.bf16 %v3086_v40, %v3085_v35  ;;  %v3304_v28 = vld [vmem:[#allocation11 + $0x118] sm:$0xff] }
 0x343   : > { %7101 = vmatprep.subr.bf16.mxu1 %v7100_v39  ;;  %v8915_v3 = vld [vmem:[#allocation4 + $0x8f] sm:$0xff]  ;;  %v8917_v7 = vld [vmem:[#allocation4 + $0xa7] sm:$0xff]  ;;  %v3312_v9 = vld [vmem:[#allocation11 + $0x158] sm:$0xff] }
 0x344   : > { %v3087_v59 = vld [vmem:[#allocation11 + $0xe0] sm:$0xff]  ;;  %v3088_v1 = vld [vmem:[#allocation11 + $0xe8] sm:$0xff]  ;;  %v3089_v52 = vld [vmem:[#allocation11 + $0xf0] sm:$0xff] }
 0x345   : > { %v8921_v6 = vld [vmem:[#allocation4 + $0xaf] sm:$0xff]  ;;  %v8923_v2 = vld [vmem:[#allocation4 + $0xc7] sm:$0xff]  ;;  %v7144_v15 = vpack.c.bf16 %v3088_v1, %v3087_v59  ;;  %v7148_v5 = vpack.c.bf16 %v3090_v16, %v3089_v52  ;;  %v3316_v11 = vld [vmem:[#allocation11 + $0x178] sm:$0xff] }
 0x346   : > { %7103 = vmatpush3.bf16.msra.mxu1 %v7100_v39  ;;  %v8927_v26 = vld [vmem:[#allocation4 + $0xcf] sm:$0xff]  ;;  %v8929_v31 = vld [vmem:[#allocation4 + $0xe7] sm:$0xff]  ;;  %v3530_v1 = vld [vmem:[#allocation11 + $0x198] sm:$0xff] }
 0x347   : > { %7105 = vmatprep.subr.bf16.mxu1 %v7104_v44  ;;  %v3301_v0 = vld [vmem:[#allocation11 + $0x100] sm:$0xff]  ;;  %v3302_v51 = vld [vmem:[#allocation11 + $0x108] sm:$0xff]  ;;  %v3303_v17 = vld [vmem:[#allocation11 + $0x110] sm:$0xff] }
 0x348   : > { %v8933_v32 = vld [vmem:[#allocation4 + $0xef] sm:$0xff]  ;;  %v7152_v24 = vpack.c.bf16 %v3302_v51, %v3301_v0  ;;  %v7156_v33 = vpack.c.bf16 %v3304_v28, %v3303_v17  ;;  %v3305_v34 = vld [vmem:[#allocation11 + $0x120] sm:$0xff]  ;;  %v3534_v28 = vld [vmem:[#allocation11 + $0x1b8] sm:$0xff] }
 0x349   : > { %v3058_v61 = vld [vmem:[#allocation4 + $0x8] sm:$0xff]  ;;  %v3059_v29 = vld [vmem:[#allocation4 + $0x10] sm:$0xff]  ;;  %v3309_v54 = vld [vmem:[#allocation11 + $0x140] sm:$0xff] }
 0x34a   : > { %7107 = vmatpush3.bf16.msra.mxu1 %v7104_v44  ;;  %v8936_v63 = vld [vmem:[#allocation4 + $0x28] sm:$0xff]  ;;  %v8939_v38 = vld [vmem:[#allocation4 + $0x30] sm:$0xff]  ;;  %v3308_v44 = vld [vmem:[#allocation11 + $0x138] sm:$0xff] }
 0x34b   : > { %7109 = vmatprep.subr.bf16.mxu1 %v7108_v53  ;;  %v3306_v47 = vld [vmem:[#allocation11 + $0x128] sm:$0xff]  ;;  %v3307_v43 = vld [vmem:[#allocation11 + $0x130] sm:$0xff]  ;;  %v3313_v21 = vld [vmem:[#allocation11 + $0x160] sm:$0xff] }
 0x34c   : > { %v8941_v39 = vld [vmem:[#allocation4 + $0x48] sm:$0xff]  ;;  %v7160_v18 = vpack.c.bf16 %v3306_v47, %v3305_v34  ;;  %v8945_v48 = vld [vmem:[#allocation4 + $0x50] sm:$0xff]  ;;  %v3527_v22 = vld [vmem:[#allocation11 + $0x180] sm:$0xff] }
 0x34d   : > { %v8947_v49 = vld [vmem:[#allocation4 + $0x68] sm:$0xff]  ;;  %v8957_v13 = vld [vmem:[#allocation4 + $0x90] sm:$0xff]  ;;  %v3535_v47 = vld [vmem:[#allocation11 + $0x1c0] sm:$0xff] }
 0x34e   : > { %7111 = vmatpush3.bf16.msra.mxu1 %v7108_v53  ;;  %v7164_v53 = vpack.c.bf16 %v3308_v44, %v3307_v43  ;;  %v3310_v56 = vld [vmem:[#allocation11 + $0x148] sm:$0xff]  ;;  %v8969_v10 = vld [vmem:[#allocation4 + $0xd0] sm:$0xff] }
 0x34f   : > { %7113 = vmatprep.subr.bf16.mxu1 %v7112_v57  ;;  %v8953_v58 = vld [vmem:[#allocation4 + $0x88] sm:$0xff]  ;;  %v7168_v4 = vpack.c.bf16 %v3310_v56, %v3309_v54  ;;  %v8975_v35 = vld [vmem:[#allocation4 + $0xf0] sm:$0xff]  ;;  %v3538_v56 = vld [vmem:[#allocation11 + $0x1d8] sm:$0xff] }
 0x350   : > { %v8965_v37 = vld [vmem:[#allocation4 + $0xc8] sm:$0xff]  ;;  %v3529_v59 = vld [vmem:[#allocation11 + $0x190] sm:$0xff] }
 0x351   : > { %v3284_v40 = vld [vmem:[#allocation4 + $0x9] sm:$0xff]  ;;  %v7188_v16 = vpack.c.bf16 %v3530_v1, %v3529_v59  ;;  %v8981_v51 = vld [vmem:[#allocation4 + $0x31] sm:$0xff] }
 0x352   : > { %7115 = vmatpush3.bf16.msra.mxu1 %v7112_v57  ;;  %v8951_v57 = vld [vmem:[#allocation4 + $0x70] sm:$0xff]  ;;  %v3532_v0 = vld [vmem:[#allocation11 + $0x1a8] sm:$0xff] }
 0x353   : > { %7117 = vmatprep.subr.bf16.mxu1 %v7116_v8  ;;  %v8978_v52 = vld [vmem:[#allocation4 + $0x29] sm:$0xff]  ;;  %v8993_v43 = vld [vmem:[#allocation4 + $0x71] sm:$0xff] }
 0x354   : > { %v3533_v17 = vld [vmem:[#allocation11 + $0x1b0] sm:$0xff]  ;;  %v3754_v59 = vld [vmem:[#allocation11 + $0x208] sm:$0xff] }
 0x355   : > { %v7196_v34 = vpack.c.bf16 %v3534_v28, %v3533_v17  ;;  %v8995_v44 = vld [vmem:[#allocation4 + $0x89] sm:$0xff]  ;;  %v9017_v1 = vld [vmem:[#allocation4 + $0xf1] sm:$0xff] }
 0x356   : > { %7119 = vmatpush3.bf16.msra.mxu1 %v7116_v8  ;;  %v3311_v8 = vld [vmem:[#allocation11 + $0x150] sm:$0xff]  ;;  %v3758_v17 = vld [vmem:[#allocation11 + $0x228] sm:$0xff] }
 0x357   : > { %7121 = vmatprep.subr.bf16.mxu1 %v7120_v14  ;;  %v7172_v19 = vpack.c.bf16 %v3312_v9, %v3311_v8  ;;  %v3537_v54 = vld [vmem:[#allocation11 + $0x1d0] sm:$0xff] }
 0x358   : > { %v9001_v8 = vld [vmem:[#allocation4 + $0xa9] sm:$0xff]  ;;  %v7204_v9 = vpack.c.bf16 %v3538_v56, %v3537_v54  ;;  %v3764_v56 = vld [vmem:[#allocation11 + $0x258] sm:$0xff] }
 0x359   : > { %6329 = vmatmul.mubr.f32.vlgmr.msra.gmra.mrb[18].mxu1 %v2859_v27  ;;  %v3314_v27 = vld [vmem:[#allocation11 + $0x168] sm:$0xff]  ;;  %v3763_v54 = vld [vmem:[#allocation11 + $0x250] sm:$0xff] }
 0x35a   : > { %7123 = vmatpush3.bf16.msra.mxu1 %v7120_v14  ;;  %6331 = vmatprep.mubr.f32.mxu1 %v8894_v30  ;;  %v8959_v14 = vld [vmem:[#allocation4 + $0xa8] sm:$0xff]  ;;  %v7176_v45 = vpack.c.bf16 %v3314_v27, %v3313_v21  ;;  %v9005_v27 = vld [vmem:[#allocation4 + $0xb1] sm:$0xff] }
 0x35b   : > { %7125 = vmatprep.subr.bf16.mxu1 %v7124_v36  ;;  %v3540_v21 = vld [vmem:[#allocation11 + $0x1e8] sm:$0xff] }
 0x35d   : > { %6332 = vmatmul.mubr.f32.gmra.mrb[20].mxu1 %v8897_v46 }
 0x35e   : > { %7127 = vmatpush3.bf16.msra.mxu1 %v7124_v36  ;;  %6334 = vmatprep.mubr.f32.mxu1 %v8899_v12  ;;  %v8963_v36 = vld [vmem:[#allocation4 + $0xb0] sm:$0xff] }
 0x35f   : > { %7129 = vmatprep.subr.bf16.mxu1 %v7128_v60 }
 0x361   : > { %6335 = vmatmul.mubr.f32.gmra.mrb[22].mxu1 %v8903_v50 }
 0x362   : > { %7131 = vmatpush3.bf16.msra.mxu1 %v7128_v60  ;;  %6337 = vmatprep.mubr.f32.mxu1 %v8905_v23  ;;  %v3315_v60 = vld [vmem:[#allocation11 + $0x170] sm:$0xff] }
 0x363   : > { %7133 = vmatprep.subr.bf16.mxu1 %v7132_v41  ;;  %v7180_v20 = vpack.c.bf16 %v3316_v11, %v3315_v60  ;;  %v3541_v11 = vld [vmem:[#allocation11 + $0x1f0] sm:$0xff] }
 0x365   : > { %6338 = vmatmul.mubr.f32.gmra.mrb[24].mxu1 %v8909_v25 }
 0x366   : > { %7135 = vmatpush3.bf16.msra.mxu1 %v7132_v41  ;;  %6340 = vmatprep.mubr.f32.mxu1 %v8911_v42  ;;  %v8971_v41 = vld [vmem:[#allocation4 + $0xe8] sm:$0xff] }
 0x367   : > { %7137 = vmatprep.subr.bf16.mxu1 %v7136_v62 }
 0x369   : > { %6341 = vmatmul.mubr.f32.gmra.mrb[26].mxu1 %v8915_v3 }
 0x36a   : > { %7139 = vmatpush3.bf16.msra.mxu1 %v7136_v62  ;;  %6343 = vmatprep.mubr.f32.mxu1 %v8917_v7  ;;  %v3528_v62 = vld [vmem:[#allocation11 + $0x188] sm:$0xff] }
 0x36b   : > { %7141 = vmatprep.subr.bf16.mxu1 %v7140_v55 }
 0x36d   : > { %6344 = vmatmul.mubr.f32.gmra.mrb[28].mxu1 %v8921_v6 }
 0x36e   : > { %7143 = vmatpush3.bf16.msra.mxu1 %v7140_v55  ;;  %6346 = vmatprep.mubr.f32.mxu1 %v8923_v2  ;;  %v7184_v55 = vpack.c.bf16 %v3528_v62, %v3527_v22  ;;  %v9011_v22 = vld [vmem:[#allocation4 + $0xd1] sm:$0xff]  ;;  %v9013_v62 = vld [vmem:[#allocation4 + $0xe9] sm:$0xff] }
 0x36f   : > { %7145 = vmatprep.subr.bf16.mxu1 %v7144_v15 }
 0x371   : > { %6347 = vmatmul.mubr.f32.gmra.mrb[30].mxu1 %v8927_v26 }
 0x372   : > { %7147 = vmatpush3.bf16.msra.mxu1 %v7144_v15  ;;  %6349 = vmatprep.mubr.f32.mxu1 %v8929_v31  ;;  %v3285_v15 = vld [vmem:[#allocation4 + $0x11] sm:$0xff] }
 0x373   : > { %7149 = vmatprep.subr.bf16.mxu1 %v7148_v5 }
 0x375   : > { %6350 = vmatmul.mubr.f32.gmra.mrb[32].mxu1 %v8933_v32 }
 0x376   : > { %7151 = vmatpush3.bf16.msra.mxu1 %v7148_v5  ;;  %6384 = vmatprep.mubr.f32.mxu1 %v3058_v61  ;;  %v3531_v5 = vld [vmem:[#allocation11 + $0x1a0] sm:$0xff]  ;;  %v8983_v61 = vld [vmem:[#allocation4 + $0x49] sm:$0xff] }
 0x377   : > { %7153 = vmatprep.subr.bf16.mxu1 %v7152_v24 }
 0x379   : > { %6385 = vmatmul.mubr.f32.vlgmr.msra.gmra.mrb[18].mxu1 %v3059_v29  ;;  %v8987_v29 = vld [vmem:[#allocation4 + $0x51] sm:$0xff] }
 0x37a   : > { %7155 = vmatpush3.bf16.msra.mxu1 %v7152_v24  ;;  %6387 = vmatprep.mubr.f32.mxu1 %v8936_v63  ;;  %v7192_v24 = vpack.c.bf16 %v3532_v0, %v3531_v5  ;;  %v3756_v5 = vld [vmem:[#allocation11 + $0x218] sm:$0xff] }
 0x37b   : > { %7157 = vmatprep.subr.bf16.mxu1 %v7156_v33 }
 0x37d   : > { %6388 = vmatmul.mubr.f32.gmra.mrb[20].mxu1 %v8939_v38 }
 0x37e   : > { %7159 = vmatpush3.bf16.msra.mxu1 %v7156_v33  ;;  %6390 = vmatprep.mubr.f32.mxu1 %v8941_v39  ;;  %v8989_v33 = vld [vmem:[#allocation4 + $0x69] sm:$0xff] }
 0x37f   : > { %7161 = vmatprep.subr.bf16.mxu1 %v7160_v18 }
 0x381   : > { %6391 = vmatmul.mubr.f32.gmra.mrb[22].mxu1 %v8945_v48 }
 0x382   : > { %7163 = vmatpush3.bf16.msra.mxu1 %v7160_v18  ;;  %6393 = vmatprep.mubr.f32.mxu1 %v8947_v49  ;;  %v3536_v18 = vld [vmem:[#allocation11 + $0x1c8] sm:$0xff] }
 0x383   : > { %7165 = vmatprep.subr.bf16.mxu1 %v7164_v53 }
 0x385   : > { %6394 = vmatmul.mubr.f32.gmra.mrb[24].mxu1 %v8951_v57 }
 0x386   : > { %7167 = vmatpush3.bf16.msra.mxu1 %v7164_v53  ;;  %6396 = vmatprep.mubr.f32.mxu1 %v8953_v58  ;;  %v7200_v53 = vpack.c.bf16 %v3536_v18, %v3535_v47  ;;  %v3760_v47 = vld [vmem:[#allocation11 + $0x238] sm:$0xff]  ;;  %v3761_v18 = vld [vmem:[#allocation11 + $0x240] sm:$0xff] }
 0x387   : > { %7169 = vmatprep.subr.bf16.mxu1 %v7168_v4 }
 0x389   : > { %6397 = vmatmul.mubr.f32.gmra.mrb[26].mxu1 %v8957_v13 }
 0x38a   : > { %7171 = vmatpush3.bf16.msra.mxu1 %v7168_v4  ;;  %6399 = vmatprep.mubr.f32.mxu1 %v8959_v14  ;;  %v8999_v4 = vld [vmem:[#allocation4 + $0x91] sm:$0xff] }
 0x38b   : > { %7173 = vmatprep.subr.bf16.mxu1 %v7172_v19 }
 0x38d   : > { %6400 = vmatmul.mubr.f32.gmra.mrb[28].mxu1 %v8963_v36 }
 0x38e   : > { %7175 = vmatpush3.bf16.msra.mxu1 %v7172_v19  ;;  %6402 = vmatprep.mubr.f32.mxu1 %v8965_v37  ;;  %v3539_v19 = vld [vmem:[#allocation11 + $0x1e0] sm:$0xff] }
 0x38f   : > { %7177 = vmatprep.subr.bf16.mxu1 %v7176_v45  ;;  %v7208_v60 = vpack.c.bf16 %v3540_v21, %v3539_v19  ;;  %v3765_v19 = vld [vmem:[#allocation11 + $0x260] sm:$0xff]  ;;  %v3766_v21 = vld [vmem:[#allocation11 + $0x268] sm:$0xff] }
 0x391   : > { %6403 = vmatmul.mubr.f32.gmra.mrb[30].mxu1 %v8969_v10 }
 0x392   : > { %7179 = vmatpush3.bf16.msra.mxu1 %v7176_v45  ;;  %6405 = vmatprep.mubr.f32.mxu1 %v8971_v41  ;;  %v9007_v45 = vld [vmem:[#allocation4 + $0xc9] sm:$0xff] }
 0x393   : > { %7181 = vmatprep.subr.bf16.mxu1 %v7180_v20 }
 0x395   : > { %6406 = vmatmul.mubr.f32.gmra.mrb[32].mxu1 %v8975_v35 }
 0x396   : > { %7183 = vmatpush3.bf16.msra.mxu1 %v7180_v20  ;;  %6440 = vmatprep.mubr.f32.mxu1 %v3284_v40  ;;  %v3542_v20 = vld [vmem:[#allocation11 + $0x1f8] sm:$0xff] }
 0x397   : > { %7185 = vmatprep.subr.bf16.mxu1 %v7184_v55  ;;  %v7212_v40 = vpack.c.bf16 %v3542_v20, %v3541_v11  ;;  %v3767_v11 = vld [vmem:[#allocation11 + $0x270] sm:$0xff]  ;;  %v3768_v20 = vld [vmem:[#allocation11 + $0x278] sm:$0xff] }
 0x399   : > { %6441 = vmatmul.mubr.f32.vlgmr.msra.gmra.mrb[18].mxu1 %v3285_v15 }
 0x39a   : > { %7187 = vmatpush3.bf16.msra.mxu1 %v7184_v55  ;;  %6443 = vmatprep.mubr.f32.mxu1 %v8978_v52  ;;  %v3753_v55 = vld [vmem:[#allocation11 + $0x200] sm:$0xff] }
 0x39b   : > { %7189 = vmatprep.subr.bf16.mxu1 %v7188_v16  ;;  %v7216_v15 = vpack.c.bf16 %v3754_v59, %v3753_v55  ;;  %v7244_v55 = vpack.c.bf16 %v3768_v20, %v3767_v11  ;;  %v3979_v59 = vld [vmem:[#allocation11 + $0x280] sm:$0xff]  ;;  %v3993_v11 = vld [vmem:[#allocation11 + $0x2f0] sm:$0xff]  ;;  %v3994_v20 = vld [vmem:[#allocation11 + $0x2f8] sm:$0xff] }
 0x39d   : > { %6444 = vmatmul.mubr.f32.gmra.mrb[20].mxu1 %v8981_v51 }
 0x39e   : > { %7191 = vmatpush3.bf16.msra.mxu1 %v7188_v16  ;;  %6446 = vmatprep.mubr.f32.mxu1 %v8983_v61  ;;  %v3755_v16 = vld [vmem:[#allocation11 + $0x210] sm:$0xff] }
 0x39f   : > { %7193 = vmatprep.subr.bf16.mxu1 %v7192_v24  ;;  %v7220_v0 = vpack.c.bf16 %v3756_v5, %v3755_v16  ;;  %v9037_v16 = vld [vmem:[#allocation4 + $0x10f] sm:$0xff] }
 0x3a1   : > { %6447 = vmatmul.mubr.f32.gmra.mrb[22].mxu1 %v8987_v29 }
 0x3a2   : > { %7195 = vmatpush3.bf16.msra.mxu1 %v7192_v24  ;;  %6449 = vmatprep.mubr.f32.mxu1 %v8989_v33  ;;  %v3757_v24 = vld [vmem:[#allocation11 + $0x220] sm:$0xff] }
 0x3a3   : > { %7197 = vmatprep.subr.bf16.mxu1 %v7196_v34  ;;  %v7224_v28 = vpack.c.bf16 %v3758_v17, %v3757_v24  ;;  %v3982_v24 = vld [vmem:[#allocation11 + $0x298] sm:$0xff] }
 0x3a5   : > { %6450 = vmatmul.mubr.f32.gmra.mrb[24].mxu1 %v8993_v43 }
 0x3a6   : > { %7199 = vmatpush3.bf16.msra.mxu1 %v7196_v34  ;;  %6452 = vmatprep.mubr.f32.mxu1 %v8995_v44  ;;  %v3759_v34 = vld [vmem:[#allocation11 + $0x230] sm:$0xff] }
 0x3a7   : > { %7201 = vmatprep.subr.bf16.mxu1 %v7200_v53 }
 0x3a9   : > { %6453 = vmatmul.mubr.f32.gmra.mrb[26].mxu1 %v8999_v4 }
 0x3aa   : > { %7203 = vmatpush3.bf16.msra.mxu1 %v7200_v53  ;;  %6455 = vmatprep.mubr.f32.mxu1 %v9001_v8  ;;  %v3762_v53 = vld [vmem:[#allocation11 + $0x248] sm:$0xff] }
 0x3ab   : > { %7205 = vmatprep.subr.bf16.mxu1 %v7204_v9 }
 0x3ad   : > { %6456 = vmatmul.mubr.f32.gmra.mrb[28].mxu1 %v9005_v27 }
 0x3ae   : > { %7207 = vmatpush3.bf16.msra.mxu1 %v7204_v9  ;;  %6458 = vmatprep.mubr.f32.mxu1 %v9007_v45  ;;  %v7236_v9 = vpack.c.bf16 %v3764_v56, %v3763_v54  ;;  %v3989_v54 = vld [vmem:[#allocation11 + $0x2d0] sm:$0xff]  ;;  %v3990_v56 = vld [vmem:[#allocation11 + $0x2d8] sm:$0xff] }
 0x3af   : > { %7209 = vmatprep.subr.bf16.mxu1 %v7208_v60 }
 0x3b1   : > { %6459 = vmatmul.mubr.f32.gmra.mrb[30].mxu1 %v9011_v22 }
 0x3b2   : > { %7211 = vmatpush3.bf16.msra.mxu1 %v7208_v60  ;;  %6461 = vmatprep.mubr.f32.mxu1 %v9013_v62  ;;  %v7240_v60 = vpack.c.bf16 %v3766_v21, %v3765_v19  ;;  %v3991_v19 = vld [vmem:[#allocation11 + $0x2e0] sm:$0xff]  ;;  %v3992_v21 = vld [vmem:[#allocation11 + $0x2e8] sm:$0xff] }
 0x3b3   : > { %7213 = vmatprep.subr.bf16.mxu1 %v7212_v40 }
 0x3b5   : > { %6462 = vmatmul.mubr.f32.gmra.mrb[32].mxu1 %v9017_v1 }
 0x3b6   : > { %7215 = vmatpush3.bf16.msra.mxu1 %v7212_v40  ;;  %6496 = vmatprep.mubr.f32.mxu1 %v8894_v30  ;;  %v7228_v30 = vpack.c.bf16 %v3760_v47, %v3759_v34  ;;  %v9033_v40 = vld [vmem:[#allocation4 + $0x107] sm:$0xff] }
 0x3b7   : > { %7217 = vmatprep.subr.bf16.mxu1 %v7216_v15  ;;  %v3984_v34 = vld [vmem:[#allocation11 + $0x2a8] sm:$0xff] }
 0x3b9   : > { %6497 = vmatmul.mubr.f32.vlgmr.msra.gmra.mrb[18].mxu1 %v8897_v46  ;;  %v7232_v46 = vpack.c.bf16 %v3762_v53, %v3761_v18  ;;  %v3986_v18 = vld [vmem:[#allocation11 + $0x2b8] sm:$0xff]  ;;  %v3987_v53 = vld [vmem:[#allocation11 + $0x2c0] sm:$0xff] }
 0x3ba   : > { %7219 = vmatpush3.bf16.msra.mxu1 %v7216_v15  ;;  %6499 = vmatprep.mubr.f32.mxu1 %v8899_v12  ;;  %v3980_v15 = vld [vmem:[#allocation11 + $0x288] sm:$0xff] }
 0x3bb   : > { %7221 = vmatprep.subr.bf16.mxu1 %v7220_v0  ;;  %v7248_v5 = vpack.c.bf16 %v3980_v15, %v3979_v59  ;;  %v7276_v59 = vpack.c.bf16 %v3994_v20, %v3993_v11  ;;  %v4205_v15 = vld [vmem:[#allocation11 + $0x300] sm:$0xff]  ;;  %v4219_v11 = vld [vmem:[#allocation11 + $0x370] sm:$0xff]  ;;  %v4220_v20 = vld [vmem:[#allocation11 + $0x378] sm:$0xff] }
 0x3bd   : > { %6500 = vmatmul.mubr.f32.gmra.mrb[20].mxu1 %v8903_v50 }
 0x3be   : > { %7223 = vmatpush3.bf16.msra.mxu1 %v7220_v0  ;;  %6502 = vmatprep.mubr.f32.mxu1 %v8905_v23  ;;  %v3981_v0 = vld [vmem:[#allocation11 + $0x290] sm:$0xff] }
 0x3bf   : > { %7225 = vmatprep.subr.bf16.mxu1 %v7224_v28  ;;  %v7252_v17 = vpack.c.bf16 %v3982_v24, %v3981_v0  ;;  %v9057_v0 = vld [vmem:[#allocation4 + $0x110] sm:$0xff] }
 0x3c1   : > { %6503 = vmatmul.mubr.f32.gmra.mrb[22].mxu1 %v8909_v25 }
 0x3c2   : > { %7227 = vmatpush3.bf16.msra.mxu1 %v7224_v28  ;;  %6505 = vmatprep.mubr.f32.mxu1 %v8911_v42  ;;  %v3983_v28 = vld [vmem:[#allocation11 + $0x2a0] sm:$0xff] }
 0x3c3   : > { %7229 = vmatprep.subr.bf16.mxu1 %v7228_v30  ;;  %v7256_v47 = vpack.c.bf16 %v3984_v34, %v3983_v28  ;;  %v4208_v28 = vld [vmem:[#allocation11 + $0x318] sm:$0xff] }
 0x3c5   : > { %6506 = vmatmul.mubr.f32.gmra.mrb[24].mxu1 %v8915_v3 }
 0x3c6   : > { %7231 = vmatpush3.bf16.msra.mxu1 %v7228_v30  ;;  %6508 = vmatprep.mubr.f32.mxu1 %v8917_v7  ;;  %v3985_v30 = vld [vmem:[#allocation11 + $0x2b0] sm:$0xff] }
 0x3c7   : > { %7233 = vmatprep.subr.bf16.mxu1 %v7232_v46 }
 0x3c9   : > { %6509 = vmatmul.mubr.f32.gmra.mrb[26].mxu1 %v8921_v6 }
 0x3ca   : > { %7235 = vmatpush3.bf16.msra.mxu1 %v7232_v46  ;;  %6511 = vmatprep.mubr.f32.mxu1 %v8923_v2  ;;  %v3988_v46 = vld [vmem:[#allocation11 + $0x2c8] sm:$0xff] }
 0x3cb   : > { %7237 = vmatprep.subr.bf16.mxu1 %v7236_v9 }
 0x3cd   : > { %6512 = vmatmul.mubr.f32.gmra.mrb[28].mxu1 %v8927_v26 }
 0x3ce   : > { %7239 = vmatpush3.bf16.msra.mxu1 %v7236_v9  ;;  %6514 = vmatprep.mubr.f32.mxu1 %v8929_v31  ;;  %v7268_v9 = vpack.c.bf16 %v3990_v56, %v3989_v54  ;;  %v4215_v54 = vld [vmem:[#allocation11 + $0x350] sm:$0xff]  ;;  %v4216_v56 = vld [vmem:[#allocation11 + $0x358] sm:$0xff] }
 0x3cf   : > { %7241 = vmatprep.subr.bf16.mxu1 %v7240_v60 }
 0x3d1   : > { %6515 = vmatmul.mubr.f32.gmra.mrb[30].mxu1 %v8933_v32 }
 0x3d2   : > { %7243 = vmatpush3.bf16.msra.mxu1 %v7240_v60  ;;  %6517 = vmatprep.mubr.f32.mxu1 %v9033_v40  ;;  %v7272_v60 = vpack.c.bf16 %v3992_v21, %v3991_v19  ;;  %v4217_v19 = vld [vmem:[#allocation11 + $0x360] sm:$0xff]  ;;  %v4218_v21 = vld [vmem:[#allocation11 + $0x368] sm:$0xff] }
 0x3d3   : > { %7245 = vmatprep.subr.bf16.mxu1 %v7244_v55 }
 0x3d5   : > { %6518 = vmatmul.mubr.f32.gmra.mrb[32].mxu1 %v9037_v16 }
 0x3d6   : > { %7247 = vmatpush3.bf16.msra.mxu1 %v7244_v55  ;;  %6552 = vmatprep.mubr.f32.mxu1 %v8936_v63  ;;  %v7260_v63 = vpack.c.bf16 %v3986_v18, %v3985_v30  ;;  %v9053_v55 = vld [vmem:[#allocation4 + $0x108] sm:$0xff] }
 0x3d7   : > { %7249 = vmatprep.subr.bf16.mxu1 %v7248_v5  ;;  %v4210_v30 = vld [vmem:[#allocation11 + $0x328] sm:$0xff] }
 0x3d9   : > { %6553 = vmatmul.mubr.f32.vlgmr.msra.gmra.mrb[18].mxu1 %v8939_v38  ;;  %v7264_v38 = vpack.c.bf16 %v3988_v46, %v3987_v53  ;;  %v4212_v53 = vld [vmem:[#allocation11 + $0x338] sm:$0xff]  ;;  %v4213_v46 = vld [vmem:[#allocation11 + $0x340] sm:$0xff] }
 0x3da   : > { %7251 = vmatpush3.bf16.msra.mxu1 %v7248_v5  ;;  %6555 = vmatprep.mubr.f32.mxu1 %v8941_v39  ;;  %v4206_v5 = vld [vmem:[#allocation11 + $0x308] sm:$0xff] }
 0x3db   : > { %7253 = vmatprep.subr.bf16.mxu1 %v7252_v17  ;;  %v7280_v24 = vpack.c.bf16 %v4206_v5, %v4205_v15  ;;  %v7308_v15 = vpack.c.bf16 %v4220_v20, %v4219_v11  ;;  %v4431_v5 = vld [vmem:[#allocation11 + $0x380] sm:$0xff]  ;;  %v4660_v11 = vld [vmem:[#allocation11 + $0x418] sm:$0xff]  ;;  %v4662_v20 = vld [vmem:[#allocation11 + $0x428] sm:$0xff] }
 0x3dd   : > { %6556 = vmatmul.mubr.f32.gmra.mrb[20].mxu1 %v8945_v48 }
 0x3de   : > { %7255 = vmatpush3.bf16.msra.mxu1 %v7252_v17  ;;  %6558 = vmatprep.mubr.f32.mxu1 %v8947_v49  ;;  %v4207_v17 = vld [vmem:[#allocation11 + $0x310] sm:$0xff] }
 0x3df   : > { %7257 = vmatprep.subr.bf16.mxu1 %v7256_v47  ;;  %v7284_v34 = vpack.c.bf16 %v4208_v28, %v4207_v17  ;;  %v9077_v17 = vld [vmem:[#allocation4 + $0x111] sm:$0xff] }
 0x3e1   : > { %6559 = vmatmul.mubr.f32.gmra.mrb[22].mxu1 %v8951_v57 }
 0x3e2   : > { %7259 = vmatpush3.bf16.msra.mxu1 %v7256_v47  ;;  %6561 = vmatprep.mubr.f32.mxu1 %v8953_v58  ;;  %v4209_v47 = vld [vmem:[#allocation11 + $0x320] sm:$0xff] }
 0x3e3   : > { %7261 = vmatprep.subr.bf16.mxu1 %v7260_v63  ;;  %v7288_v18 = vpack.c.bf16 %v4210_v30, %v4209_v47  ;;  %v4434_v47 = vld [vmem:[#allocation11 + $0x398] sm:$0xff] }
 0x3e5   : > { %6562 = vmatmul.mubr.f32.gmra.mrb[24].mxu1 %v8957_v13 }
 0x3e6   : > { %7263 = vmatpush3.bf16.msra.mxu1 %v7260_v63  ;;  %6564 = vmatprep.mubr.f32.mxu1 %v8959_v14  ;;  %v4211_v63 = vld [vmem:[#allocation11 + $0x330] sm:$0xff] }
 0x3e7   : > { %7265 = vmatprep.subr.bf16.mxu1 %v7264_v38 }
 0x3e9   : > { %6565 = vmatmul.mubr.f32.gmra.mrb[26].mxu1 %v8963_v36 }
 0x3ea   : > { %7267 = vmatpush3.bf16.msra.mxu1 %v7264_v38  ;;  %6567 = vmatprep.mubr.f32.mxu1 %v8965_v37  ;;  %v4214_v38 = vld [vmem:[#allocation11 + $0x348] sm:$0xff] }
 0x3eb   : > { %7269 = vmatprep.subr.bf16.mxu1 %v7268_v9 }
 0x3ed   : > { %6568 = vmatmul.mubr.f32.gmra.mrb[28].mxu1 %v8969_v10 }
 0x3ee   : > { %7271 = vmatpush3.bf16.msra.mxu1 %v7268_v9  ;;  %6570 = vmatprep.mubr.f32.mxu1 %v8971_v41  ;;  %v7300_v9 = vpack.c.bf16 %v4216_v56, %v4215_v54  ;;  %v4442_v54 = vld [vmem:[#allocation11 + $0x3d8] sm:$0xff]  ;;  %v4444_v56 = vld [vmem:[#allocation11 + $0x3e8] sm:$0xff] }
 0x3ef   : > { %7273 = vmatprep.subr.bf16.mxu1 %v7272_v60 }
 0x3f1   : > { %6571 = vmatmul.mubr.f32.gmra.mrb[30].mxu1 %v8975_v35 }
 0x3f2   : > { %7275 = vmatpush3.bf16.msra.mxu1 %v7272_v60  ;;  %6573 = vmatprep.mubr.f32.mxu1 %v9053_v55  ;;  %v7304_v60 = vpack.c.bf16 %v4218_v21, %v4217_v19  ;;  %v4657_v19 = vld [vmem:[#allocation11 + $0x400] sm:$0xff]  ;;  %v4658_v21 = vld [vmem:[#allocation11 + $0x408] sm:$0xff] }
 0x3f3   : > { %7277 = vmatprep.subr.bf16.mxu1 %v7276_v59 }
 0x3f5   : > { %6574 = vmatmul.mubr.f32.gmra.mrb[32].mxu1 %v9057_v0 }
 0x3f6   : > { %7279 = vmatpush3.bf16.msra.mxu1 %v7276_v59  ;;  %6608 = vmatprep.mubr.f32.mxu1 %v8978_v52  ;;  %v7292_v52 = vpack.c.bf16 %v4212_v53, %v4211_v63  ;;  %v9073_v59 = vld [vmem:[#allocation4 + $0x109] sm:$0xff] }
 0x3f7   : > { %7281 = vmatprep.subr.bf16.mxu1 %v7280_v24  ;;  %v4436_v63 = vld [vmem:[#allocation11 + $0x3a8] sm:$0xff] }
 0x3f9   : > { %6609 = vmatmul.mubr.f32.vlgmr.msra.gmra.mrb[18].mxu1 %v8981_v51  ;;  %v7296_v51 = vpack.c.bf16 %v4214_v38, %v4213_v46  ;;  %v4438_v46 = vld [vmem:[#allocation11 + $0x3b8] sm:$0xff]  ;;  %v4439_v38 = vld [vmem:[#allocation11 + $0x3c0] sm:$0xff] }
 0x3fa   : > { %7283 = vmatpush3.bf16.msra.mxu1 %v7280_v24  ;;  %6611 = vmatprep.mubr.f32.mxu1 %v8983_v61  ;;  %v4432_v24 = vld [vmem:[#allocation11 + $0x388] sm:$0xff] }
 0x3fb   : > { %7285 = vmatprep.subr.bf16.mxu1 %v7284_v34  ;;  %v7312_v28 = vpack.c.bf16 %v4432_v24, %v4431_v5  ;;  %v4664_v5 = vld [vmem:[#allocation11 + $0x438] sm:$0xff]  ;;  %v4665_v24 = vld [vmem:[#allocation11 + $0x440] sm:$0xff] }
 0x3fd   : > { %6612 = vmatmul.mubr.f32.gmra.mrb[20].mxu1 %v8987_v29 }
 0x3fe   : > { %7287 = vmatpush3.bf16.msra.mxu1 %v7284_v34  ;;  %6614 = vmatprep.mubr.f32.mxu1 %v8989_v33  ;;  %v4433_v34 = vld [vmem:[#allocation11 + $0x390] sm:$0xff] }
 0x3ff   : > { %7289 = vmatprep.subr.bf16.mxu1 %v7288_v18  ;;  %v7316_v30 = vpack.c.bf16 %v4434_v47, %v4433_v34  ;;  %v4668_v34 = vld [vmem:[#allocation11 + $0x458] sm:$0xff]  ;;  %v4670_v47 = vld [vmem:[#allocation11 + $0x468] sm:$0xff] }
 0x401   : > { %6615 = vmatmul.mubr.f32.gmra.mrb[22].mxu1 %v8993_v43 }
 0x402   : > { %7291 = vmatpush3.bf16.msra.mxu1 %v7288_v18  ;;  %6617 = vmatprep.mubr.f32.mxu1 %v8995_v44  ;;  %v4435_v18 = vld [vmem:[#allocation11 + $0x3a0] sm:$0xff] }
 0x403   : > { %7293 = vmatprep.subr.bf16.mxu1 %v7292_v52  ;;  %v7320_v53 = vpack.c.bf16 %v4436_v63, %v4435_v18 }
 0x405   : > { %6618 = vmatmul.mubr.f32.gmra.mrb[24].mxu1 %v8999_v4 }
 0x406   : > { %7295 = vmatpush3.bf16.msra.mxu1 %v7292_v52  ;;  %6620 = vmatprep.mubr.f32.mxu1 %v9001_v8  ;;  %v4437_v52 = vld [vmem:[#allocation11 + $0x3b0] sm:$0xff] }
 0x407   : > { %7297 = vmatprep.subr.bf16.mxu1 %v7296_v51 }
 0x409   : > { %6621 = vmatmul.mubr.f32.gmra.mrb[26].mxu1 %v9005_v27 }
 0x40a   : > { %7299 = vmatpush3.bf16.msra.mxu1 %v7296_v51  ;;  %6623 = vmatprep.mubr.f32.mxu1 %v9007_v45  ;;  %v4440_v51 = vld [vmem:[#allocation11 + $0x3c8] sm:$0xff] }
 0x40b   : > { %7301 = vmatprep.subr.bf16.mxu1 %v7300_v9 }
 0x40d   : > { %6624 = vmatmul.mubr.f32.gmra.mrb[28].mxu1 %v9011_v22 }
 0x40e   : > { %7303 = vmatpush3.bf16.msra.mxu1 %v7300_v9  ;;  %6626 = vmatprep.mubr.f32.mxu1 %v9013_v62  ;;  %v4446_v9 = vld [vmem:[#allocation11 + $0x3f8] sm:$0xff] }
 0x40f   : > { %7305 = vmatprep.subr.bf16.mxu1 %v7304_v60 }
 0x411   : > { %6627 = vmatmul.mubr.f32.gmra.mrb[30].mxu1 %v9017_v1 }
 0x412   : > { %7307 = vmatpush3.bf16.msra.mxu1 %v7304_v60  ;;  %6629 = vmatprep.mubr.f32.mxu1 %v9073_v59  ;;  %v4659_v60 = vld [vmem:[#allocation11 + $0x410] sm:$0xff] }
 0x413   : > { %7309 = vmatprep.subr.bf16.mxu1 %v7308_v15 }
 0x415   : > { %6630 = vmatmul.mubr.f32.gmra.mrb[32].mxu1 %v9077_v17 }
 0x416   : > { %7311 = vmatpush3.bf16.msra.mxu1 %v7308_v15  ;;  %6664 = vmatprep.mubr.f32.mxu1 %v8899_v12  ;;  %v7324_v12 = vpack.c.bf16 %v4438_v46, %v4437_v52  ;;  %v4663_v15 = vld [vmem:[#allocation11 + $0x430] sm:$0xff] }
 0x417   : > { %7313 = vmatprep.subr.bf16.mxu1 %v7312_v28 }
 0x419   : > { %6665 = vmatmul.mubr.f32.vlgmr.msra.gmra.mrb[18].mxu1 %v8903_v50  ;;  %v7328_v50 = vpack.c.bf16 %v4440_v51, %v4439_v38 }
 0x41a   : > { %7315 = vmatpush3.bf16.msra.mxu1 %v7312_v28  ;;  %6667 = vmatprep.mubr.f32.mxu1 %v8905_v23  ;;  %v4441_v23 = vld [vmem:[#allocation11 + $0x3d0] sm:$0xff]  ;;  %v4666_v28 = vld [vmem:[#allocation11 + $0x448] sm:$0xff] }
 0x41b   : > { %7317 = vmatprep.subr.bf16.mxu1 %v7316_v30 }
 0x41d   : > { %6668 = vmatmul.mubr.f32.gmra.mrb[20].mxu1 %v8909_v25  ;;  %v7332_v25 = vpack.c.bf16 %v4442_v54, %v4441_v23  ;;  %v4889_v54 = vld [vmem:[%s8446_s20 + $0x38] sm:$0xff] }
 0x41e   : > { %7319 = vmatpush3.bf16.msra.mxu1 %v7316_v30  ;;  %6670 = vmatprep.mubr.f32.mxu1 %v8911_v42  ;;  %v4443_v42 = vld [vmem:[#allocation11 + $0x3e0] sm:$0xff]  ;;  %v4672_v30 = vld [vmem:[#allocation11 + $0x478] sm:$0xff] }
 0x41f   : > { %7321 = vmatprep.subr.bf16.mxu1 %v7320_v53 }
 0x421   : > { %6671 = vmatmul.mubr.f32.gmra.mrb[22].mxu1 %v8915_v3  ;;  %v7336_v3 = vpack.c.bf16 %v4444_v56, %v4443_v42  ;;  %v4888_v56 = vld [vmem:[%s8446_s20 + $0x30] sm:$0xff] }
 0x422   : > { %7323 = vmatpush3.bf16.msra.mxu1 %v7320_v53  ;;  %6673 = vmatprep.mubr.f32.mxu1 %v8917_v7  ;;  %v4445_v7 = vld [vmem:[#allocation11 + $0x3f0] sm:$0xff]  ;;  %v4887_v53 = vld [vmem:[%s8446_s20 + $0x28] sm:$0xff] }
 0x423   : > { %7325 = vmatprep.subr.bf16.mxu1 %v7324_v12 }
 0x425   : > { %6674 = vmatmul.mubr.f32.gmra.mrb[24].mxu1 %v8921_v6  ;;  %v4202_v6 = vld [vmem:[#allocation4 + $0x127] sm:$0xff] }
 0x426   : > { %7327 = vmatpush3.bf16.msra.mxu1 %v7324_v12  ;;  %6676 = vmatprep.mubr.f32.mxu1 %v8923_v2  ;;  %v7340_v2 = vpack.c.bf16 %v4446_v9, %v4445_v7  ;;  %v4886_v12 = vld [vmem:[%s8446_s20 + $0x20] sm:$0xff] }
 0x427   : > { %7329 = vmatprep.subr.bf16.mxu1 %v7328_v50 }
 0x429   : > { %6677 = vmatmul.mubr.f32.gmra.mrb[26].mxu1 %v8927_v26  ;;  %v4203_v26 = vld [vmem:[#allocation4 + $0x12f] sm:$0xff] }
 0x42a   : > { %7331 = vmatpush3.bf16.msra.mxu1 %v7328_v50  ;;  %6679 = vmatprep.mubr.f32.mxu1 %v8929_v31  ;;  %v7344_v31 = vpack.c.bf16 %v4658_v21, %v4657_v19 }
 0x42b   : > { %7333 = vmatprep.subr.bf16.mxu1 %v7332_v25 }
 0x42d   : > { %6680 = vmatmul.mubr.f32.gmra.mrb[28].mxu1 %v8933_v32  ;;  %v7348_v32 = vpack.c.bf16 %v4660_v11, %v4659_v60 }
 0x42e   : > { %7335 = vmatpush3.bf16.msra.mxu1 %v7332_v25  ;;  %6682 = vmatprep.mubr.f32.mxu1 %v9033_v40  ;;  %v4661_v40 = vld [vmem:[#allocation11 + $0x420] sm:$0xff] }
 0x42f   : > { %7337 = vmatprep.subr.bf16.mxu1 %v7336_v3 }
 0x431   : > { %6683 = vmatmul.mubr.f32.gmra.mrb[30].mxu1 %v9037_v16  ;;  %v7352_v16 = vpack.c.bf16 %v4662_v20, %v4661_v40  ;;  %v4893_v40 = vld [vmem:[%s8446_s20 + $0x58] sm:$0xff] }
 0x432   : > { %7339 = vmatpush3.bf16.msra.mxu1 %v7336_v3  ;;  %6685 = vmatprep.mubr.f32.mxu1 %v4202_v6 }
 0x433   : > { %7341 = vmatprep.subr.bf16.mxu1 %v7340_v2 }
 0x435   : > { %6686 = vmatmul.mubr.f32.gmra.mrb[32].mxu1 %v4203_v26  ;;  %v4890_v26 = vld [vmem:[%s8446_s20 + $0x40] sm:$0xff] }
 0x436   : > { %7343 = vmatpush3.bf16.msra.mxu1 %v7340_v2  ;;  %6720 = vmatprep.mubr.f32.mxu1 %v8941_v39  ;;  %v7356_v39 = vpack.c.bf16 %v4664_v5, %v4663_v15  ;;  %v4891_v2 = vld [vmem:[%s8446_s20 + $0x48] sm:$0xff]  ;;  %v4892_v15 = vld [vmem:[%s8446_s20 + $0x50] sm:$0xff] }
 0x437   : > { %7345 = vmatprep.subr.bf16.mxu1 %v7344_v31 }
 0x439   : > { %6721 = vmatmul.mubr.f32.vlgmr.msra.gmra.mrb[18].mxu1 %v8945_v48  ;;  %v7360_v48 = vpack.c.bf16 %v4666_v28, %v4665_v24 }
 0x43a   : > { %7347 = vmatpush3.bf16.msra.mxu1 %v7344_v31  ;;  %6723 = vmatprep.mubr.f32.mxu1 %v8947_v49  ;;  %v4667_v49 = vld [vmem:[#allocation11 + $0x450] sm:$0xff] }
 0x43b   : > { %7349 = vmatprep.subr.bf16.mxu1 %v7348_v32 }
 0x43d   : > { %6724 = vmatmul.mubr.f32.gmra.mrb[20].mxu1 %v8951_v57  ;;  %v7364_v57 = vpack.c.bf16 %v4668_v34, %v4667_v49 }
 0x43e   : > { %7351 = vmatpush3.bf16.msra.mxu1 %v7348_v32  ;;  %6726 = vmatprep.mubr.f32.mxu1 %v8953_v58  ;;  %v4669_v58 = vld [vmem:[#allocation11 + $0x460] sm:$0xff] }
 0x43f   : > { %7353 = vmatprep.subr.bf16.mxu1 %v7352_v16 }
 0x441   : > { %6727 = vmatmul.mubr.f32.gmra.mrb[22].mxu1 %v8957_v13  ;;  %v7368_v13 = vpack.c.bf16 %v4670_v47, %v4669_v58 }
 0x442   : > { %7355 = vmatpush3.bf16.msra.mxu1 %v7352_v16  ;;  %6729 = vmatprep.mubr.f32.mxu1 %v8959_v14  ;;  %v4671_v14 = vld [vmem:[#allocation11 + $0x470] sm:$0xff] }
 0x443   : > { %7357 = vmatprep.subr.bf16.mxu1 %v7356_v39 }
 0x445   : > { %6730 = vmatmul.mubr.f32.gmra.mrb[24].mxu1 %v8963_v36  ;;  %v4428_v36 = vld [vmem:[#allocation4 + $0x128] sm:$0xff] }
 0x446   : > { %7359 = vmatpush3.bf16.msra.mxu1 %v7356_v39  ;;  %6732 = vmatprep.mubr.f32.mxu1 %v8965_v37  ;;  %v7372_v37 = vpack.c.bf16 %v4672_v30, %v4671_v14  ;;  %v4897_v30 = vld [vmem:[%s8446_s20 + $0x78] sm:$0xff] }
 0x447   : > { %7361 = vmatprep.subr.bf16.mxu1 %v7360_v48 }
 0x449   : > { %6733 = vmatmul.mubr.f32.gmra.mrb[26].mxu1 %v8969_v10  ;;  %v4429_v10 = vld [vmem:[#allocation4 + $0x130] sm:$0xff] }
 0x44a   : > { %7363 = vmatpush3.bf16.msra.mxu1 %v7360_v48  ;;  %6735 = vmatprep.mubr.f32.mxu1 %v8971_v41  ;;  %v4654_v41 = vld [vmem:[#allocation4 + $0x129] sm:$0xff] }
 0x44b   : > { %7365 = vmatprep.subr.bf16.mxu1 %v7364_v57  ;;  %v4895_v48 = vld [vmem:[%s8446_s20 + $0x68] sm:$0xff] }
 0x44d   : > { %6736 = vmatmul.mubr.f32.gmra.mrb[28].mxu1 %v8975_v35  ;;  %v4655_v35 = vld [vmem:[#allocation4 + $0x131] sm:$0xff] }
 0x44e   : > { %7367 = vmatpush3.bf16.msra.mxu1 %v7364_v57  ;;  %6738 = vmatprep.mubr.f32.mxu1 %v9053_v55  ;;  %v4894_v57 = vld [vmem:[%s8446_s20 + $0x60] sm:$0xff] }
 0x44f   : > { %7369 = vmatprep.subr.bf16.mxu1 %v7368_v13 }
 0x451   : > { %6739 = vmatmul.mubr.f32.gmra.mrb[30].mxu1 %v9057_v0  ;;  %v4884_v0 = vld [vmem:[%s8446_s20 + $0x10] sm:$0xff] }
 0x452   : > { %7371 = vmatpush3.bf16.msra.mxu1 %v7368_v13  ;;  %6741 = vmatprep.mubr.f32.mxu1 %v4428_v36 }
 0x453   : > { %7373 = vmatprep.subr.bf16.mxu1 %v7372_v37 }
 0x455   : > { %6742 = vmatmul.mubr.f32.gmra.mrb[32].mxu1 %v4429_v10  ;;  %v4896_v10 = vld [vmem:[%s8446_s20 + $0x70] sm:$0xff] }
 0x456   : > { %7375 = vmatpush3.bf16.msra.mxu1 %v7372_v37  ;;  %6776 = vmatprep.mubr.f32.mxu1 %v8983_v61  ;;  %v9125_v61 = vld [vmem:[%s9325_s30] ss:$0 sm:$0xff] }
 0x459   : > { %6777 = vmatmul.mubr.f32.vlgmr.msra.gmra.mrb[18].mxu1 %v8987_v29 }
 0x45a   : > { %6779 = vmatprep.mubr.f32.mxu1 %v8989_v33  ;;  %v4883_v33 = vld [vmem:[%s8446_s20 + $0x8] sm:$0xff] }
 0x45d   : > { %6780 = vmatmul.mubr.f32.gmra.mrb[20].mxu1 %v8993_v43 }
 0x45e   : > { %6782 = vmatprep.mubr.f32.mxu1 %v8995_v44 }
 0x461   : > { %6783 = vmatmul.mubr.f32.gmra.mrb[22].mxu1 %v8999_v4  ;;  %v4882_v4 = vld [vmem:[%s8446_s20] sm:$0xff] }
 0x462   : > { %6785 = vmatprep.mubr.f32.mxu1 %v9001_v8 }
 0x465   : > { %6786 = vmatmul.mubr.f32.gmra.mrb[24].mxu1 %v9005_v27 }
 0x466   : > { %6788 = vmatprep.mubr.f32.mxu1 %v9007_v45 }
 0x469   : > { %6789 = vmatmul.mubr.f32.gmra.mrb[26].mxu1 %v9011_v22 }
 0x46a   : > { %6791 = vmatprep.mubr.f32.mxu1 %v9013_v62  ;;  %v4885_v62 = vld [vmem:[%s8446_s20 + $0x18] sm:$0xff]  ;;  %s8190_s20 = smov [#allocation12]  }
 0x46b   : > { %s8073_s11 = sshll.u32 %s8190_s20, 4  ;;  %s8074_s11 = int_to_ptr.vmem [resolvable:$false] %s8073_s11 }
 0x46c   : > { %s8075_s8 = scalar_lea.vmem %s8074_s11, 4096  ;;  %p8076_p3 = scmp.lt.s32.totalorder %s9181_s25, %s8074_s11 }
 0x46d   : > { %6792 = vmatmul.mubr.f32.gmra.mrb[28].mxu1 %v9017_v1  ;;  %p8077_p7 = scmp.lt.s32.totalorder %s8075_s8, %s8069_s0 }
 0x46e   : > { %6794 = vmatprep.mubr.f32.mxu1 %v9073_v59 }
 0x46f   : > { %p8078_p12 = por %p8077_p7, %p8076_p3 }
 0x471   : > { %6795 = vmatmul.mubr.f32.gmra.mrb[30].mxu1 %v9077_v17  ;;  %p8079_p1 = pnand %p8078_p12, %p8072_p13 }
 0x472   : > { %6797 = vmatprep.mubr.f32.mxu1 %v4654_v41 }
 0x475   : > { %6798 = vmatmul.mubr.f32.gmra.mrb[32].mxu1 %v4655_v35 }
 0x52c   : > { %v6778_v29 = vpop.f32.mrb[18].mxu1 }
 0x52d   : > { %v7508_v43 = vadd.f32 %v6778_v29, %v9125_v61  ;;  %v4739_v44 = vpop.f32.mrb[19].mxu1 }
 0x52e   : > { %v7511_v8 = vadd.f32 %v9125_v61, %v4739_v44 }
 0x52f   : > { %v4899_v27 = vadd.f32 %v7508_v43, %v4883_v33 }
 0x530   : > { %v4898_v45 = vadd.f32 %v7511_v8, %v4882_v4  ;;  %v6781_v22 = vpop.f32.mrb[20].mxu1 }
 0x531   : > { %4915 = vst [vmem:[%s8475_s7 + $0x8] sm:$0xff] %v4899_v27  ;;  %v7514_v1 = vadd.f32 %v6781_v22, %v9125_v61  ;;  %v4749_v55 = vpop.f32.mrb[21].mxu1 }
 0x532   : > { %4914 = vst [vmem:[%s8475_s7] sm:$0xff] %v4898_v45  ;;  %v7517_v59 = vadd.f32 %v9125_v61, %v4749_v55 }
 0x533   : > { %v4901_v17 = vadd.f32 %v7514_v1, %v4885_v62 }
 0x534   : > { %v4900_v18 = vadd.f32 %v7517_v59, %v4884_v0  ;;  %v6784_v63 = vpop.f32.mrb[22].mxu1 }
 0x535   : > { %4917 = vst [vmem:[%s8475_s7 + $0x18] sm:$0xff] %v4901_v17  ;;  %v7520_v52 = vadd.f32 %v6784_v63, %v9125_v61  ;;  %v4759_v46 = vpop.f32.mrb[23].mxu1 }
 0x536   : > { %4916 = vst [vmem:[%s8475_s7 + $0x10] sm:$0xff] %v4900_v18  ;;  %v7523_v38 = vadd.f32 %v9125_v61, %v4759_v46 }
 0x537   : > { %v4903_v51 = vadd.f32 %v7520_v52, %v4887_v53 }
 0x538   : > { %v4902_v50 = vadd.f32 %v7523_v38, %v4886_v12  ;;  %v6787_v23 = vpop.f32.mrb[24].mxu1 }
 0x539   : > { %4919 = vst [vmem:[%s8475_s7 + $0x28] sm:$0xff] %v4903_v51  ;;  %v7526_v25 = vadd.f32 %v6787_v23, %v9125_v61  ;;  %v4769_v42 = vpop.f32.mrb[25].mxu1 }
 0x53a   : > { %4918 = vst [vmem:[%s8475_s7 + $0x20] sm:$0xff] %v4902_v50  ;;  %v7529_v3 = vadd.f32 %v9125_v61, %v4769_v42 }
 0x53b   : > { %v4905_v7 = vadd.f32 %v7526_v25, %v4889_v54 }
 0x53c   : > { %v4904_v9 = vadd.f32 %v7529_v3, %v4888_v56  ;;  %v6790_v6 = vpop.f32.mrb[26].mxu1 }
 0x53d   : > { %4921 = vst [vmem:[%s8475_s7 + $0x38] sm:$0xff] %v4905_v7  ;;  %v7532_v19 = vadd.f32 %v6790_v6, %v9125_v61  ;;  %v4779_v21 = vpop.f32.mrb[27].mxu1 }
 0x53e   : > { %4920 = vst [vmem:[%s8475_s7 + $0x30] sm:$0xff] %v4904_v9  ;;  %v7535_v31 = vadd.f32 %v9125_v61, %v4779_v21 }
 0x53f   : > { %v4907_v60 = vadd.f32 %v7532_v19, %v4891_v2 }
 0x540   : > { %v4906_v11 = vadd.f32 %v7535_v31, %v4890_v26  ;;  %v6793_v32 = vpop.f32.mrb[28].mxu1 }
 0x541   : > { %4923 = vst [vmem:[%s8475_s7 + $0x48] sm:$0xff] %v4907_v60  ;;  %v7538_v20 = vadd.f32 %v6793_v32, %v9125_v61  ;;  %v4789_v16 = vpop.f32.mrb[29].mxu1 }
 0x542   : > { %4922 = vst [vmem:[%s8475_s7 + $0x40] sm:$0xff] %v4906_v11  ;;  %v7541_v5 = vadd.f32 %v9125_v61, %v4789_v16 }
 0x543   : > { %v4909_v39 = vadd.f32 %v7538_v20, %v4893_v40 }
 0x544   : > { %v4908_v24 = vadd.f32 %v7541_v5, %v4892_v15  ;;  %v6796_v28 = vpop.f32.mrb[30].mxu1 }
 0x545   : > { %4925 = vst [vmem:[%s8475_s7 + $0x58] sm:$0xff] %v4909_v39  ;;  %v7544_v49 = vadd.f32 %v6796_v28, %v9125_v61  ;;  %v4799_v34 = vpop.f32.mrb[31].mxu1 }
 0x546   : > { %4924 = vst [vmem:[%s8475_s7 + $0x50] sm:$0xff] %v4908_v24  ;;  %v7547_v58 = vadd.f32 %v9125_v61, %v4799_v34 }
 0x547   : > { %v4911_v47 = vadd.f32 %v7544_v49, %v4895_v48 }
 0x548   : > { %v4910_v13 = vadd.f32 %v7547_v58, %v4894_v57  ;;  %v6799_v14 = vpop.f32.mrb[32].mxu1 }
 0x549   : > { %4927 = vst [vmem:[%s8475_s7 + $0x68] sm:$0xff] %v4911_v47  ;;  %v7550_v36 = vadd.f32 %v6799_v14, %v9125_v61  ;;  %v4809_v37 = vpop.f32.mrb[33].mxu1 }
 0x54a   : > { %4926 = vst [vmem:[%s8475_s7 + $0x60] sm:$0xff] %v4910_v13  ;;  %v7553_v41 = vadd.f32 %v9125_v61, %v4809_v37 }
 0x54b   : > { %v4913_v35 = vadd.f32 %v7550_v36, %v4897_v30 }
 0x54c   : > { %v4912_v29 = vadd.f32 %v7553_v41, %v4896_v10 }
 0x54d   : > { %4929 = vst [vmem:[%s8475_s7 + $0x78] sm:$0xff] %v4913_v35 }
 0x54e   : > { %4928 = vst [vmem:[%s8475_s7 + $0x70] sm:$0xff] %v4912_v29 }
 0x54f   : > { %8082 = shalt.err (!%p8079_p1)
}
 0x550   : > { %s8083_s7 = scalar_lea.hbm %s9179_s5, 2048  ;;  %s8087_s29 = scalar_lea.hbm %s9327_s10, 8192 }
 0x551   : > { %p8084_p2 = scmp.ne.s32.totalorder %s9179_s5, %s8083_s7  ;;  %p8088_p0 = scmp.lt.u32.totalorder %s9179_s5, %s9327_s10 }
 0x552   : > { %p8089_p4 = scmp.lt.u32.totalorder %s8087_s29, %s8083_s7  ;;  %p8091_p6 = scmp.lt.u32.totalorder %s8083_s7, %s9179_s5 }
 0x553   : > { %p8085_p5 = pnand %p8084_p2, %p8376_p8 }
 0x554   : > { %p8090_p10 = por %p8089_p4, %p8088_p0 }
 0x555   : > { %p8086_p9 = pneg %p8085_p5 }
 0x556   : > { %p8092_p11 = por %p8091_p6, %p8090_p10 }
 0x558   : > { %p8093_p13 = pnand %p8092_p11, %p8086_p9 }
 0x55a   : > { %8096 = shalt.err (!%p8093_p13)
}
 0x55b   : > { %s8191_s12 = smov 128   ;;  %s8192_s15 = smov 8  }
 0x55c   : > { %7834 = dma.vmem_to_hbm [thread:$0]  (%p8376_p8), %s9181_s25, 2048, %s9179_s5, %s4931_s9, %s8191_s12, %s8191_s12, %s8192_s15  }
 0x55d PF: > { %s9328_s13 = sld [smem:[#allocation24_spill]]  ;;  %s9329_s24 = sld [smem:[#allocation25_spill]] }
 0x55e   : > { %p7856_p3 = scmp.ge.s32.totalorder %s8175_s28, 2 }
 0x563   : > { %s4962_s21 = sand.u32 1, %s9328_s13   ;;  %p9330_p7 = scmp.ne.s32.totalorder %s9329_s24, 0 }
 0x564   : > { %s4963_s4 = scalar_lea.sflag [#allocation8], %s4962_s21 }
 0x565   : > { %p7848_p12 = pnand %p7856_p3, %p9330_p7 }
 0x567   : > { %8142 = dma.done.wait (!%p7848_p12), %s4963_s4, 2048  }
 0x568   : > { %8144 = vsyncadd (!%p7848_p12), %s4963_s4, 4294965248  ;;  %s23_s28 = sadd.s32 1, %s8175_s28   ;;  %s9331_s18 = sld [smem:[#allocation26_spill]] }
 0x569   : > { %p20_p1 = scmp.ge.s32.totalorder %s23_s28, 6   ;;  %s9332_s21 = smov %s8151_s22 }
 0x56a   : > { %s9333_s22 = smov %s8155_s23  ;;  %s9334_s23 = smov %s8389_s2 }
 0x56b   : > { %s9335_s24 = smov %s8167_s26  ;;  %s9336_s25 = smov %s8171_s27 }
 0x56c   : > { %s9338_s27 = smov %s9344_s14  ;;  %22 = sbr.rel (!%p20_p1) target bundleno = 14 (0xe), region = 151 }
 0x56e   : > { %s9337_s26 = smov %s9331_s18 }
 0x573   :  { %4968 = vsyncpa [#allocation7], 1 }
 0x574   :  { %4970 = vsyncpa [#allocation7 + $0x1], 1 }
 0x575   :  { %4971 = vsyncpa [#allocation10], 1 }
 0x576   :  { %4972 = vsyncpa [#allocation8], 1 }
 0x577   :  { %4974 = vsyncpa [#allocation8 + $0x1], 1 }
 0x578   :  { %4975 = vsyncmov [#allocation3] }
 0x57b   :  { %s4976_s6 = vpop.sfrf %4975 }
 0x57c   :  { %p5121_p8 = scmp.ne.s32.totalorder %s4976_s6, 0 }
 0x57e   :  { %4980 = shalt.err (%p5121_p8)  }
 0x57f   :  { %4982 = vsyncmov [#allocation3 + $0x1] }
 0x582   :  { %s4983_s2 = vpop.sfrf %4982 }
 0x583   :  { %p5122_p2 = scmp.ne.s32.totalorder %s4983_s2, 0 }
 0x585   :  { %4987 = shalt.err (%p5122_p2)  }

</bundles_post_ra>
